<compile_context>
chip_gen: v5e
topology: v5e:2x2
jax: 0.10.0
libtpu: 0.0.40
codegen_flags: <defaults>
</compile_context>

<pallas_src>
import math
import numpy as np
import jax
import jax.numpy as jnp
from jax.experimental import pallas as pl
from jax.experimental.pallas import tpu as pltpu


def make_params(key, E, H, L, out_dim):
    """Deterministic params matching PyTorch shapes (transposed for the kernel)."""
    scale = 1.0 / math.sqrt(H)

    def u(k, shape, s):
        return jax.random.uniform(k, shape, jnp.float32, -s, s)

    w_ih, w_hh, bias = [], [], []
    for l in range(L):
        in_dim = E if l == 0 else 2 * H
        for _d in range(2):  # forward / reverse
            key, k1, k2, k3, k4 = jax.random.split(key, 5)
            wi = u(k1, (4 * H, in_dim), scale)   # weight_ih_l{l}(_reverse)
            wh = u(k2, (4 * H, H), scale)        # weight_hh_l{l}(_reverse)
            bi = u(k3, (4 * H,), scale)
            bh = u(k4, (4 * H,), scale)
            # transpose + zero-pad input dim up to 2H so all layers share one shape
            wi_t = jnp.zeros((2 * H, 4 * H), jnp.float32).at[:in_dim].set(wi.T)
            w_ih.append(wi_t)
            w_hh.append(wh.T)
            bias.append((bi + bh)[None, :])
    w_ih_all = jnp.stack(w_ih).reshape(L, 2, 2 * H, 4 * H)
    w_hh_all = jnp.stack(w_hh).reshape(L, 2, H, 4 * H)
    b_all = jnp.stack(bias).reshape(L, 2, 1, 4 * H)

    # Head: Linear(2H,64) -> ReLU -> Linear(64,32) -> Dropout -> ReLU -> Linear(32,out_dim)
    def lin(k, fan_in, fan_out):
        s = 1.0 / math.sqrt(fan_in)
        k1, k2 = jax.random.split(k)
        return (jax.random.uniform(k1, (fan_in, fan_out), jnp.float32, -s, s),
                jax.random.uniform(k2, (1, fan_out), jnp.float32, -s, s))

    key, k1, k2, k3 = jax.random.split(key, 4)
    w1, b1 = lin(k1, 2 * H, 64)
    w2, b2 = lin(k2, 64, 32)
    w3, b3 = lin(k3, 32, out_dim)
    return dict(w_ih=w_ih_all, w_hh=w_hh_all, b=b_all,
                w1=w1, b1=b1, w2=w2, b2=b2, w3=w3, b3=b3)


def ndo_forward(x, params, H, L):
    """Pallas implementation of Model.forward(x) with hidden=None (eval mode)."""
    B, S, E = x.shape
    out_dim = params["w3"].shape[1]
    H2, H4, H8 = 2 * H, 4 * H, 8 * H
    HEAD1, HEAD2 = 64, 32
    assert H8 >= HEAD1, "g_scr is reused as head staging; needs 8H >= 64"
    Bp = max(8, ((B + 7) // 8) * 8)          # pad batch to a sublane tile
    OUT_PAD = ((out_dim + 127) // 128) * 128  # lane-dense final output

    # ---- wrapper-side glue / weight repacking (no per-step compute) ---------
    # time-major, batch- and feature-padded input, flattened to (S*Bp, 2H)
    x_tm = jnp.transpose(x.astype(jnp.float32), (1, 0, 2))          # (S, B, E)
    xp = jnp.zeros((S, Bp, H2), jnp.float32).at[:, :B, :E].set(x_tm).reshape(S * Bp, H2)

    # Fold the tanh-form sigmoid pre-scale (0.5) into the i/f/o gate columns.
    s4 = jnp.concatenate([jnp.full((H,), 0.5), jnp.full((H,), 0.5),
                          jnp.ones((H,)), jnp.full((H,), 0.5)]).astype(jnp.float32)
    wi = params["w_ih"] * s4        # (L, 2, 2H, 4H)
    wh = params["w_hh"] * s4        # (L, 2, H, 4H)
    bb = params["b"] * s4           # (L, 2, 1, 4H)

    def fuse_dirs(a_f, a_r):
        # (..., 4H) per-direction -> (..., 8H) gate-grouped, dir-interleaved:
        # fused col (q*2H + d*H + j)  <-  direction d, gate q, unit j.
        sh = a_f.shape[:-1]
        return jnp.concatenate([a_f.reshape(sh + (4, 1, H)),
                                a_r.reshape(sh + (4, 1, H))], axis=-2).reshape(sh + (H8,))

    zeros_h4 = jnp.zeros((H, H4), jnp.float32)
    w_a_l, w_b_l, w_hh_l, b_l = [], [], [], []
    for l in range(L):
        wf, wr = wi[l, 0], wi[l, 1]                       # (2H, 4H)
        if l == 0:
            # layer 0 input is NOT swizzled (raw padded x, same for both dirs)
            a_fwd, a_rev = wf, jnp.zeros_like(wr)
            b_fwd, b_rev = jnp.zeros_like(wf), wr
        else:
            # layer input rows are swizzled: row u = [h_fwd(u) | h_rev(S-1-u)];
            # g_scr[t] = (P@W_A)[t] + (P@W_B)[S-1-t] reconstructs the true gates.
            a_fwd = jnp.concatenate([wf[:H], zeros_h4], axis=0)   # h_fwd(t)  -> fwd cols
            a_rev = jnp.concatenate([zeros_h4, wr[H:]], axis=0)   # h_rev(S-1-t) -> rev cols
            b_fwd = jnp.concatenate([zeros_h4, wf[H:]], axis=0)   # h_rev(t)  -> fwd cols
            b_rev = jnp.concatenate([wr[:H], zeros_h4], axis=0)   # h_fwd(S-1-t) -> rev cols
        w_a_l.append(fuse_dirs(a_fwd, a_rev))
        w_b_l.append(fuse_dirs(b_fwd, b_rev))
        # block-diagonal fused recurrent weights: h_fwd feeds only fwd columns,
        # h_rev only rev columns -> one (2H,8H) matmul per step covers both dirs.
        w_hh_l.append(fuse_dirs(jnp.concatenate([wh[l, 0], zeros_h4], axis=0),
                                jnp.concatenate([zeros_h4, wh[l, 1]], axis=0)))
        b_l.append(fuse_dirs(bb[l, 0], bb[l, 1]))
    w_a = jnp.stack(w_a_l)          # (L, 2H, 8H)
    w_b = jnp.stack(w_b_l)          # (L, 2H, 8H)
    w_hh_blk = jnp.stack(w_hh_l)    # (L, 2H, 8H)
    b8 = jnp.stack(b_l)             # (L, 1, 8H)

    # Head Linear(2H,64) split the same way to absorb the final swizzle.
    w1a = params["w1"].at[H:].set(0.0)     # multiplies h_fwd(t)     (row t)
    w1b = params["w1"].at[:H].set(0.0)     # multiplies h_rev(t)     (row S-1-t)
    w3p = jnp.zeros((HEAD2, OUT_PAD), jnp.float32).at[:, :out_dim].set(params["w3"])
    b3p = jnp.zeros((1, OUT_PAD), jnp.float32).at[:, :out_dim].set(params["b3"])

    def kernel(x_ref, wa_ref, wb_ref, whh_ref, b_ref,
               w1a_ref, w1b_ref, b1_ref, w2_ref, b2_ref, w3_ref, b3_ref,
               y_ref, hn_ref, cn_ref,
               p_a, p_b, g_scr, gb_scr):
        bufs = (p_a, p_b)
        in_ref = x_ref                       # layer 0 reads the kernel input directly
        for l in range(L):                   # static loop over layers
            out_ref = bufs[l % 2]
            x_in = in_ref[...]               # (S*Bp, 2H)
            # Hoisted input projection (both directions, all timesteps, + bias),
            # split into A/B so the reverse-direction time flip is a pure
            # row-block-aligned add. Spill to VMEM to keep vreg pressure low.
            ga = jnp.dot(x_in, wa_ref[l], preferred_element_type=jnp.float32) + b_ref[l]
            gb_scr[...] = jnp.dot(x_in, wb_ref[l], preferred_element_type=jnp.float32)
            for t in range(S):
                tb = S - 1 - t
                g_scr[t * Bp:(t + 1) * Bp, :] = (ga[t * Bp:(t + 1) * Bp, :]
                                                 + gb_scr[tb * Bp:(tb + 1) * Bp, :])

            whh_l2 = whh_ref[l]              # (2H, 8H), loop-invariant
            h_fb = jnp.zeros((Bp, H2), jnp.float32)   # [h_fwd | h_rev]
            c_fb = jnp.zeros((Bp, H2), jnp.float32)
            # Fully unrolled time loop; ONE fused MXU dot + ONE fused tanh per step.
            for t in range(S):
                gs = (g_scr[t * Bp:(t + 1) * Bp, :]
                      + jnp.dot(h_fb, whh_l2, preferred_element_type=jnp.float32))
                ta = jnp.tanh(gs)            # single EUP pass over all 8 gate groups
                i_g = ta[:, 0 * H2:1 * H2] * 0.5 + 0.5     # sigmoid via tanh identity
                f_g = ta[:, 1 * H2:2 * H2] * 0.5 + 0.5
                g_g = ta[:, 2 * H2:3 * H2]
                o_g = ta[:, 3 * H2:4 * H2] * 0.5 + 0.5
                c_fb = f_g * c_fb + i_g * g_g
                h_fb = o_g * jnp.tanh(c_fb)
                # swizzled layout: row block t holds [h_fwd(t) | h_rev(S-1-t)]
                out_ref[t * Bp:(t + 1) * Bp, :] = h_fb

            hn_ref[l * Bp:(l + 1) * Bp, :] = h_fb    # dense (8, 2H) full-row stores
            cn_ref[l * Bp:(l + 1) * Bp, :] = c_fb
            in_ref = out_ref

        # MLP head over the whole sequence (dropout == identity at eval).
        # First Linear absorbs the swizzle of the last layer's output buffer.
        z = in_ref[...]                                          # (S*Bp, 2H) swizzled
        ha = jnp.dot(z, w1a_ref[...], preferred_element_type=jnp.float32) + b1_ref[...]
        hb = jnp.dot(z, w1b_ref[...], preferred_element_type=jnp.float32)
        for t in range(S):
            tb = S - 1 - t
            g_scr[t * Bp:(t + 1) * Bp, 0:HEAD1] = jnp.maximum(
                ha[t * Bp:(t + 1) * Bp, :] + hb[tb * Bp:(tb + 1) * Bp, :], 0.0)
        h1 = g_scr[:, 0:HEAD1]
        h2 = jnp.maximum(jnp.dot(h1, w2_ref[...],
                                 preferred_element_type=jnp.float32) + b2_ref[...], 0.0)
        y_ref[...] = jnp.dot(h2, w3_ref[...],
                             preferred_element_type=jnp.float32) + b3_ref[...]

    vmem = pl.BlockSpec(memory_space=pltpu.MemorySpace.VMEM)
    y2d, hn_slab, cn_slab = pl.pallas_call(
        kernel,
        out_shape=(jax.ShapeDtypeStruct((S * Bp, OUT_PAD), jnp.float32),
                   jax.ShapeDtypeStruct((L * Bp, H2), jnp.float32),
                   jax.ShapeDtypeStruct((L * Bp, H2), jnp.float32)),
        in_specs=[vmem] * 12,
        out_specs=(vmem, vmem, vmem),
        # Whole-sequence-resident design: total footprint < 1 MiB, far below the
        # scoped-VMEM default on v5e/v6e/v7x; stream in S-chunks only if scaling up.
        scratch_shapes=[pltpu.VMEM((S * Bp, H2), jnp.float32),   # ping seq buffer
                        pltpu.VMEM((S * Bp, H2), jnp.float32),   # pong seq buffer
                        pltpu.VMEM((S * Bp, H8), jnp.float32),   # fused gate inputs
                        pltpu.VMEM((S * Bp, H8), jnp.float32)],  # rev-half projection
    )(xp, w_a, w_b, w_hh_blk, b8,
      w1a, w1b, params["b1"], params["w2"], params["b2"], w3p, b3p)

    y = jnp.transpose(y2d.reshape(S, Bp, OUT_PAD)[:, :B, :out_dim], (1, 0, 2))
    h_n = hn_slab.reshape(L, Bp, 2, H).transpose(0, 2, 1, 3).reshape(2 * L, Bp, H)[:, :B]
    c_n = cn_slab.reshape(L, Bp, 2, H).transpose(0, 2, 1, 3).reshape(2 * L, Bp, H)[:, :B]
    return y, (h_n, c_n)


def ndo_forward_ref(x, params, H, L):
    """Pure-JAX reference mirroring the PyTorch forward (eval mode)."""
    B, S, E = x.shape
    seq = jnp.zeros((S, B, 2 * H), jnp.float32).at[:, :, :E].set(
        jnp.transpose(x.astype(jnp.float32), (1, 0, 2)))
    h_n, c_n = [], []
    for l in range(L):
        outs = []
        for d in range(2):
            w_ih = params["w_ih"][l, d]
            w_hh = params["w_hh"][l, d]
            b = params["b"][l, d]
            h = jnp.zeros((B, H), jnp.float32)
            c = jnp.zeros((B, H), jnp.float32)
            out_t = [None] * S
            order = range(S) if d == 0 else range(S - 1, -1, -1)
            for t in order:
                gates = seq[t] @ w_ih + h @ w_hh + b
                i_g = jax.nn.sigmoid(gates[:, :H])
                f_g = jax.nn.sigmoid(gates[:, H:2 * H])
                g_g = jnp.tanh(gates[:, 2 * H:3 * H])
                o_g = jax.nn.sigmoid(gates[:, 3 * H:])
                c = f_g * c + i_g * g_g
                h = o_g * jnp.tanh(c)
                out_t[t] = h
            h_n.append(h)
            c_n.append(c)
            outs.append(jnp.stack(out_t))
        seq = jnp.concatenate(outs, axis=-1)
    h1 = jnp.maximum(seq @ params["w1"] + params["b1"], 0.0)
    h2 = jnp.maximum(h1 @ params["w2"] + params["b2"], 0.0)
    y = h2 @ params["w3"] + params["b3"]
    return jnp.transpose(y, (1, 0, 2)), (jnp.stack(h_n), jnp.stack(c_n))


if __name__ == "__main__":
    B, S, E = 2, 8, 1        # batch, seq_len, embedding_dim (=1 as in the module)
    H, L, OUT = 32, 2, 1     # hidden_dim, layers_num, out_dim

    key = jax.random.PRNGKey(0)
    kx, kp = jax.random.split(key)
    x = jax.random.normal(kx, (B, S, E), jnp.float32)
    params = make_params(kp, E, H, L, OUT)

    y, (h_n, c_n) = jax.block_until_ready(ndo_forward(x, params, H, L))
    y_ref, (h_ref, c_ref) = ndo_forward_ref(x, params, H, L)

    np.testing.assert_allclose(np.asarray(y), np.asarray(y_ref), rtol=1e-3, atol=1e-3)
    np.testing.assert_allclose(np.asarray(h_n), np.asarray(h_ref), rtol=1e-3, atol=1e-3)
    np.testing.assert_allclose(np.asarray(c_n), np.asarray(c_ref), rtol=1e-3, atol=1e-3)
    assert y.shape == (B, S, OUT)
    assert h_n.shape == (L * 2, B, H) and c_n.shape == (L * 2, B, H)
    print("KERNEL_OK")
</pallas_src>

<mosaic_0001>
module attributes {stable_mosaic.version = 11 : i64} {
  func.func @kernel(%arg0: memref<64x64xf32, #tpu.memory_space<vmem>>, %arg1: memref<2x64x256xf32, #tpu.memory_space<vmem>>, %arg2: memref<2x64x256xf32, #tpu.memory_space<vmem>>, %arg3: memref<2x64x256xf32, #tpu.memory_space<vmem>>, %arg4: memref<2x1x256xf32, #tpu.memory_space<vmem>>, %arg5: memref<64x64xf32, #tpu.memory_space<vmem>>, %arg6: memref<64x64xf32, #tpu.memory_space<vmem>>, %arg7: memref<1x64xf32, #tpu.memory_space<vmem>>, %arg8: memref<64x32xf32, #tpu.memory_space<vmem>>, %arg9: memref<1x32xf32, #tpu.memory_space<vmem>>, %arg10: memref<32x128xf32, #tpu.memory_space<vmem>>, %arg11: memref<1x128xf32, #tpu.memory_space<vmem>>, %arg12: memref<64x128xf32, #tpu.memory_space<vmem>>, %arg13: memref<16x64xf32, #tpu.memory_space<vmem>>, %arg14: memref<16x64xf32, #tpu.memory_space<vmem>>, %arg15: memref<64x64xf32, #tpu.memory_space<vmem>>, %arg16: memref<64x64xf32, #tpu.memory_space<vmem>>, %arg17: memref<64x256xf32, #tpu.memory_space<vmem>>, %arg18: memref<64x256xf32, #tpu.memory_space<vmem>>) attributes {dimension_semantics = [], scalar_prefetch = 0 : i64, scratch_operands = 4 : i64, tpu.core_type = #tpu.core_type<tc>} {
    %c0 = arith.constant 0 : index
    %c0_0 = arith.constant 0 : index
    %0 = vector.load %arg0[%c0, %c0_0] : memref<64x64xf32, #tpu.memory_space<vmem>>, vector<64x64xf32>
    %c0_1 = arith.constant 0 : index
    %c0_2 = arith.constant 0 : index
    %c0_3 = arith.constant 0 : index
    %1 = vector.load %arg1[%c0_1, %c0_2, %c0_3] : memref<2x64x256xf32, #tpu.memory_space<vmem>>, vector<1x64x256xf32>
    %2 = vector.shape_cast %1 : vector<1x64x256xf32> to vector<64x256xf32>
    %cst = arith.constant dense<0.000000e+00> : vector<64x256xf32>
    %3 = tpu.matmul %0, %2, %cst {dimension_numbers = #tpu.dot_dimension_numbers<[1], [0], [0], [1], [0, 0, 1, 1], [], []>} : vector<64x64xf32>, vector<64x256xf32>, vector<64x256xf32> -> vector<64x256xf32>
    %c0_4 = arith.constant 0 : index
    %c0_5 = arith.constant 0 : index
    %c0_6 = arith.constant 0 : index
    %4 = vector.load %arg4[%c0_4, %c0_5, %c0_6] : memref<2x1x256xf32, #tpu.memory_space<vmem>>, vector<1x1x256xf32>
    %5 = vector.shape_cast %4 : vector<1x1x256xf32> to vector<1x256xf32>
    %6 = vector.broadcast %5 : vector<1x256xf32> to vector<64x256xf32>
    %7 = arith.addf %3, %6 : vector<64x256xf32>
    %c0_7 = arith.constant 0 : index
    %c0_8 = arith.constant 0 : index
    %c0_9 = arith.constant 0 : index
    %8 = vector.load %arg2[%c0_7, %c0_8, %c0_9] : memref<2x64x256xf32, #tpu.memory_space<vmem>>, vector<1x64x256xf32>
    %9 = vector.shape_cast %8 : vector<1x64x256xf32> to vector<64x256xf32>
    %cst_10 = arith.constant dense<0.000000e+00> : vector<64x256xf32>
    %10 = tpu.matmul %0, %9, %cst_10 {dimension_numbers = #tpu.dot_dimension_numbers<[1], [0], [0], [1], [0, 0, 1, 1], [], []>} : vector<64x64xf32>, vector<64x256xf32>, vector<64x256xf32> -> vector<64x256xf32>
    %c0_11 = arith.constant 0 : index
    %c0_12 = arith.constant 0 : index
    %11 = vector.load %arg18[%c0_11, %c0_12] : memref<64x256xf32, #tpu.memory_space<vmem>>, vector<64x256xf32>
    tpu.vector_store %arg18[%c0_11, %c0_12], %10 {strides = array<i32>} : memref<64x256xf32, #tpu.memory_space<vmem>>, vector<64x256xf32>,
    %12 = vector.extract_strided_slice %7 {offsets = [0, 0], sizes = [8, 256], strides = [1, 1]} : vector<64x256xf32> to vector<8x256xf32>
    %c56 = arith.constant 56 : index
    %c0_13 = arith.constant 0 : index
    %13 = vector.load %arg18[%c56, %c0_13] : memref<64x256xf32, #tpu.memory_space<vmem>>, vector<8x256xf32>
    %14 = arith.addf %12, %13 : vector<8x256xf32>
    %c0_14 = arith.constant 0 : index
    %c0_15 = arith.constant 0 : index
    %15 = vector.load %arg17[%c0_14, %c0_15] : memref<64x256xf32, #tpu.memory_space<vmem>>, vector<8x256xf32>
    tpu.vector_store %arg17[%c0_14, %c0_15], %14 {strides = array<i32>} : memref<64x256xf32, #tpu.memory_space<vmem>>, vector<8x256xf32>,
    %16 = vector.extract_strided_slice %7 {offsets = [8, 0], sizes = [8, 256], strides = [1, 1]} : vector<64x256xf32> to vector<8x256xf32>
    %c48 = arith.constant 48 : index
    %c0_16 = arith.constant 0 : index
    %17 = vector.load %arg18[%c48, %c0_16] : memref<64x256xf32, #tpu.memory_space<vmem>>, vector<8x256xf32>
    %18 = arith.addf %16, %17 : vector<8x256xf32>
    %c8 = arith.constant 8 : index
    %c0_17 = arith.constant 0 : index
    %19 = vector.load %arg17[%c8, %c0_17] : memref<64x256xf32, #tpu.memory_space<vmem>>, vector<8x256xf32>
    tpu.vector_store %arg17[%c8, %c0_17], %18 {strides = array<i32>} : memref<64x256xf32, #tpu.memory_space<vmem>>, vector<8x256xf32>,
    %20 = vector.extract_strided_slice %7 {offsets = [16, 0], sizes = [8, 256], strides = [1, 1]} : vector<64x256xf32> to vector<8x256xf32>
    %c40 = arith.constant 40 : index
    %c0_18 = arith.constant 0 : index
    %21 = vector.load %arg18[%c40, %c0_18] : memref<64x256xf32, #tpu.memory_space<vmem>>, vector<8x256xf32>
    %22 = arith.addf %20, %21 : vector<8x256xf32>
    %c16 = arith.constant 16 : index
    %c0_19 = arith.constant 0 : index
    %23 = vector.load %arg17[%c16, %c0_19] : memref<64x256xf32, #tpu.memory_space<vmem>>, vector<8x256xf32>
    tpu.vector_store %arg17[%c16, %c0_19], %22 {strides = array<i32>} : memref<64x256xf32, #tpu.memory_space<vmem>>, vector<8x256xf32>,
    %24 = vector.extract_strided_slice %7 {offsets = [24, 0], sizes = [8, 256], strides = [1, 1]} : vector<64x256xf32> to vector<8x256xf32>
    %c32 = arith.constant 32 : index
    %c0_20 = arith.constant 0 : index
    %25 = vector.load %arg18[%c32, %c0_20] : memref<64x256xf32, #tpu.memory_space<vmem>>, vector<8x256xf32>
    %26 = arith.addf %24, %25 : vector<8x256xf32>
    %c24 = arith.constant 24 : index
    %c0_21 = arith.constant 0 : index
    %27 = vector.load %arg17[%c24, %c0_21] : memref<64x256xf32, #tpu.memory_space<vmem>>, vector<8x256xf32>
    tpu.vector_store %arg17[%c24, %c0_21], %26 {strides = array<i32>} : memref<64x256xf32, #tpu.memory_space<vmem>>, vector<8x256xf32>,
    %28 = vector.extract_strided_slice %7 {offsets = [32, 0], sizes = [8, 256], strides = [1, 1]} : vector<64x256xf32> to vector<8x256xf32>
    %c24_22 = arith.constant 24 : index
    %c0_23 = arith.constant 0 : index
    %29 = vector.load %arg18[%c24_22, %c0_23] : memref<64x256xf32, #tpu.memory_space<vmem>>, vector<8x256xf32>
    %30 = arith.addf %28, %29 : vector<8x256xf32>
    %c32_24 = arith.constant 32 : index
    %c0_25 = arith.constant 0 : index
    %31 = vector.load %arg17[%c32_24, %c0_25] : memref<64x256xf32, #tpu.memory_space<vmem>>, vector<8x256xf32>
    tpu.vector_store %arg17[%c32_24, %c0_25], %30 {strides = array<i32>} : memref<64x256xf32, #tpu.memory_space<vmem>>, vector<8x256xf32>,
    %32 = vector.extract_strided_slice %7 {offsets = [40, 0], sizes = [8, 256], strides = [1, 1]} : vector<64x256xf32> to vector<8x256xf32>
    %c16_26 = arith.constant 16 : index
    %c0_27 = arith.constant 0 : index
    %33 = vector.load %arg18[%c16_26, %c0_27] : memref<64x256xf32, #tpu.memory_space<vmem>>, vector<8x256xf32>
    %34 = arith.addf %32, %33 : vector<8x256xf32>
    %c40_28 = arith.constant 40 : index
    %c0_29 = arith.constant 0 : index
    %35 = vector.load %arg17[%c40_28, %c0_29] : memref<64x256xf32, #tpu.memory_space<vmem>>, vector<8x256xf32>
    tpu.vector_store %arg17[%c40_28, %c0_29], %34 {strides = array<i32>} : memref<64x256xf32, #tpu.memory_space<vmem>>, vector<8x256xf32>,
    %36 = vector.extract_strided_slice %7 {offsets = [48, 0], sizes = [8, 256], strides = [1, 1]} : vector<64x256xf32> to vector<8x256xf32>
    %c8_30 = arith.constant 8 : index
    %c0_31 = arith.constant 0 : index
    %37 = vector.load %arg18[%c8_30, %c0_31] : memref<64x256xf32, #tpu.memory_space<vmem>>, vector<8x256xf32>
    %38 = arith.addf %36, %37 : vector<8x256xf32>
    %c48_32 = arith.constant 48 : index
    %c0_33 = arith.constant 0 : index
    %39 = vector.load %arg17[%c48_32, %c0_33] : memref<64x256xf32, #tpu.memory_space<vmem>>, vector<8x256xf32>
    tpu.vector_store %arg17[%c48_32, %c0_33], %38 {strides = array<i32>} : memref<64x256xf32, #tpu.memory_space<vmem>>, vector<8x256xf32>,
    %40 = vector.extract_strided_slice %7 {offsets = [56, 0], sizes = [8, 256], strides = [1, 1]} : vector<64x256xf32> to vector<8x256xf32>
    %c0_34 = arith.constant 0 : index
    %c0_35 = arith.constant 0 : index
    %41 = vector.load %arg18[%c0_34, %c0_35] : memref<64x256xf32, #tpu.memory_space<vmem>>, vector<8x256xf32>
    %42 = arith.addf %40, %41 : vector<8x256xf32>
    %c56_36 = arith.constant 56 : index
    %c0_37 = arith.constant 0 : index
    %43 = vector.load %arg17[%c56_36, %c0_37] : memref<64x256xf32, #tpu.memory_space<vmem>>, vector<8x256xf32>
    tpu.vector_store %arg17[%c56_36, %c0_37], %42 {strides = array<i32>} : memref<64x256xf32, #tpu.memory_space<vmem>>, vector<8x256xf32>,
    %c0_38 = arith.constant 0 : index
    %c0_39 = arith.constant 0 : index
    %c0_40 = arith.constant 0 : index
    %44 = vector.load %arg3[%c0_38, %c0_39, %c0_40] : memref<2x64x256xf32, #tpu.memory_space<vmem>>, vector<1x64x256xf32>
    %45 = vector.shape_cast %44 : vector<1x64x256xf32> to vector<64x256xf32>
    %cst_41 = arith.constant 0.000000e+00 : f32
    %46 = vector.broadcast %cst_41 : f32 to vector<8x64xf32>
    %cst_42 = arith.constant 0.000000e+00 : f32
    %47 = vector.broadcast %cst_42 : f32 to vector<8x64xf32>
    %c0_43 = arith.constant 0 : index
    %c0_44 = arith.constant 0 : index
    %48 = vector.load %arg17[%c0_43, %c0_44] : memref<64x256xf32, #tpu.memory_space<vmem>>, vector<8x256xf32>
    %cst_45 = arith.constant dense<0.000000e+00> : vector<8x256xf32>
    %49 = tpu.matmul %46, %45, %cst_45 {dimension_numbers = #tpu.dot_dimension_numbers<[1], [0], [0], [1], [0, 0, 1, 1], [], []>} : vector<8x64xf32>, vector<64x256xf32>, vector<8x256xf32> -> vector<8x256xf32>
    %50 = arith.addf %48, %49 : vector<8x256xf32>
    %51 = math.tanh %50 : vector<8x256xf32>
    %52 = vector.extract_strided_slice %51 {offsets = [0, 0], sizes = [8, 64], strides = [1, 1]} : vector<8x256xf32> to vector<8x64xf32>
    %cst_46 = arith.constant 5.000000e-01 : f32
    %53 = vector.broadcast %cst_46 : f32 to vector<8x64xf32>
    %54 = arith.mulf %52, %53 : vector<8x64xf32>
    %cst_47 = arith.constant 5.000000e-01 : f32
    %55 = vector.broadcast %cst_47 : f32 to vector<8x64xf32>
    %56 = arith.addf %54, %55 : vector<8x64xf32>
    %57 = vector.extract_strided_slice %51 {offsets = [0, 64], sizes = [8, 64], strides = [1, 1]} : vector<8x256xf32> to vector<8x64xf32>
    %cst_48 = arith.constant 5.000000e-01 : f32
    %58 = vector.broadcast %cst_48 : f32 to vector<8x64xf32>
    %59 = arith.mulf %57, %58 : vector<8x64xf32>
    %cst_49 = arith.constant 5.000000e-01 : f32
    %60 = vector.broadcast %cst_49 : f32 to vector<8x64xf32>
    %61 = arith.addf %59, %60 : vector<8x64xf32>
    %62 = vector.extract_strided_slice %51 {offsets = [0, 128], sizes = [8, 64], strides = [1, 1]} : vector<8x256xf32> to vector<8x64xf32>
    %63 = vector.extract_strided_slice %51 {offsets = [0, 192], sizes = [8, 64], strides = [1, 1]} : vector<8x256xf32> to vector<8x64xf32>
    %cst_50 = arith.constant 5.000000e-01 : f32
    %64 = vector.broadcast %cst_50 : f32 to vector<8x64xf32>
    %65 = arith.mulf %63, %64 : vector<8x64xf32>
    %cst_51 = arith.constant 5.000000e-01 : f32
    %66 = vector.broadcast %cst_51 : f32 to vector<8x64xf32>
    %67 = arith.addf %65, %66 : vector<8x64xf32>
    %68 = arith.mulf %61, %47 : vector<8x64xf32>
    %69 = arith.mulf %56, %62 : vector<8x64xf32>
    %70 = arith.addf %68, %69 : vector<8x64xf32>
    %71 = math.tanh %70 : vector<8x64xf32>
    %72 = arith.mulf %67, %71 : vector<8x64xf32>
    %c0_52 = arith.constant 0 : index
    %c0_53 = arith.constant 0 : index
    %73 = vector.load %arg15[%c0_52, %c0_53] : memref<64x64xf32, #tpu.memory_space<vmem>>, vector<8x64xf32>
    tpu.vector_store %arg15[%c0_52, %c0_53], %72 {strides = array<i32>} : memref<64x64xf32, #tpu.memory_space<vmem>>, vector<8x64xf32>,
    %c8_54 = arith.constant 8 : index
    %c0_55 = arith.constant 0 : index
    %74 = vector.load %arg17[%c8_54, %c0_55] : memref<64x256xf32, #tpu.memory_space<vmem>>, vector<8x256xf32>
    %cst_56 = arith.constant dense<0.000000e+00> : vector<8x256xf32>
    %75 = tpu.matmul %72, %45, %cst_56 {dimension_numbers = #tpu.dot_dimension_numbers<[1], [0], [0], [1], [0, 0, 1, 1], [], []>} : vector<8x64xf32>, vector<64x256xf32>, vector<8x256xf32> -> vector<8x256xf32>
    %76 = arith.addf %74, %75 : vector<8x256xf32>
    %77 = math.tanh %76 : vector<8x256xf32>
    %78 = vector.extract_strided_slice %77 {offsets = [0, 0], sizes = [8, 64], strides = [1, 1]} : vector<8x256xf32> to vector<8x64xf32>
    %cst_57 = arith.constant 5.000000e-01 : f32
    %79 = vector.broadcast %cst_57 : f32 to vector<8x64xf32>
    %80 = arith.mulf %78, %79 : vector<8x64xf32>
    %cst_58 = arith.constant 5.000000e-01 : f32
    %81 = vector.broadcast %cst_58 : f32 to vector<8x64xf32>
    %82 = arith.addf %80, %81 : vector<8x64xf32>
    %83 = vector.extract_strided_slice %77 {offsets = [0, 64], sizes = [8, 64], strides = [1, 1]} : vector<8x256xf32> to vector<8x64xf32>
    %cst_59 = arith.constant 5.000000e-01 : f32
    %84 = vector.broadcast %cst_59 : f32 to vector<8x64xf32>
    %85 = arith.mulf %83, %84 : vector<8x64xf32>
    %cst_60 = arith.constant 5.000000e-01 : f32
    %86 = vector.broadcast %cst_60 : f32 to vector<8x64xf32>
    %87 = arith.addf %85, %86 : vector<8x64xf32>
    %88 = vector.extract_strided_slice %77 {offsets = [0, 128], sizes = [8, 64], strides = [1, 1]} : vector<8x256xf32> to vector<8x64xf32>
    %89 = vector.extract_strided_slice %77 {offsets = [0, 192], sizes = [8, 64], strides = [1, 1]} : vector<8x256xf32> to vector<8x64xf32>
    %cst_61 = arith.constant 5.000000e-01 : f32
    %90 = vector.broadcast %cst_61 : f32 to vector<8x64xf32>
    %91 = arith.mulf %89, %90 : vector<8x64xf32>
    %cst_62 = arith.constant 5.000000e-01 : f32
    %92 = vector.broadcast %cst_62 : f32 to vector<8x64xf32>
    %93 = arith.addf %91, %92 : vector<8x64xf32>
    %94 = arith.mulf %87, %70 : vector<8x64xf32>
    %95 = arith.mulf %82, %88 : vector<8x64xf32>
    %96 = arith.addf %94, %95 : vector<8x64xf32>
    %97 = math.tanh %96 : vector<8x64xf32>
    %98 = arith.mulf %93, %97 : vector<8x64xf32>
    %c8_63 = arith.constant 8 : index
    %c0_64 = arith.constant 0 : index
    %99 = vector.load %arg15[%c8_63, %c0_64] : memref<64x64xf32, #tpu.memory_space<vmem>>, vector<8x64xf32>
    tpu.vector_store %arg15[%c8_63, %c0_64], %98 {strides = array<i32>} : memref<64x64xf32, #tpu.memory_space<vmem>>, vector<8x64xf32>,
    %c16_65 = arith.constant 16 : index
    %c0_66 = arith.constant 0 : index
    %100 = vector.load %arg17[%c16_65, %c0_66] : memref<64x256xf32, #tpu.memory_space<vmem>>, vector<8x256xf32>
    %cst_67 = arith.constant dense<0.000000e+00> : vector<8x256xf32>
    %101 = tpu.matmul %98, %45, %cst_67 {dimension_numbers = #tpu.dot_dimension_numbers<[1], [0], [0], [1], [0, 0, 1, 1], [], []>} : vector<8x64xf32>, vector<64x256xf32>, vector<8x256xf32> -> vector<8x256xf32>
    %102 = arith.addf %100, %101 : vector<8x256xf32>
    %103 = math.tanh %102 : vector<8x256xf32>
    %104 = vector.extract_strided_slice %103 {offsets = [0, 0], sizes = [8, 64], strides = [1, 1]} : vector<8x256xf32> to vector<8x64xf32>
    %cst_68 = arith.constant 5.000000e-01 : f32
    %105 = vector.broadcast %cst_68 : f32 to vector<8x64xf32>
    %106 = arith.mulf %104, %105 : vector<8x64xf32>
    %cst_69 = arith.constant 5.000000e-01 : f32
    %107 = vector.broadcast %cst_69 : f32 to vector<8x64xf32>
    %108 = arith.addf %106, %107 : vector<8x64xf32>
    %109 = vector.extract_strided_slice %103 {offsets = [0, 64], sizes = [8, 64], strides = [1, 1]} : vector<8x256xf32> to vector<8x64xf32>
    %cst_70 = arith.constant 5.000000e-01 : f32
    %110 = vector.broadcast %cst_70 : f32 to vector<8x64xf32>
    %111 = arith.mulf %109, %110 : vector<8x64xf32>
    %cst_71 = arith.constant 5.000000e-01 : f32
    %112 = vector.broadcast %cst_71 : f32 to vector<8x64xf32>
    %113 = arith.addf %111, %112 : vector<8x64xf32>
    %114 = vector.extract_strided_slice %103 {offsets = [0, 128], sizes = [8, 64], strides = [1, 1]} : vector<8x256xf32> to vector<8x64xf32>
    %115 = vector.extract_strided_slice %103 {offsets = [0, 192], sizes = [8, 64], strides = [1, 1]} : vector<8x256xf32> to vector<8x64xf32>
    %cst_72 = arith.constant 5.000000e-01 : f32
    %116 = vector.broadcast %cst_72 : f32 to vector<8x64xf32>
    %117 = arith.mulf %115, %116 : vector<8x64xf32>
    %cst_73 = arith.constant 5.000000e-01 : f32
    %118 = vector.broadcast %cst_73 : f32 to vector<8x64xf32>
    %119 = arith.addf %117, %118 : vector<8x64xf32>
    %120 = arith.mulf %113, %96 : vector<8x64xf32>
    %121 = arith.mulf %108, %114 : vector<8x64xf32>
    %122 = arith.addf %120, %121 : vector<8x64xf32>
    %123 = math.tanh %122 : vector<8x64xf32>
    %124 = arith.mulf %119, %123 : vector<8x64xf32>
    %c16_74 = arith.constant 16 : index
    %c0_75 = arith.constant 0 : index
    %125 = vector.load %arg15[%c16_74, %c0_75] : memref<64x64xf32, #tpu.memory_space<vmem>>, vector<8x64xf32>
    tpu.vector_store %arg15[%c16_74, %c0_75], %124 {strides = array<i32>} : memref<64x64xf32, #tpu.memory_space<vmem>>, vector<8x64xf32>,
    %c24_76 = arith.constant 24 : index
    %c0_77 = arith.constant 0 : index
    %126 = vector.load %arg17[%c24_76, %c0_77] : memref<64x256xf32, #tpu.memory_space<vmem>>, vector<8x256xf32>
    %cst_78 = arith.constant dense<0.000000e+00> : vector<8x256xf32>
    %127 = tpu.matmul %124, %45, %cst_78 {dimension_numbers = #tpu.dot_dimension_numbers<[1], [0], [0], [1], [0, 0, 1, 1], [], []>} : vector<8x64xf32>, vector<64x256xf32>, vector<8x256xf32> -> vector<8x256xf32>
    %128 = arith.addf %126, %127 : vector<8x256xf32>
    %129 = math.tanh %128 : vector<8x256xf32>
    %130 = vector.extract_strided_slice %129 {offsets = [0, 0], sizes = [8, 64], strides = [1, 1]} : vector<8x256xf32> to vector<8x64xf32>
    %cst_79 = arith.constant 5.000000e-01 : f32
    %131 = vector.broadcast %cst_79 : f32 to vector<8x64xf32>
    %132 = arith.mulf %130, %131 : vector<8x64xf32>
    %cst_80 = arith.constant 5.000000e-01 : f32
    %133 = vector.broadcast %cst_80 : f32 to vector<8x64xf32>
    %134 = arith.addf %132, %133 : vector<8x64xf32>
    %135 = vector.extract_strided_slice %129 {offsets = [0, 64], sizes = [8, 64], strides = [1, 1]} : vector<8x256xf32> to vector<8x64xf32>
    %cst_81 = arith.constant 5.000000e-01 : f32
    %136 = vector.broadcast %cst_81 : f32 to vector<8x64xf32>
    %137 = arith.mulf %135, %136 : vector<8x64xf32>
    %cst_82 = arith.constant 5.000000e-01 : f32
    %138 = vector.broadcast %cst_82 : f32 to vector<8x64xf32>
    %139 = arith.addf %137, %138 : vector<8x64xf32>
    %140 = vector.extract_strided_slice %129 {offsets = [0, 128], sizes = [8, 64], strides = [1, 1]} : vector<8x256xf32> to vector<8x64xf32>
    %141 = vector.extract_strided_slice %129 {offsets = [0, 192], sizes = [8, 64], strides = [1, 1]} : vector<8x256xf32> to vector<8x64xf32>
    %cst_83 = arith.constant 5.000000e-01 : f32
    %142 = vector.broadcast %cst_83 : f32 to vector<8x64xf32>
    %143 = arith.mulf %141, %142 : vector<8x64xf32>
    %cst_84 = arith.constant 5.000000e-01 : f32
    %144 = vector.broadcast %cst_84 : f32 to vector<8x64xf32>
    %145 = arith.addf %143, %144 : vector<8x64xf32>
    %146 = arith.mulf %139, %122 : vector<8x64xf32>
    %147 = arith.mulf %134, %140 : vector<8x64xf32>
    %148 = arith.addf %146, %147 : vector<8x64xf32>
    %149 = math.tanh %148 : vector<8x64xf32>
    %150 = arith.mulf %145, %149 : vector<8x64xf32>
    %c24_85 = arith.constant 24 : index
    %c0_86 = arith.constant 0 : index
    %151 = vector.load %arg15[%c24_85, %c0_86] : memref<64x64xf32, #tpu.memory_space<vmem>>, vector<8x64xf32>
    tpu.vector_store %arg15[%c24_85, %c0_86], %150 {strides = array<i32>} : memref<64x64xf32, #tpu.memory_space<vmem>>, vector<8x64xf32>,
    %c32_87 = arith.constant 32 : index
    %c0_88 = arith.constant 0 : index
    %152 = vector.load %arg17[%c32_87, %c0_88] : memref<64x256xf32, #tpu.memory_space<vmem>>, vector<8x256xf32>
    %cst_89 = arith.constant dense<0.000000e+00> : vector<8x256xf32>
    %153 = tpu.matmul %150, %45, %cst_89 {dimension_numbers = #tpu.dot_dimension_numbers<[1], [0], [0], [1], [0, 0, 1, 1], [], []>} : vector<8x64xf32>, vector<64x256xf32>, vector<8x256xf32> -> vector<8x256xf32>
    %154 = arith.addf %152, %153 : vector<8x256xf32>
    %155 = math.tanh %154 : vector<8x256xf32>
    %156 = vector.extract_strided_slice %155 {offsets = [0, 0], sizes = [8, 64], strides = [1, 1]} : vector<8x256xf32> to vector<8x64xf32>
    %cst_90 = arith.constant 5.000000e-01 : f32
    %157 = vector.broadcast %cst_90 : f32 to vector<8x64xf32>
    %158 = arith.mulf %156, %157 : vector<8x64xf32>
    %cst_91 = arith.constant 5.000000e-01 : f32
    %159 = vector.broadcast %cst_91 : f32 to vector<8x64xf32>
    %160 = arith.addf %158, %159 : vector<8x64xf32>
    %161 = vector.extract_strided_slice %155 {offsets = [0, 64], sizes = [8, 64], strides = [1, 1]} : vector<8x256xf32> to vector<8x64xf32>
    %cst_92 = arith.constant 5.000000e-01 : f32
    %162 = vector.broadcast %cst_92 : f32 to vector<8x64xf32>
    %163 = arith.mulf %161, %162 : vector<8x64xf32>
    %cst_93 = arith.constant 5.000000e-01 : f32
    %164 = vector.broadcast %cst_93 : f32 to vector<8x64xf32>
    %165 = arith.addf %163, %164 : vector<8x64xf32>
    %166 = vector.extract_strided_slice %155 {offsets = [0, 128], sizes = [8, 64], strides = [1, 1]} : vector<8x256xf32> to vector<8x64xf32>
    %167 = vector.extract_strided_slice %155 {offsets = [0, 192], sizes = [8, 64], strides = [1, 1]} : vector<8x256xf32> to vector<8x64xf32>
    %cst_94 = arith.constant 5.000000e-01 : f32
    %168 = vector.broadcast %cst_94 : f32 to vector<8x64xf32>
    %169 = arith.mulf %167, %168 : vector<8x64xf32>
    %cst_95 = arith.constant 5.000000e-01 : f32
    %170 = vector.broadcast %cst_95 : f32 to vector<8x64xf32>
    %171 = arith.addf %169, %170 : vector<8x64xf32>
    %172 = arith.mulf %165, %148 : vector<8x64xf32>
    %173 = arith.mulf %160, %166 : vector<8x64xf32>
    %174 = arith.addf %172, %173 : vector<8x64xf32>
    %175 = math.tanh %174 : vector<8x64xf32>
    %176 = arith.mulf %171, %175 : vector<8x64xf32>
    %c32_96 = arith.constant 32 : index
    %c0_97 = arith.constant 0 : index
    %177 = vector.load %arg15[%c32_96, %c0_97] : memref<64x64xf32, #tpu.memory_space<vmem>>, vector<8x64xf32>
    tpu.vector_store %arg15[%c32_96, %c0_97], %176 {strides = array<i32>} : memref<64x64xf32, #tpu.memory_space<vmem>>, vector<8x64xf32>,
    %c40_98 = arith.constant 40 : index
    %c0_99 = arith.constant 0 : index
    %178 = vector.load %arg17[%c40_98, %c0_99] : memref<64x256xf32, #tpu.memory_space<vmem>>, vector<8x256xf32>
    %cst_100 = arith.constant dense<0.000000e+00> : vector<8x256xf32>
    %179 = tpu.matmul %176, %45, %cst_100 {dimension_numbers = #tpu.dot_dimension_numbers<[1], [0], [0], [1], [0, 0, 1, 1], [], []>} : vector<8x64xf32>, vector<64x256xf32>, vector<8x256xf32> -> vector<8x256xf32>
    %180 = arith.addf %178, %179 : vector<8x256xf32>
    %181 = math.tanh %180 : vector<8x256xf32>
    %182 = vector.extract_strided_slice %181 {offsets = [0, 0], sizes = [8, 64], strides = [1, 1]} : vector<8x256xf32> to vector<8x64xf32>
    %cst_101 = arith.constant 5.000000e-01 : f32
    %183 = vector.broadcast %cst_101 : f32 to vector<8x64xf32>
    %184 = arith.mulf %182, %183 : vector<8x64xf32>
    %cst_102 = arith.constant 5.000000e-01 : f32
    %185 = vector.broadcast %cst_102 : f32 to vector<8x64xf32>
    %186 = arith.addf %184, %185 : vector<8x64xf32>
    %187 = vector.extract_strided_slice %181 {offsets = [0, 64], sizes = [8, 64], strides = [1, 1]} : vector<8x256xf32> to vector<8x64xf32>
    %cst_103 = arith.constant 5.000000e-01 : f32
    %188 = vector.broadcast %cst_103 : f32 to vector<8x64xf32>
    %189 = arith.mulf %187, %188 : vector<8x64xf32>
    %cst_104 = arith.constant 5.000000e-01 : f32
    %190 = vector.broadcast %cst_104 : f32 to vector<8x64xf32>
    %191 = arith.addf %189, %190 : vector<8x64xf32>
    %192 = vector.extract_strided_slice %181 {offsets = [0, 128], sizes = [8, 64], strides = [1, 1]} : vector<8x256xf32> to vector<8x64xf32>
    %193 = vector.extract_strided_slice %181 {offsets = [0, 192], sizes = [8, 64], strides = [1, 1]} : vector<8x256xf32> to vector<8x64xf32>
    %cst_105 = arith.constant 5.000000e-01 : f32
    %194 = vector.broadcast %cst_105 : f32 to vector<8x64xf32>
    %195 = arith.mulf %193, %194 : vector<8x64xf32>
    %cst_106 = arith.constant 5.000000e-01 : f32
    %196 = vector.broadcast %cst_106 : f32 to vector<8x64xf32>
    %197 = arith.addf %195, %196 : vector<8x64xf32>
    %198 = arith.mulf %191, %174 : vector<8x64xf32>
    %199 = arith.mulf %186, %192 : vector<8x64xf32>
    %200 = arith.addf %198, %199 : vector<8x64xf32>
    %201 = math.tanh %200 : vector<8x64xf32>
    %202 = arith.mulf %197, %201 : vector<8x64xf32>
    %c40_107 = arith.constant 40 : index
    %c0_108 = arith.constant 0 : index
    %203 = vector.load %arg15[%c40_107, %c0_108] : memref<64x64xf32, #tpu.memory_space<vmem>>, vector<8x64xf32>
    tpu.vector_store %arg15[%c40_107, %c0_108], %202 {strides = array<i32>} : memref<64x64xf32, #tpu.memory_space<vmem>>, vector<8x64xf32>,
    %c48_109 = arith.constant 48 : index
    %c0_110 = arith.constant 0 : index
    %204 = vector.load %arg17[%c48_109, %c0_110] : memref<64x256xf32, #tpu.memory_space<vmem>>, vector<8x256xf32>
    %cst_111 = arith.constant dense<0.000000e+00> : vector<8x256xf32>
    %205 = tpu.matmul %202, %45, %cst_111 {dimension_numbers = #tpu.dot_dimension_numbers<[1], [0], [0], [1], [0, 0, 1, 1], [], []>} : vector<8x64xf32>, vector<64x256xf32>, vector<8x256xf32> -> vector<8x256xf32>
    %206 = arith.addf %204, %205 : vector<8x256xf32>
    %207 = math.tanh %206 : vector<8x256xf32>
    %208 = vector.extract_strided_slice %207 {offsets = [0, 0], sizes = [8, 64], strides = [1, 1]} : vector<8x256xf32> to vector<8x64xf32>
    %cst_112 = arith.constant 5.000000e-01 : f32
    %209 = vector.broadcast %cst_112 : f32 to vector<8x64xf32>
    %210 = arith.mulf %208, %209 : vector<8x64xf32>
    %cst_113 = arith.constant 5.000000e-01 : f32
    %211 = vector.broadcast %cst_113 : f32 to vector<8x64xf32>
    %212 = arith.addf %210, %211 : vector<8x64xf32>
    %213 = vector.extract_strided_slice %207 {offsets = [0, 64], sizes = [8, 64], strides = [1, 1]} : vector<8x256xf32> to vector<8x64xf32>
    %cst_114 = arith.constant 5.000000e-01 : f32
    %214 = vector.broadcast %cst_114 : f32 to vector<8x64xf32>
    %215 = arith.mulf %213, %214 : vector<8x64xf32>
    %cst_115 = arith.constant 5.000000e-01 : f32
    %216 = vector.broadcast %cst_115 : f32 to vector<8x64xf32>
    %217 = arith.addf %215, %216 : vector<8x64xf32>
    %218 = vector.extract_strided_slice %207 {offsets = [0, 128], sizes = [8, 64], strides = [1, 1]} : vector<8x256xf32> to vector<8x64xf32>
    %219 = vector.extract_strided_slice %207 {offsets = [0, 192], sizes = [8, 64], strides = [1, 1]} : vector<8x256xf32> to vector<8x64xf32>
    %cst_116 = arith.constant 5.000000e-01 : f32
    %220 = vector.broadcast %cst_116 : f32 to vector<8x64xf32>
    %221 = arith.mulf %219, %220 : vector<8x64xf32>
    %cst_117 = arith.constant 5.000000e-01 : f32
    %222 = vector.broadcast %cst_117 : f32 to vector<8x64xf32>
    %223 = arith.addf %221, %222 : vector<8x64xf32>
    %224 = arith.mulf %217, %200 : vector<8x64xf32>
    %225 = arith.mulf %212, %218 : vector<8x64xf32>
    %226 = arith.addf %224, %225 : vector<8x64xf32>
    %227 = math.tanh %226 : vector<8x64xf32>
    %228 = arith.mulf %223, %227 : vector<8x64xf32>
    %c48_118 = arith.constant 48 : index
    %c0_119 = arith.constant 0 : index
    %229 = vector.load %arg15[%c48_118, %c0_119] : memref<64x64xf32, #tpu.memory_space<vmem>>, vector<8x64xf32>
    tpu.vector_store %arg15[%c48_118, %c0_119], %228 {strides = array<i32>} : memref<64x64xf32, #tpu.memory_space<vmem>>, vector<8x64xf32>,
    %c56_120 = arith.constant 56 : index
    %c0_121 = arith.constant 0 : index
    %230 = vector.load %arg17[%c56_120, %c0_121] : memref<64x256xf32, #tpu.memory_space<vmem>>, vector<8x256xf32>
    %cst_122 = arith.constant dense<0.000000e+00> : vector<8x256xf32>
    %231 = tpu.matmul %228, %45, %cst_122 {dimension_numbers = #tpu.dot_dimension_numbers<[1], [0], [0], [1], [0, 0, 1, 1], [], []>} : vector<8x64xf32>, vector<64x256xf32>, vector<8x256xf32> -> vector<8x256xf32>
    %232 = arith.addf %230, %231 : vector<8x256xf32>
    %233 = math.tanh %232 : vector<8x256xf32>
    %234 = vector.extract_strided_slice %233 {offsets = [0, 0], sizes = [8, 64], strides = [1, 1]} : vector<8x256xf32> to vector<8x64xf32>
    %cst_123 = arith.constant 5.000000e-01 : f32
    %235 = vector.broadcast %cst_123 : f32 to vector<8x64xf32>
    %236 = arith.mulf %234, %235 : vector<8x64xf32>
    %cst_124 = arith.constant 5.000000e-01 : f32
    %237 = vector.broadcast %cst_124 : f32 to vector<8x64xf32>
    %238 = arith.addf %236, %237 : vector<8x64xf32>
    %239 = vector.extract_strided_slice %233 {offsets = [0, 64], sizes = [8, 64], strides = [1, 1]} : vector<8x256xf32> to vector<8x64xf32>
    %cst_125 = arith.constant 5.000000e-01 : f32
    %240 = vector.broadcast %cst_125 : f32 to vector<8x64xf32>
    %241 = arith.mulf %239, %240 : vector<8x64xf32>
    %cst_126 = arith.constant 5.000000e-01 : f32
    %242 = vector.broadcast %cst_126 : f32 to vector<8x64xf32>
    %243 = arith.addf %241, %242 : vector<8x64xf32>
    %244 = vector.extract_strided_slice %233 {offsets = [0, 128], sizes = [8, 64], strides = [1, 1]} : vector<8x256xf32> to vector<8x64xf32>
    %245 = vector.extract_strided_slice %233 {offsets = [0, 192], sizes = [8, 64], strides = [1, 1]} : vector<8x256xf32> to vector<8x64xf32>
    %cst_127 = arith.constant 5.000000e-01 : f32
    %246 = vector.broadcast %cst_127 : f32 to vector<8x64xf32>
    %247 = arith.mulf %245, %246 : vector<8x64xf32>
    %cst_128 = arith.constant 5.000000e-01 : f32
    %248 = vector.broadcast %cst_128 : f32 to vector<8x64xf32>
    %249 = arith.addf %247, %248 : vector<8x64xf32>
    %250 = arith.mulf %243, %226 : vector<8x64xf32>
    %251 = arith.mulf %238, %244 : vector<8x64xf32>
    %252 = arith.addf %250, %251 : vector<8x64xf32>
    %253 = math.tanh %252 : vector<8x64xf32>
    %254 = arith.mulf %249, %253 : vector<8x64xf32>
    %c56_129 = arith.constant 56 : index
    %c0_130 = arith.constant 0 : index
    %255 = vector.load %arg15[%c56_129, %c0_130] : memref<64x64xf32, #tpu.memory_space<vmem>>, vector<8x64xf32>
    tpu.vector_store %arg15[%c56_129, %c0_130], %254 {strides = array<i32>} : memref<64x64xf32, #tpu.memory_space<vmem>>, vector<8x64xf32>,
    %c0_131 = arith.constant 0 : index
    %c0_132 = arith.constant 0 : index
    %256 = vector.load %arg13[%c0_131, %c0_132] : memref<16x64xf32, #tpu.memory_space<vmem>>, vector<8x64xf32>
    tpu.vector_store %arg13[%c0_131, %c0_132], %254 {strides = array<i32>} : memref<16x64xf32, #tpu.memory_space<vmem>>, vector<8x64xf32>,
    %c0_133 = arith.constant 0 : index
    %c0_134 = arith.constant 0 : index
    %257 = vector.load %arg14[%c0_133, %c0_134] : memref<16x64xf32, #tpu.memory_space<vmem>>, vector<8x64xf32>
    tpu.vector_store %arg14[%c0_133, %c0_134], %252 {strides = array<i32>} : memref<16x64xf32, #tpu.memory_space<vmem>>, vector<8x64xf32>,
    %c0_135 = arith.constant 0 : index
    %c0_136 = arith.constant 0 : index
    %258 = vector.load %arg15[%c0_135, %c0_136] : memref<64x64xf32, #tpu.memory_space<vmem>>, vector<64x64xf32>
    %c1 = arith.constant 1 : index
    %c0_137 = arith.constant 0 : index
    %c0_138 = arith.constant 0 : index
    %259 = vector.load %arg1[%c1, %c0_137, %c0_138] : memref<2x64x256xf32, #tpu.memory_space<vmem>>, vector<1x64x256xf32>
    %260 = vector.shape_cast %259 : vector<1x64x256xf32> to vector<64x256xf32>
    %cst_139 = arith.constant dense<0.000000e+00> : vector<64x256xf32>
    %261 = tpu.matmul %258, %260, %cst_139 {dimension_numbers = #tpu.dot_dimension_numbers<[1], [0], [0], [1], [0, 0, 1, 1], [], []>} : vector<64x64xf32>, vector<64x256xf32>, vector<64x256xf32> -> vector<64x256xf32>
    %c1_140 = arith.constant 1 : index
    %c0_141 = arith.constant 0 : index
    %c0_142 = arith.constant 0 : index
    %262 = vector.load %arg4[%c1_140, %c0_141, %c0_142] : memref<2x1x256xf32, #tpu.memory_space<vmem>>, vector<1x1x256xf32>
    %263 = vector.shape_cast %262 : vector<1x1x256xf32> to vector<1x256xf32>
    %264 = vector.broadcast %263 : vector<1x256xf32> to vector<64x256xf32>
    %265 = arith.addf %261, %264 : vector<64x256xf32>
    %c1_143 = arith.constant 1 : index
    %c0_144 = arith.constant 0 : index
    %c0_145 = arith.constant 0 : index
    %266 = vector.load %arg2[%c1_143, %c0_144, %c0_145] : memref<2x64x256xf32, #tpu.memory_space<vmem>>, vector<1x64x256xf32>
    %267 = vector.shape_cast %266 : vector<1x64x256xf32> to vector<64x256xf32>
    %cst_146 = arith.constant dense<0.000000e+00> : vector<64x256xf32>
    %268 = tpu.matmul %258, %267, %cst_146 {dimension_numbers = #tpu.dot_dimension_numbers<[1], [0], [0], [1], [0, 0, 1, 1], [], []>} : vector<64x64xf32>, vector<64x256xf32>, vector<64x256xf32> -> vector<64x256xf32>
    %c0_147 = arith.constant 0 : index
    %c0_148 = arith.constant 0 : index
    %269 = vector.load %arg18[%c0_147, %c0_148] : memref<64x256xf32, #tpu.memory_space<vmem>>, vector<64x256xf32>
    tpu.vector_store %arg18[%c0_147, %c0_148], %268 {strides = array<i32>} : memref<64x256xf32, #tpu.memory_space<vmem>>, vector<64x256xf32>,
    %270 = vector.extract_strided_slice %265 {offsets = [0, 0], sizes = [8, 256], strides = [1, 1]} : vector<64x256xf32> to vector<8x256xf32>
    %c56_149 = arith.constant 56 : index
    %c0_150 = arith.constant 0 : index
    %271 = vector.load %arg18[%c56_149, %c0_150] : memref<64x256xf32, #tpu.memory_space<vmem>>, vector<8x256xf32>
    %272 = arith.addf %270, %271 : vector<8x256xf32>
    %c0_151 = arith.constant 0 : index
    %c0_152 = arith.constant 0 : index
    %273 = vector.load %arg17[%c0_151, %c0_152] : memref<64x256xf32, #tpu.memory_space<vmem>>, vector<8x256xf32>
    tpu.vector_store %arg17[%c0_151, %c0_152], %272 {strides = array<i32>} : memref<64x256xf32, #tpu.memory_space<vmem>>, vector<8x256xf32>,
    %274 = vector.extract_strided_slice %265 {offsets = [8, 0], sizes = [8, 256], strides = [1, 1]} : vector<64x256xf32> to vector<8x256xf32>
    %c48_153 = arith.constant 48 : index
    %c0_154 = arith.constant 0 : index
    %275 = vector.load %arg18[%c48_153, %c0_154] : memref<64x256xf32, #tpu.memory_space<vmem>>, vector<8x256xf32>
    %276 = arith.addf %274, %275 : vector<8x256xf32>
    %c8_155 = arith.constant 8 : index
    %c0_156 = arith.constant 0 : index
    %277 = vector.load %arg17[%c8_155, %c0_156] : memref<64x256xf32, #tpu.memory_space<vmem>>, vector<8x256xf32>
    tpu.vector_store %arg17[%c8_155, %c0_156], %276 {strides = array<i32>} : memref<64x256xf32, #tpu.memory_space<vmem>>, vector<8x256xf32>,
    %278 = vector.extract_strided_slice %265 {offsets = [16, 0], sizes = [8, 256], strides = [1, 1]} : vector<64x256xf32> to vector<8x256xf32>
    %c40_157 = arith.constant 40 : index
    %c0_158 = arith.constant 0 : index
    %279 = vector.load %arg18[%c40_157, %c0_158] : memref<64x256xf32, #tpu.memory_space<vmem>>, vector<8x256xf32>
    %280 = arith.addf %278, %279 : vector<8x256xf32>
    %c16_159 = arith.constant 16 : index
    %c0_160 = arith.constant 0 : index
    %281 = vector.load %arg17[%c16_159, %c0_160] : memref<64x256xf32, #tpu.memory_space<vmem>>, vector<8x256xf32>
    tpu.vector_store %arg17[%c16_159, %c0_160], %280 {strides = array<i32>} : memref<64x256xf32, #tpu.memory_space<vmem>>, vector<8x256xf32>,
    %282 = vector.extract_strided_slice %265 {offsets = [24, 0], sizes = [8, 256], strides = [1, 1]} : vector<64x256xf32> to vector<8x256xf32>
    %c32_161 = arith.constant 32 : index
    %c0_162 = arith.constant 0 : index
    %283 = vector.load %arg18[%c32_161, %c0_162] : memref<64x256xf32, #tpu.memory_space<vmem>>, vector<8x256xf32>
    %284 = arith.addf %282, %283 : vector<8x256xf32>
    %c24_163 = arith.constant 24 : index
    %c0_164 = arith.constant 0 : index
    %285 = vector.load %arg17[%c24_163, %c0_164] : memref<64x256xf32, #tpu.memory_space<vmem>>, vector<8x256xf32>
    tpu.vector_store %arg17[%c24_163, %c0_164], %284 {strides = array<i32>} : memref<64x256xf32, #tpu.memory_space<vmem>>, vector<8x256xf32>,
    %286 = vector.extract_strided_slice %265 {offsets = [32, 0], sizes = [8, 256], strides = [1, 1]} : vector<64x256xf32> to vector<8x256xf32>
    %c24_165 = arith.constant 24 : index
    %c0_166 = arith.constant 0 : index
    %287 = vector.load %arg18[%c24_165, %c0_166] : memref<64x256xf32, #tpu.memory_space<vmem>>, vector<8x256xf32>
    %288 = arith.addf %286, %287 : vector<8x256xf32>
    %c32_167 = arith.constant 32 : index
    %c0_168 = arith.constant 0 : index
    %289 = vector.load %arg17[%c32_167, %c0_168] : memref<64x256xf32, #tpu.memory_space<vmem>>, vector<8x256xf32>
    tpu.vector_store %arg17[%c32_167, %c0_168], %288 {strides = array<i32>} : memref<64x256xf32, #tpu.memory_space<vmem>>, vector<8x256xf32>,
    %290 = vector.extract_strided_slice %265 {offsets = [40, 0], sizes = [8, 256], strides = [1, 1]} : vector<64x256xf32> to vector<8x256xf32>
    %c16_169 = arith.constant 16 : index
    %c0_170 = arith.constant 0 : index
    %291 = vector.load %arg18[%c16_169, %c0_170] : memref<64x256xf32, #tpu.memory_space<vmem>>, vector<8x256xf32>
    %292 = arith.addf %290, %291 : vector<8x256xf32>
    %c40_171 = arith.constant 40 : index
    %c0_172 = arith.constant 0 : index
    %293 = vector.load %arg17[%c40_171, %c0_172] : memref<64x256xf32, #tpu.memory_space<vmem>>, vector<8x256xf32>
    tpu.vector_store %arg17[%c40_171, %c0_172], %292 {strides = array<i32>} : memref<64x256xf32, #tpu.memory_space<vmem>>, vector<8x256xf32>,
    %294 = vector.extract_strided_slice %265 {offsets = [48, 0], sizes = [8, 256], strides = [1, 1]} : vector<64x256xf32> to vector<8x256xf32>
    %c8_173 = arith.constant 8 : index
    %c0_174 = arith.constant 0 : index
    %295 = vector.load %arg18[%c8_173, %c0_174] : memref<64x256xf32, #tpu.memory_space<vmem>>, vector<8x256xf32>
    %296 = arith.addf %294, %295 : vector<8x256xf32>
    %c48_175 = arith.constant 48 : index
    %c0_176 = arith.constant 0 : index
    %297 = vector.load %arg17[%c48_175, %c0_176] : memref<64x256xf32, #tpu.memory_space<vmem>>, vector<8x256xf32>
    tpu.vector_store %arg17[%c48_175, %c0_176], %296 {strides = array<i32>} : memref<64x256xf32, #tpu.memory_space<vmem>>, vector<8x256xf32>,
    %298 = vector.extract_strided_slice %265 {offsets = [56, 0], sizes = [8, 256], strides = [1, 1]} : vector<64x256xf32> to vector<8x256xf32>
    %c0_177 = arith.constant 0 : index
    %c0_178 = arith.constant 0 : index
    %299 = vector.load %arg18[%c0_177, %c0_178] : memref<64x256xf32, #tpu.memory_space<vmem>>, vector<8x256xf32>
    %300 = arith.addf %298, %299 : vector<8x256xf32>
    %c56_179 = arith.constant 56 : index
    %c0_180 = arith.constant 0 : index
    %301 = vector.load %arg17[%c56_179, %c0_180] : memref<64x256xf32, #tpu.memory_space<vmem>>, vector<8x256xf32>
    tpu.vector_store %arg17[%c56_179, %c0_180], %300 {strides = array<i32>} : memref<64x256xf32, #tpu.memory_space<vmem>>, vector<8x256xf32>,
    %c1_181 = arith.constant 1 : index
    %c0_182 = arith.constant 0 : index
    %c0_183 = arith.constant 0 : index
    %302 = vector.load %arg3[%c1_181, %c0_182, %c0_183] : memref<2x64x256xf32, #tpu.memory_space<vmem>>, vector<1x64x256xf32>
    %303 = vector.shape_cast %302 : vector<1x64x256xf32> to vector<64x256xf32>
    %cst_184 = arith.constant 0.000000e+00 : f32
    %304 = vector.broadcast %cst_184 : f32 to vector<8x64xf32>
    %cst_185 = arith.constant 0.000000e+00 : f32
    %305 = vector.broadcast %cst_185 : f32 to vector<8x64xf32>
    %c0_186 = arith.constant 0 : index
    %c0_187 = arith.constant 0 : index
    %306 = vector.load %arg17[%c0_186, %c0_187] : memref<64x256xf32, #tpu.memory_space<vmem>>, vector<8x256xf32>
    %cst_188 = arith.constant dense<0.000000e+00> : vector<8x256xf32>
    %307 = tpu.matmul %304, %303, %cst_188 {dimension_numbers = #tpu.dot_dimension_numbers<[1], [0], [0], [1], [0, 0, 1, 1], [], []>} : vector<8x64xf32>, vector<64x256xf32>, vector<8x256xf32> -> vector<8x256xf32>
    %308 = arith.addf %306, %307 : vector<8x256xf32>
    %309 = math.tanh %308 : vector<8x256xf32>
    %310 = vector.extract_strided_slice %309 {offsets = [0, 0], sizes = [8, 64], strides = [1, 1]} : vector<8x256xf32> to vector<8x64xf32>
    %cst_189 = arith.constant 5.000000e-01 : f32
    %311 = vector.broadcast %cst_189 : f32 to vector<8x64xf32>
    %312 = arith.mulf %310, %311 : vector<8x64xf32>
    %cst_190 = arith.constant 5.000000e-01 : f32
    %313 = vector.broadcast %cst_190 : f32 to vector<8x64xf32>
    %314 = arith.addf %312, %313 : vector<8x64xf32>
    %315 = vector.extract_strided_slice %309 {offsets = [0, 64], sizes = [8, 64], strides = [1, 1]} : vector<8x256xf32> to vector<8x64xf32>
    %cst_191 = arith.constant 5.000000e-01 : f32
    %316 = vector.broadcast %cst_191 : f32 to vector<8x64xf32>
    %317 = arith.mulf %315, %316 : vector<8x64xf32>
    %cst_192 = arith.constant 5.000000e-01 : f32
    %318 = vector.broadcast %cst_192 : f32 to vector<8x64xf32>
    %319 = arith.addf %317, %318 : vector<8x64xf32>
    %320 = vector.extract_strided_slice %309 {offsets = [0, 128], sizes = [8, 64], strides = [1, 1]} : vector<8x256xf32> to vector<8x64xf32>
    %321 = vector.extract_strided_slice %309 {offsets = [0, 192], sizes = [8, 64], strides = [1, 1]} : vector<8x256xf32> to vector<8x64xf32>
    %cst_193 = arith.constant 5.000000e-01 : f32
    %322 = vector.broadcast %cst_193 : f32 to vector<8x64xf32>
    %323 = arith.mulf %321, %322 : vector<8x64xf32>
    %cst_194 = arith.constant 5.000000e-01 : f32
    %324 = vector.broadcast %cst_194 : f32 to vector<8x64xf32>
    %325 = arith.addf %323, %324 : vector<8x64xf32>
    %326 = arith.mulf %319, %305 : vector<8x64xf32>
    %327 = arith.mulf %314, %320 : vector<8x64xf32>
    %328 = arith.addf %326, %327 : vector<8x64xf32>
    %329 = math.tanh %328 : vector<8x64xf32>
    %330 = arith.mulf %325, %329 : vector<8x64xf32>
    %c0_195 = arith.constant 0 : index
    %c0_196 = arith.constant 0 : index
    %331 = vector.load %arg16[%c0_195, %c0_196] : memref<64x64xf32, #tpu.memory_space<vmem>>, vector<8x64xf32>
    tpu.vector_store %arg16[%c0_195, %c0_196], %330 {strides = array<i32>} : memref<64x64xf32, #tpu.memory_space<vmem>>, vector<8x64xf32>,
    %c8_197 = arith.constant 8 : index
    %c0_198 = arith.constant 0 : index
    %332 = vector.load %arg17[%c8_197, %c0_198] : memref<64x256xf32, #tpu.memory_space<vmem>>, vector<8x256xf32>
    %cst_199 = arith.constant dense<0.000000e+00> : vector<8x256xf32>
    %333 = tpu.matmul %330, %303, %cst_199 {dimension_numbers = #tpu.dot_dimension_numbers<[1], [0], [0], [1], [0, 0, 1, 1], [], []>} : vector<8x64xf32>, vector<64x256xf32>, vector<8x256xf32> -> vector<8x256xf32>
    %334 = arith.addf %332, %333 : vector<8x256xf32>
    %335 = math.tanh %334 : vector<8x256xf32>
    %336 = vector.extract_strided_slice %335 {offsets = [0, 0], sizes = [8, 64], strides = [1, 1]} : vector<8x256xf32> to vector<8x64xf32>
    %cst_200 = arith.constant 5.000000e-01 : f32
    %337 = vector.broadcast %cst_200 : f32 to vector<8x64xf32>
    %338 = arith.mulf %336, %337 : vector<8x64xf32>
    %cst_201 = arith.constant 5.000000e-01 : f32
    %339 = vector.broadcast %cst_201 : f32 to vector<8x64xf32>
    %340 = arith.addf %338, %339 : vector<8x64xf32>
    %341 = vector.extract_strided_slice %335 {offsets = [0, 64], sizes = [8, 64], strides = [1, 1]} : vector<8x256xf32> to vector<8x64xf32>
    %cst_202 = arith.constant 5.000000e-01 : f32
    %342 = vector.broadcast %cst_202 : f32 to vector<8x64xf32>
    %343 = arith.mulf %341, %342 : vector<8x64xf32>
    %cst_203 = arith.constant 5.000000e-01 : f32
    %344 = vector.broadcast %cst_203 : f32 to vector<8x64xf32>
    %345 = arith.addf %343, %344 : vector<8x64xf32>
    %346 = vector.extract_strided_slice %335 {offsets = [0, 128], sizes = [8, 64], strides = [1, 1]} : vector<8x256xf32> to vector<8x64xf32>
    %347 = vector.extract_strided_slice %335 {offsets = [0, 192], sizes = [8, 64], strides = [1, 1]} : vector<8x256xf32> to vector<8x64xf32>
    %cst_204 = arith.constant 5.000000e-01 : f32
    %348 = vector.broadcast %cst_204 : f32 to vector<8x64xf32>
    %349 = arith.mulf %347, %348 : vector<8x64xf32>
    %cst_205 = arith.constant 5.000000e-01 : f32
    %350 = vector.broadcast %cst_205 : f32 to vector<8x64xf32>
    %351 = arith.addf %349, %350 : vector<8x64xf32>
    %352 = arith.mulf %345, %328 : vector<8x64xf32>
    %353 = arith.mulf %340, %346 : vector<8x64xf32>
    %354 = arith.addf %352, %353 : vector<8x64xf32>
    %355 = math.tanh %354 : vector<8x64xf32>
    %356 = arith.mulf %351, %355 : vector<8x64xf32>
    %c8_206 = arith.constant 8 : index
    %c0_207 = arith.constant 0 : index
    %357 = vector.load %arg16[%c8_206, %c0_207] : memref<64x64xf32, #tpu.memory_space<vmem>>, vector<8x64xf32>
    tpu.vector_store %arg16[%c8_206, %c0_207], %356 {strides = array<i32>} : memref<64x64xf32, #tpu.memory_space<vmem>>, vector<8x64xf32>,
    %c16_208 = arith.constant 16 : index
    %c0_209 = arith.constant 0 : index
    %358 = vector.load %arg17[%c16_208, %c0_209] : memref<64x256xf32, #tpu.memory_space<vmem>>, vector<8x256xf32>
    %cst_210 = arith.constant dense<0.000000e+00> : vector<8x256xf32>
    %359 = tpu.matmul %356, %303, %cst_210 {dimension_numbers = #tpu.dot_dimension_numbers<[1], [0], [0], [1], [0, 0, 1, 1], [], []>} : vector<8x64xf32>, vector<64x256xf32>, vector<8x256xf32> -> vector<8x256xf32>
    %360 = arith.addf %358, %359 : vector<8x256xf32>
    %361 = math.tanh %360 : vector<8x256xf32>
    %362 = vector.extract_strided_slice %361 {offsets = [0, 0], sizes = [8, 64], strides = [1, 1]} : vector<8x256xf32> to vector<8x64xf32>
    %cst_211 = arith.constant 5.000000e-01 : f32
    %363 = vector.broadcast %cst_211 : f32 to vector<8x64xf32>
    %364 = arith.mulf %362, %363 : vector<8x64xf32>
    %cst_212 = arith.constant 5.000000e-01 : f32
    %365 = vector.broadcast %cst_212 : f32 to vector<8x64xf32>
    %366 = arith.addf %364, %365 : vector<8x64xf32>
    %367 = vector.extract_strided_slice %361 {offsets = [0, 64], sizes = [8, 64], strides = [1, 1]} : vector<8x256xf32> to vector<8x64xf32>
    %cst_213 = arith.constant 5.000000e-01 : f32
    %368 = vector.broadcast %cst_213 : f32 to vector<8x64xf32>
    %369 = arith.mulf %367, %368 : vector<8x64xf32>
    %cst_214 = arith.constant 5.000000e-01 : f32
    %370 = vector.broadcast %cst_214 : f32 to vector<8x64xf32>
    %371 = arith.addf %369, %370 : vector<8x64xf32>
    %372 = vector.extract_strided_slice %361 {offsets = [0, 128], sizes = [8, 64], strides = [1, 1]} : vector<8x256xf32> to vector<8x64xf32>
    %373 = vector.extract_strided_slice %361 {offsets = [0, 192], sizes = [8, 64], strides = [1, 1]} : vector<8x256xf32> to vector<8x64xf32>
    %cst_215 = arith.constant 5.000000e-01 : f32
    %374 = vector.broadcast %cst_215 : f32 to vector<8x64xf32>
    %375 = arith.mulf %373, %374 : vector<8x64xf32>
    %cst_216 = arith.constant 5.000000e-01 : f32
    %376 = vector.broadcast %cst_216 : f32 to vector<8x64xf32>
    %377 = arith.addf %375, %376 : vector<8x64xf32>
    %378 = arith.mulf %371, %354 : vector<8x64xf32>
    %379 = arith.mulf %366, %372 : vector<8x64xf32>
    %380 = arith.addf %378, %379 : vector<8x64xf32>
    %381 = math.tanh %380 : vector<8x64xf32>
    %382 = arith.mulf %377, %381 : vector<8x64xf32>
    %c16_217 = arith.constant 16 : index
    %c0_218 = arith.constant 0 : index
    %383 = vector.load %arg16[%c16_217, %c0_218] : memref<64x64xf32, #tpu.memory_space<vmem>>, vector<8x64xf32>
    tpu.vector_store %arg16[%c16_217, %c0_218], %382 {strides = array<i32>} : memref<64x64xf32, #tpu.memory_space<vmem>>, vector<8x64xf32>,
    %c24_219 = arith.constant 24 : index
    %c0_220 = arith.constant 0 : index
    %384 = vector.load %arg17[%c24_219, %c0_220] : memref<64x256xf32, #tpu.memory_space<vmem>>, vector<8x256xf32>
    %cst_221 = arith.constant dense<0.000000e+00> : vector<8x256xf32>
    %385 = tpu.matmul %382, %303, %cst_221 {dimension_numbers = #tpu.dot_dimension_numbers<[1], [0], [0], [1], [0, 0, 1, 1], [], []>} : vector<8x64xf32>, vector<64x256xf32>, vector<8x256xf32> -> vector<8x256xf32>
    %386 = arith.addf %384, %385 : vector<8x256xf32>
    %387 = math.tanh %386 : vector<8x256xf32>
    %388 = vector.extract_strided_slice %387 {offsets = [0, 0], sizes = [8, 64], strides = [1, 1]} : vector<8x256xf32> to vector<8x64xf32>
    %cst_222 = arith.constant 5.000000e-01 : f32
    %389 = vector.broadcast %cst_222 : f32 to vector<8x64xf32>
    %390 = arith.mulf %388, %389 : vector<8x64xf32>
    %cst_223 = arith.constant 5.000000e-01 : f32
    %391 = vector.broadcast %cst_223 : f32 to vector<8x64xf32>
    %392 = arith.addf %390, %391 : vector<8x64xf32>
    %393 = vector.extract_strided_slice %387 {offsets = [0, 64], sizes = [8, 64], strides = [1, 1]} : vector<8x256xf32> to vector<8x64xf32>
    %cst_224 = arith.constant 5.000000e-01 : f32
    %394 = vector.broadcast %cst_224 : f32 to vector<8x64xf32>
    %395 = arith.mulf %393, %394 : vector<8x64xf32>
    %cst_225 = arith.constant 5.000000e-01 : f32
    %396 = vector.broadcast %cst_225 : f32 to vector<8x64xf32>
    %397 = arith.addf %395, %396 : vector<8x64xf32>
    %398 = vector.extract_strided_slice %387 {offsets = [0, 128], sizes = [8, 64], strides = [1, 1]} : vector<8x256xf32> to vector<8x64xf32>
    %399 = vector.extract_strided_slice %387 {offsets = [0, 192], sizes = [8, 64], strides = [1, 1]} : vector<8x256xf32> to vector<8x64xf32>
    %cst_226 = arith.constant 5.000000e-01 : f32
    %400 = vector.broadcast %cst_226 : f32 to vector<8x64xf32>
    %401 = arith.mulf %399, %400 : vector<8x64xf32>
    %cst_227 = arith.constant 5.000000e-01 : f32
    %402 = vector.broadcast %cst_227 : f32 to vector<8x64xf32>
    %403 = arith.addf %401, %402 : vector<8x64xf32>
    %404 = arith.mulf %397, %380 : vector<8x64xf32>
    %405 = arith.mulf %392, %398 : vector<8x64xf32>
    %406 = arith.addf %404, %405 : vector<8x64xf32>
    %407 = math.tanh %406 : vector<8x64xf32>
    %408 = arith.mulf %403, %407 : vector<8x64xf32>
    %c24_228 = arith.constant 24 : index
    %c0_229 = arith.constant 0 : index
    %409 = vector.load %arg16[%c24_228, %c0_229] : memref<64x64xf32, #tpu.memory_space<vmem>>, vector<8x64xf32>
    tpu.vector_store %arg16[%c24_228, %c0_229], %408 {strides = array<i32>} : memref<64x64xf32, #tpu.memory_space<vmem>>, vector<8x64xf32>,
    %c32_230 = arith.constant 32 : index
    %c0_231 = arith.constant 0 : index
    %410 = vector.load %arg17[%c32_230, %c0_231] : memref<64x256xf32, #tpu.memory_space<vmem>>, vector<8x256xf32>
    %cst_232 = arith.constant dense<0.000000e+00> : vector<8x256xf32>
    %411 = tpu.matmul %408, %303, %cst_232 {dimension_numbers = #tpu.dot_dimension_numbers<[1], [0], [0], [1], [0, 0, 1, 1], [], []>} : vector<8x64xf32>, vector<64x256xf32>, vector<8x256xf32> -> vector<8x256xf32>
    %412 = arith.addf %410, %411 : vector<8x256xf32>
    %413 = math.tanh %412 : vector<8x256xf32>
    %414 = vector.extract_strided_slice %413 {offsets = [0, 0], sizes = [8, 64], strides = [1, 1]} : vector<8x256xf32> to vector<8x64xf32>
    %cst_233 = arith.constant 5.000000e-01 : f32
    %415 = vector.broadcast %cst_233 : f32 to vector<8x64xf32>
    %416 = arith.mulf %414, %415 : vector<8x64xf32>
    %cst_234 = arith.constant 5.000000e-01 : f32
    %417 = vector.broadcast %cst_234 : f32 to vector<8x64xf32>
    %418 = arith.addf %416, %417 : vector<8x64xf32>
    %419 = vector.extract_strided_slice %413 {offsets = [0, 64], sizes = [8, 64], strides = [1, 1]} : vector<8x256xf32> to vector<8x64xf32>
    %cst_235 = arith.constant 5.000000e-01 : f32
    %420 = vector.broadcast %cst_235 : f32 to vector<8x64xf32>
    %421 = arith.mulf %419, %420 : vector<8x64xf32>
    %cst_236 = arith.constant 5.000000e-01 : f32
    %422 = vector.broadcast %cst_236 : f32 to vector<8x64xf32>
    %423 = arith.addf %421, %422 : vector<8x64xf32>
    %424 = vector.extract_strided_slice %413 {offsets = [0, 128], sizes = [8, 64], strides = [1, 1]} : vector<8x256xf32> to vector<8x64xf32>
    %425 = vector.extract_strided_slice %413 {offsets = [0, 192], sizes = [8, 64], strides = [1, 1]} : vector<8x256xf32> to vector<8x64xf32>
    %cst_237 = arith.constant 5.000000e-01 : f32
    %426 = vector.broadcast %cst_237 : f32 to vector<8x64xf32>
    %427 = arith.mulf %425, %426 : vector<8x64xf32>
    %cst_238 = arith.constant 5.000000e-01 : f32
    %428 = vector.broadcast %cst_238 : f32 to vector<8x64xf32>
    %429 = arith.addf %427, %428 : vector<8x64xf32>
    %430 = arith.mulf %423, %406 : vector<8x64xf32>
    %431 = arith.mulf %418, %424 : vector<8x64xf32>
    %432 = arith.addf %430, %431 : vector<8x64xf32>
    %433 = math.tanh %432 : vector<8x64xf32>
    %434 = arith.mulf %429, %433 : vector<8x64xf32>
    %c32_239 = arith.constant 32 : index
    %c0_240 = arith.constant 0 : index
    %435 = vector.load %arg16[%c32_239, %c0_240] : memref<64x64xf32, #tpu.memory_space<vmem>>, vector<8x64xf32>
    tpu.vector_store %arg16[%c32_239, %c0_240], %434 {strides = array<i32>} : memref<64x64xf32, #tpu.memory_space<vmem>>, vector<8x64xf32>,
    %c40_241 = arith.constant 40 : index
    %c0_242 = arith.constant 0 : index
    %436 = vector.load %arg17[%c40_241, %c0_242] : memref<64x256xf32, #tpu.memory_space<vmem>>, vector<8x256xf32>
    %cst_243 = arith.constant dense<0.000000e+00> : vector<8x256xf32>
    %437 = tpu.matmul %434, %303, %cst_243 {dimension_numbers = #tpu.dot_dimension_numbers<[1], [0], [0], [1], [0, 0, 1, 1], [], []>} : vector<8x64xf32>, vector<64x256xf32>, vector<8x256xf32> -> vector<8x256xf32>
    %438 = arith.addf %436, %437 : vector<8x256xf32>
    %439 = math.tanh %438 : vector<8x256xf32>
    %440 = vector.extract_strided_slice %439 {offsets = [0, 0], sizes = [8, 64], strides = [1, 1]} : vector<8x256xf32> to vector<8x64xf32>
    %cst_244 = arith.constant 5.000000e-01 : f32
    %441 = vector.broadcast %cst_244 : f32 to vector<8x64xf32>
    %442 = arith.mulf %440, %441 : vector<8x64xf32>
    %cst_245 = arith.constant 5.000000e-01 : f32
    %443 = vector.broadcast %cst_245 : f32 to vector<8x64xf32>
    %444 = arith.addf %442, %443 : vector<8x64xf32>
    %445 = vector.extract_strided_slice %439 {offsets = [0, 64], sizes = [8, 64], strides = [1, 1]} : vector<8x256xf32> to vector<8x64xf32>
    %cst_246 = arith.constant 5.000000e-01 : f32
    %446 = vector.broadcast %cst_246 : f32 to vector<8x64xf32>
    %447 = arith.mulf %445, %446 : vector<8x64xf32>
    %cst_247 = arith.constant 5.000000e-01 : f32
    %448 = vector.broadcast %cst_247 : f32 to vector<8x64xf32>
    %449 = arith.addf %447, %448 : vector<8x64xf32>
    %450 = vector.extract_strided_slice %439 {offsets = [0, 128], sizes = [8, 64], strides = [1, 1]} : vector<8x256xf32> to vector<8x64xf32>
    %451 = vector.extract_strided_slice %439 {offsets = [0, 192], sizes = [8, 64], strides = [1, 1]} : vector<8x256xf32> to vector<8x64xf32>
    %cst_248 = arith.constant 5.000000e-01 : f32
    %452 = vector.broadcast %cst_248 : f32 to vector<8x64xf32>
    %453 = arith.mulf %451, %452 : vector<8x64xf32>
    %cst_249 = arith.constant 5.000000e-01 : f32
    %454 = vector.broadcast %cst_249 : f32 to vector<8x64xf32>
    %455 = arith.addf %453, %454 : vector<8x64xf32>
    %456 = arith.mulf %449, %432 : vector<8x64xf32>
    %457 = arith.mulf %444, %450 : vector<8x64xf32>
    %458 = arith.addf %456, %457 : vector<8x64xf32>
    %459 = math.tanh %458 : vector<8x64xf32>
    %460 = arith.mulf %455, %459 : vector<8x64xf32>
    %c40_250 = arith.constant 40 : index
    %c0_251 = arith.constant 0 : index
    %461 = vector.load %arg16[%c40_250, %c0_251] : memref<64x64xf32, #tpu.memory_space<vmem>>, vector<8x64xf32>
    tpu.vector_store %arg16[%c40_250, %c0_251], %460 {strides = array<i32>} : memref<64x64xf32, #tpu.memory_space<vmem>>, vector<8x64xf32>,
    %c48_252 = arith.constant 48 : index
    %c0_253 = arith.constant 0 : index
    %462 = vector.load %arg17[%c48_252, %c0_253] : memref<64x256xf32, #tpu.memory_space<vmem>>, vector<8x256xf32>
    %cst_254 = arith.constant dense<0.000000e+00> : vector<8x256xf32>
    %463 = tpu.matmul %460, %303, %cst_254 {dimension_numbers = #tpu.dot_dimension_numbers<[1], [0], [0], [1], [0, 0, 1, 1], [], []>} : vector<8x64xf32>, vector<64x256xf32>, vector<8x256xf32> -> vector<8x256xf32>
    %464 = arith.addf %462, %463 : vector<8x256xf32>
    %465 = math.tanh %464 : vector<8x256xf32>
    %466 = vector.extract_strided_slice %465 {offsets = [0, 0], sizes = [8, 64], strides = [1, 1]} : vector<8x256xf32> to vector<8x64xf32>
    %cst_255 = arith.constant 5.000000e-01 : f32
    %467 = vector.broadcast %cst_255 : f32 to vector<8x64xf32>
    %468 = arith.mulf %466, %467 : vector<8x64xf32>
    %cst_256 = arith.constant 5.000000e-01 : f32
    %469 = vector.broadcast %cst_256 : f32 to vector<8x64xf32>
    %470 = arith.addf %468, %469 : vector<8x64xf32>
    %471 = vector.extract_strided_slice %465 {offsets = [0, 64], sizes = [8, 64], strides = [1, 1]} : vector<8x256xf32> to vector<8x64xf32>
    %cst_257 = arith.constant 5.000000e-01 : f32
    %472 = vector.broadcast %cst_257 : f32 to vector<8x64xf32>
    %473 = arith.mulf %471, %472 : vector<8x64xf32>
    %cst_258 = arith.constant 5.000000e-01 : f32
    %474 = vector.broadcast %cst_258 : f32 to vector<8x64xf32>
    %475 = arith.addf %473, %474 : vector<8x64xf32>
    %476 = vector.extract_strided_slice %465 {offsets = [0, 128], sizes = [8, 64], strides = [1, 1]} : vector<8x256xf32> to vector<8x64xf32>
    %477 = vector.extract_strided_slice %465 {offsets = [0, 192], sizes = [8, 64], strides = [1, 1]} : vector<8x256xf32> to vector<8x64xf32>
    %cst_259 = arith.constant 5.000000e-01 : f32
    %478 = vector.broadcast %cst_259 : f32 to vector<8x64xf32>
    %479 = arith.mulf %477, %478 : vector<8x64xf32>
    %cst_260 = arith.constant 5.000000e-01 : f32
    %480 = vector.broadcast %cst_260 : f32 to vector<8x64xf32>
    %481 = arith.addf %479, %480 : vector<8x64xf32>
    %482 = arith.mulf %475, %458 : vector<8x64xf32>
    %483 = arith.mulf %470, %476 : vector<8x64xf32>
    %484 = arith.addf %482, %483 : vector<8x64xf32>
    %485 = math.tanh %484 : vector<8x64xf32>
    %486 = arith.mulf %481, %485 : vector<8x64xf32>
    %c48_261 = arith.constant 48 : index
    %c0_262 = arith.constant 0 : index
    %487 = vector.load %arg16[%c48_261, %c0_262] : memref<64x64xf32, #tpu.memory_space<vmem>>, vector<8x64xf32>
    tpu.vector_store %arg16[%c48_261, %c0_262], %486 {strides = array<i32>} : memref<64x64xf32, #tpu.memory_space<vmem>>, vector<8x64xf32>,
    %c56_263 = arith.constant 56 : index
    %c0_264 = arith.constant 0 : index
    %488 = vector.load %arg17[%c56_263, %c0_264] : memref<64x256xf32, #tpu.memory_space<vmem>>, vector<8x256xf32>
    %cst_265 = arith.constant dense<0.000000e+00> : vector<8x256xf32>
    %489 = tpu.matmul %486, %303, %cst_265 {dimension_numbers = #tpu.dot_dimension_numbers<[1], [0], [0], [1], [0, 0, 1, 1], [], []>} : vector<8x64xf32>, vector<64x256xf32>, vector<8x256xf32> -> vector<8x256xf32>
    %490 = arith.addf %488, %489 : vector<8x256xf32>
    %491 = math.tanh %490 : vector<8x256xf32>
    %492 = vector.extract_strided_slice %491 {offsets = [0, 0], sizes = [8, 64], strides = [1, 1]} : vector<8x256xf32> to vector<8x64xf32>
    %cst_266 = arith.constant 5.000000e-01 : f32
    %493 = vector.broadcast %cst_266 : f32 to vector<8x64xf32>
    %494 = arith.mulf %492, %493 : vector<8x64xf32>
    %cst_267 = arith.constant 5.000000e-01 : f32
    %495 = vector.broadcast %cst_267 : f32 to vector<8x64xf32>
    %496 = arith.addf %494, %495 : vector<8x64xf32>
    %497 = vector.extract_strided_slice %491 {offsets = [0, 64], sizes = [8, 64], strides = [1, 1]} : vector<8x256xf32> to vector<8x64xf32>
    %cst_268 = arith.constant 5.000000e-01 : f32
    %498 = vector.broadcast %cst_268 : f32 to vector<8x64xf32>
    %499 = arith.mulf %497, %498 : vector<8x64xf32>
    %cst_269 = arith.constant 5.000000e-01 : f32
    %500 = vector.broadcast %cst_269 : f32 to vector<8x64xf32>
    %501 = arith.addf %499, %500 : vector<8x64xf32>
    %502 = vector.extract_strided_slice %491 {offsets = [0, 128], sizes = [8, 64], strides = [1, 1]} : vector<8x256xf32> to vector<8x64xf32>
    %503 = vector.extract_strided_slice %491 {offsets = [0, 192], sizes = [8, 64], strides = [1, 1]} : vector<8x256xf32> to vector<8x64xf32>
    %cst_270 = arith.constant 5.000000e-01 : f32
    %504 = vector.broadcast %cst_270 : f32 to vector<8x64xf32>
    %505 = arith.mulf %503, %504 : vector<8x64xf32>
    %cst_271 = arith.constant 5.000000e-01 : f32
    %506 = vector.broadcast %cst_271 : f32 to vector<8x64xf32>
    %507 = arith.addf %505, %506 : vector<8x64xf32>
    %508 = arith.mulf %501, %484 : vector<8x64xf32>
    %509 = arith.mulf %496, %502 : vector<8x64xf32>
    %510 = arith.addf %508, %509 : vector<8x64xf32>
    %511 = math.tanh %510 : vector<8x64xf32>
    %512 = arith.mulf %507, %511 : vector<8x64xf32>
    %c56_272 = arith.constant 56 : index
    %c0_273 = arith.constant 0 : index
    %513 = vector.load %arg16[%c56_272, %c0_273] : memref<64x64xf32, #tpu.memory_space<vmem>>, vector<8x64xf32>
    tpu.vector_store %arg16[%c56_272, %c0_273], %512 {strides = array<i32>} : memref<64x64xf32, #tpu.memory_space<vmem>>, vector<8x64xf32>,
    %c8_274 = arith.constant 8 : index
    %c0_275 = arith.constant 0 : index
    %514 = vector.load %arg13[%c8_274, %c0_275] : memref<16x64xf32, #tpu.memory_space<vmem>>, vector<8x64xf32>
    tpu.vector_store %arg13[%c8_274, %c0_275], %512 {strides = array<i32>} : memref<16x64xf32, #tpu.memory_space<vmem>>, vector<8x64xf32>,
    %c8_276 = arith.constant 8 : index
    %c0_277 = arith.constant 0 : index
    %515 = vector.load %arg14[%c8_276, %c0_277] : memref<16x64xf32, #tpu.memory_space<vmem>>, vector<8x64xf32>
    tpu.vector_store %arg14[%c8_276, %c0_277], %510 {strides = array<i32>} : memref<16x64xf32, #tpu.memory_space<vmem>>, vector<8x64xf32>,
    %c0_278 = arith.constant 0 : index
    %c0_279 = arith.constant 0 : index
    %516 = vector.load %arg16[%c0_278, %c0_279] : memref<64x64xf32, #tpu.memory_space<vmem>>, vector<64x64xf32>
    %c0_280 = arith.constant 0 : index
    %c0_281 = arith.constant 0 : index
    %517 = vector.load %arg5[%c0_280, %c0_281] : memref<64x64xf32, #tpu.memory_space<vmem>>, vector<64x64xf32>
    %cst_282 = arith.constant dense<0.000000e+00> : vector<64x64xf32>
    %518 = tpu.matmul %516, %517, %cst_282 {dimension_numbers = #tpu.dot_dimension_numbers<[1], [0], [0], [1], [0, 0, 1, 1], [], []>} : vector<64x64xf32>, vector<64x64xf32>, vector<64x64xf32> -> vector<64x64xf32>
    %c0_283 = arith.constant 0 : index
    %c0_284 = arith.constant 0 : index
    %519 = vector.load %arg7[%c0_283, %c0_284] : memref<1x64xf32, #tpu.memory_space<vmem>>, vector<1x64xf32>
    %520 = vector.broadcast %519 : vector<1x64xf32> to vector<64x64xf32>
    %521 = arith.addf %518, %520 : vector<64x64xf32>
    %c0_285 = arith.constant 0 : index
    %c0_286 = arith.constant 0 : index
    %522 = vector.load %arg6[%c0_285, %c0_286] : memref<64x64xf32, #tpu.memory_space<vmem>>, vector<64x64xf32>
    %cst_287 = arith.constant dense<0.000000e+00> : vector<64x64xf32>
    %523 = tpu.matmul %516, %522, %cst_287 {dimension_numbers = #tpu.dot_dimension_numbers<[1], [0], [0], [1], [0, 0, 1, 1], [], []>} : vector<64x64xf32>, vector<64x64xf32>, vector<64x64xf32> -> vector<64x64xf32>
    %524 = vector.extract_strided_slice %521 {offsets = [0, 0], sizes = [8, 64], strides = [1, 1]} : vector<64x64xf32> to vector<8x64xf32>
    %525 = vector.extract_strided_slice %523 {offsets = [56, 0], sizes = [8, 64], strides = [1, 1]} : vector<64x64xf32> to vector<8x64xf32>
    %526 = arith.addf %524, %525 : vector<8x64xf32>
    %cst_288 = arith.constant 0.000000e+00 : f32
    %527 = vector.broadcast %cst_288 : f32 to vector<8x64xf32>
    %528 = arith.maximumf %526, %527 : vector<8x64xf32>
    %c0_289 = arith.constant 0 : index
    %c0_290 = arith.constant 0 : index
    %529 = vector.load %arg17[%c0_289, %c0_290] : memref<64x256xf32, #tpu.memory_space<vmem>>, vector<8x64xf32>
    tpu.vector_store %arg17[%c0_289, %c0_290], %528 {strides = array<i32>} : memref<64x256xf32, #tpu.memory_space<vmem>>, vector<8x64xf32>,
    %530 = vector.extract_strided_slice %521 {offsets = [8, 0], sizes = [8, 64], strides = [1, 1]} : vector<64x64xf32> to vector<8x64xf32>
    %531 = vector.extract_strided_slice %523 {offsets = [48, 0], sizes = [8, 64], strides = [1, 1]} : vector<64x64xf32> to vector<8x64xf32>
    %532 = arith.addf %530, %531 : vector<8x64xf32>
    %cst_291 = arith.constant 0.000000e+00 : f32
    %533 = vector.broadcast %cst_291 : f32 to vector<8x64xf32>
    %534 = arith.maximumf %532, %533 : vector<8x64xf32>
    %c8_292 = arith.constant 8 : index
    %c0_293 = arith.constant 0 : index
    %535 = vector.load %arg17[%c8_292, %c0_293] : memref<64x256xf32, #tpu.memory_space<vmem>>, vector<8x64xf32>
    tpu.vector_store %arg17[%c8_292, %c0_293], %534 {strides = array<i32>} : memref<64x256xf32, #tpu.memory_space<vmem>>, vector<8x64xf32>,
    %536 = vector.extract_strided_slice %521 {offsets = [16, 0], sizes = [8, 64], strides = [1, 1]} : vector<64x64xf32> to vector<8x64xf32>
    %537 = vector.extract_strided_slice %523 {offsets = [40, 0], sizes = [8, 64], strides = [1, 1]} : vector<64x64xf32> to vector<8x64xf32>
    %538 = arith.addf %536, %537 : vector<8x64xf32>
    %cst_294 = arith.constant 0.000000e+00 : f32
    %539 = vector.broadcast %cst_294 : f32 to vector<8x64xf32>
    %540 = arith.maximumf %538, %539 : vector<8x64xf32>
    %c16_295 = arith.constant 16 : index
    %c0_296 = arith.constant 0 : index
    %541 = vector.load %arg17[%c16_295, %c0_296] : memref<64x256xf32, #tpu.memory_space<vmem>>, vector<8x64xf32>
    tpu.vector_store %arg17[%c16_295, %c0_296], %540 {strides = array<i32>} : memref<64x256xf32, #tpu.memory_space<vmem>>, vector<8x64xf32>,
    %542 = vector.extract_strided_slice %521 {offsets = [24, 0], sizes = [8, 64], strides = [1, 1]} : vector<64x64xf32> to vector<8x64xf32>
    %543 = vector.extract_strided_slice %523 {offsets = [32, 0], sizes = [8, 64], strides = [1, 1]} : vector<64x64xf32> to vector<8x64xf32>
    %544 = arith.addf %542, %543 : vector<8x64xf32>
    %cst_297 = arith.constant 0.000000e+00 : f32
    %545 = vector.broadcast %cst_297 : f32 to vector<8x64xf32>
    %546 = arith.maximumf %544, %545 : vector<8x64xf32>
    %c24_298 = arith.constant 24 : index
    %c0_299 = arith.constant 0 : index
    %547 = vector.load %arg17[%c24_298, %c0_299] : memref<64x256xf32, #tpu.memory_space<vmem>>, vector<8x64xf32>
    tpu.vector_store %arg17[%c24_298, %c0_299], %546 {strides = array<i32>} : memref<64x256xf32, #tpu.memory_space<vmem>>, vector<8x64xf32>,
    %548 = vector.extract_strided_slice %521 {offsets = [32, 0], sizes = [8, 64], strides = [1, 1]} : vector<64x64xf32> to vector<8x64xf32>
    %549 = vector.extract_strided_slice %523 {offsets = [24, 0], sizes = [8, 64], strides = [1, 1]} : vector<64x64xf32> to vector<8x64xf32>
    %550 = arith.addf %548, %549 : vector<8x64xf32>
    %cst_300 = arith.constant 0.000000e+00 : f32
    %551 = vector.broadcast %cst_300 : f32 to vector<8x64xf32>
    %552 = arith.maximumf %550, %551 : vector<8x64xf32>
    %c32_301 = arith.constant 32 : index
    %c0_302 = arith.constant 0 : index
    %553 = vector.load %arg17[%c32_301, %c0_302] : memref<64x256xf32, #tpu.memory_space<vmem>>, vector<8x64xf32>
    tpu.vector_store %arg17[%c32_301, %c0_302], %552 {strides = array<i32>} : memref<64x256xf32, #tpu.memory_space<vmem>>, vector<8x64xf32>,
    %554 = vector.extract_strided_slice %521 {offsets = [40, 0], sizes = [8, 64], strides = [1, 1]} : vector<64x64xf32> to vector<8x64xf32>
    %555 = vector.extract_strided_slice %523 {offsets = [16, 0], sizes = [8, 64], strides = [1, 1]} : vector<64x64xf32> to vector<8x64xf32>
    %556 = arith.addf %554, %555 : vector<8x64xf32>
    %cst_303 = arith.constant 0.000000e+00 : f32
    %557 = vector.broadcast %cst_303 : f32 to vector<8x64xf32>
    %558 = arith.maximumf %556, %557 : vector<8x64xf32>
    %c40_304 = arith.constant 40 : index
    %c0_305 = arith.constant 0 : index
    %559 = vector.load %arg17[%c40_304, %c0_305] : memref<64x256xf32, #tpu.memory_space<vmem>>, vector<8x64xf32>
    tpu.vector_store %arg17[%c40_304, %c0_305], %558 {strides = array<i32>} : memref<64x256xf32, #tpu.memory_space<vmem>>, vector<8x64xf32>,
    %560 = vector.extract_strided_slice %521 {offsets = [48, 0], sizes = [8, 64], strides = [1, 1]} : vector<64x64xf32> to vector<8x64xf32>
    %561 = vector.extract_strided_slice %523 {offsets = [8, 0], sizes = [8, 64], strides = [1, 1]} : vector<64x64xf32> to vector<8x64xf32>
    %562 = arith.addf %560, %561 : vector<8x64xf32>
    %cst_306 = arith.constant 0.000000e+00 : f32
    %563 = vector.broadcast %cst_306 : f32 to vector<8x64xf32>
    %564 = arith.maximumf %562, %563 : vector<8x64xf32>
    %c48_307 = arith.constant 48 : index
    %c0_308 = arith.constant 0 : index
    %565 = vector.load %arg17[%c48_307, %c0_308] : memref<64x256xf32, #tpu.memory_space<vmem>>, vector<8x64xf32>
    tpu.vector_store %arg17[%c48_307, %c0_308], %564 {strides = array<i32>} : memref<64x256xf32, #tpu.memory_space<vmem>>, vector<8x64xf32>,
    %566 = vector.extract_strided_slice %521 {offsets = [56, 0], sizes = [8, 64], strides = [1, 1]} : vector<64x64xf32> to vector<8x64xf32>
    %567 = vector.extract_strided_slice %523 {offsets = [0, 0], sizes = [8, 64], strides = [1, 1]} : vector<64x64xf32> to vector<8x64xf32>
    %568 = arith.addf %566, %567 : vector<8x64xf32>
    %cst_309 = arith.constant 0.000000e+00 : f32
    %569 = vector.broadcast %cst_309 : f32 to vector<8x64xf32>
    %570 = arith.maximumf %568, %569 : vector<8x64xf32>
    %c56_310 = arith.constant 56 : index
    %c0_311 = arith.constant 0 : index
    %571 = vector.load %arg17[%c56_310, %c0_311] : memref<64x256xf32, #tpu.memory_space<vmem>>, vector<8x64xf32>
    tpu.vector_store %arg17[%c56_310, %c0_311], %570 {strides = array<i32>} : memref<64x256xf32, #tpu.memory_space<vmem>>, vector<8x64xf32>,
    %c0_312 = arith.constant 0 : index
    %c0_313 = arith.constant 0 : index
    %572 = vector.load %arg17[%c0_312, %c0_313] : memref<64x256xf32, #tpu.memory_space<vmem>>, vector<64x64xf32>
    %c0_314 = arith.constant 0 : index
    %c0_315 = arith.constant 0 : index
    %573 = vector.load %arg8[%c0_314, %c0_315] : memref<64x32xf32, #tpu.memory_space<vmem>>, vector<64x32xf32>
    %cst_316 = arith.constant dense<0.000000e+00> : vector<64x32xf32>
    %574 = tpu.matmul %572, %573, %cst_316 {dimension_numbers = #tpu.dot_dimension_numbers<[1], [0], [0], [1], [0, 0, 1, 1], [], []>} : vector<64x64xf32>, vector<64x32xf32>, vector<64x32xf32> -> vector<64x32xf32>
    %c0_317 = arith.constant 0 : index
    %c0_318 = arith.constant 0 : index
    %575 = vector.load %arg9[%c0_317, %c0_318] : memref<1x32xf32, #tpu.memory_space<vmem>>, vector<1x32xf32>
    %576 = vector.broadcast %575 : vector<1x32xf32> to vector<64x32xf32>
    %577 = arith.addf %574, %576 : vector<64x32xf32>
    %cst_319 = arith.constant 0.000000e+00 : f32
    %578 = vector.broadcast %cst_319 : f32 to vector<64x32xf32>
    %579 = arith.maximumf %577, %578 : vector<64x32xf32>
    %c0_320 = arith.constant 0 : index
    %c0_321 = arith.constant 0 : index
    %580 = vector.load %arg10[%c0_320, %c0_321] : memref<32x128xf32, #tpu.memory_space<vmem>>, vector<32x128xf32>
    %cst_322 = arith.constant dense<0.000000e+00> : vector<64x128xf32>
    %581 = tpu.matmul %579, %580, %cst_322 {dimension_numbers = #tpu.dot_dimension_numbers<[1], [0], [0], [1], [0, 0, 1, 1], [], []>} : vector<64x32xf32>, vector<32x128xf32>, vector<64x128xf32> -> vector<64x128xf32>
    %c0_323 = arith.constant 0 : index
    %c0_324 = arith.constant 0 : index
    %582 = vector.load %arg11[%c0_323, %c0_324] : memref<1x128xf32, #tpu.memory_space<vmem>>, vector<1x128xf32>
    %583 = vector.broadcast %582 : vector<1x128xf32> to vector<64x128xf32>
    %584 = arith.addf %581, %583 : vector<64x128xf32>
    %c0_325 = arith.constant 0 : index
    %c0_326 = arith.constant 0 : index
    %585 = vector.load %arg12[%c0_325, %c0_326] : memref<64x128xf32, #tpu.memory_space<vmem>>, vector<64x128xf32>
    tpu.vector_store %arg12[%c0_325, %c0_326], %584 {strides = array<i32>} : memref<64x128xf32, #tpu.memory_space<vmem>>, vector<64x128xf32>,
    return
  }
}

</mosaic_0001>

<bundles_post_ra>
// kernel: tpu_custom_call.1
= control target key start
LH: loop header
LB: loop body
LE: loop exit
PB: predicated region body
PF: predicated region fallthrough
CT: control target
= control target key end

     0   :  { %20 = vsyncpa [#allocation7], 0  ;;  %s3672_s0 = inlined_call_operand.vmem [shape: f32[64,64], index: 0, kind: input, shape index: {}]   ;;  %s3673_s1 = inlined_call_operand.hbm [shape: f32[2,64,256], index: 1, kind: input, shape index: {}]   ;;  %s3674_s2 = inlined_call_operand.hbm [shape: f32[2,64,256], index: 2, kind: input, shape index: {}]   ;;  %s3675_s3 = inlined_call_operand.hbm [shape: f32[2,64,256], index: 3, kind: input, shape index: {}]   ;;  %s3676_s4 = inlined_call_operand.hbm [shape: f32[2,1,256], index: 4, kind: input, shape index: {}]   ;;  %s3677_s5 = inlined_call_operand.hbm [shape: f32[64,64], index: 5, kind: input, shape index: {}]   ;;  %s3678_s6 = inlined_call_operand.hbm [shape: f32[64,64], index: 6, kind: input, shape index: {}]   ;;  %s3679_s7 = inlined_call_operand.vmem [shape: f32[1,64], index: 7, kind: input, shape index: {}]   ;;  %s3680_s8 = inlined_call_operand.vmem [shape: f32[64,32], index: 8, kind: input, shape index: {}]   ;;  %s3681_s9 = inlined_call_operand.vmem [shape: f32[1,32], index: 9, kind: input, shape index: {}]   ;;  %s3682_s10 = inlined_call_operand.vmem [shape: f32[32,128], index: 10, kind: input, shape index: {}]   ;;  %s3683_s11 = inlined_call_operand.vmem [shape: f32[1,128], index: 11, kind: input, shape index: {}]   ;;  %s3684_s12 = inlined_call_operand.hbm [shape: f32[64,128], index: 12, kind: output, shape index: {0}]   ;;  %s3685_s13 = inlined_call_operand.hbm [shape: f32[16,64], index: 13, kind: output, shape index: {1}]   ;;  %s3686_s14 = inlined_call_operand.hbm [shape: f32[16,64], index: 14, kind: output, shape index: {2}]  }
   0x1   :  { %21 = vsyncpa [#allocation10], 0 }
   0x2   :  { %22 = vsyncpa [#allocation13], 0 }
   0x3   :  { %23 = vsyncpa [#allocation16], 0 }
   0x4   :  { %24 = vsyncpa [#allocation8], 0 }
   0x5   :  { %25 = vsyncpa [#allocation19], 0  ;;  %s45_s15 = sshll.u32 %s3674_s2, 4  ;;  %s2698_s16 = smov [#allocation9]   ;;  %s46_s15 = int_to_ptr.hbm [resolvable:$true] %s45_s15 }
   0x6   :  { %s47_s17 = sshll.u32 %s2698_s16, 4  ;;  %s71_s20 = sshll.u32 %s3676_s4, 4  ;;  %s48_s17 = int_to_ptr.vmem [resolvable:$true] %s47_s17  ;;  %s72_s20 = int_to_ptr.hbm [resolvable:$true] %s71_s20 }
   0x7   :  { %s2699_s21 = smov 256   ;;  %s2700_s22 = smov 16  }
   0x8   :  { %53 = dma.hbm_to_vmem [thread:$0]  %s46_s15, 4096, %s48_s17, [#allocation10], %s2699_s21, %s2699_s21, %s2700_s22  }
   0x9   :  { %s2701_s23 = smov [#allocation12]   ;;  %s2702_s25 = smov 32  }
   0xa   :  { %s73_s24 = sshll.u32 %s2701_s23, 4  ;;  %s2703_s26 = smov 2   ;;  %s74_s24 = int_to_ptr.vmem [resolvable:$true] %s73_s24 }
   0xb   :  { %79 = dma.hbm_to_vmem [thread:$0]  %s72_s20, 64, %s74_s24, [#allocation13], %s2702_s25, %s2702_s25, %s2703_s26  }
   0xc   :  { %s32_s28 = sshll.u32 %s3673_s1, 4  ;;  %s2704_s29 = smov [#allocation6]   ;;  %s33_s28 = int_to_ptr.hbm [resolvable:$true] %s32_s28 }
   0xd   :  { %s34_s30 = sshll.u32 %s2704_s29, 4  ;;  %s58_s18 = sshll.u32 %s3675_s3, 4  ;;  %s35_s30 = int_to_ptr.vmem [resolvable:$true] %s34_s30  ;;  %s59_s18 = int_to_ptr.hbm [resolvable:$true] %s58_s18 }
   0xe   :  { %40 = dma.hbm_to_vmem [thread:$0]  %s33_s28, 4096, %s35_s30, [#allocation7], %s2699_s21, %s2699_s21, %s2700_s22  }
   0xf   :  { %s2705_s15 = smov [#allocation11]   ;;  %s84_s20 = sshll.u32 %s3677_s5, 4  ;;  %s85_s20 = int_to_ptr.hbm [resolvable:$true] %s84_s20 }
  0x10   :  { %s60_s17 = sshll.u32 %s2705_s15, 4  ;;  %s2706_s1 = smov [#allocation14]   ;;  %s61_s17 = int_to_ptr.vmem [resolvable:$true] %s60_s17 }
  0x11   :  { %66 = dma.hbm_to_vmem [thread:$0]  %s59_s18, 4096, %s61_s17, [#allocation10], %s2699_s21, %s2699_s21, %s2700_s22  }
  0x12   :  { %s86_s24 = sshll.u32 %s2706_s1, 4  ;;  %s97_s27 = sshll.u32 %s3678_s6, 4  ;;  %s87_s24 = int_to_ptr.vmem [resolvable:$true] %s86_s24  ;;  %s98_s27 = int_to_ptr.hbm [resolvable:$true] %s97_s27 }
  0x13   :  { %s2707_s2 = smov 128   ;;  %s2708_s3 = smov 8  }
  0x14   :  { %92 = dma.hbm_to_vmem [thread:$0]  %s85_s20, 1024, %s87_s24, [#allocation13], %s2707_s2, %s2707_s2, %s2708_s3  }
  0x15   :  { %s2709_s28 = smov [#allocation15]  }
  0x16   :  { %s99_s29 = sshll.u32 %s2709_s28, 4  ;;  %s100_s29 = int_to_ptr.vmem [resolvable:$true] %s99_s29 }
  0x17   :  { %105 = dma.hbm_to_vmem [thread:$0]  %s98_s27, 1024, %s100_s29, [#allocation16], %s2707_s2, %s2707_s2, %s2708_s3  }
  0x18   :  { %2686 = dma.done.wait [#allocation7], 4096  }
  0x19   :  { %2687 = vsyncadd [#allocation7], 4294963200 }
  0x1a   :  { %2688 = dma.done.wait [#allocation10], 8192  }
  0x1b   :  { %2689 = vsyncadd [#allocation10], 4294959104 }
  0x1c   :  { %2690 = dma.done.wait [#allocation13], 1088  }
  0x1d   :  { %2691 = vsyncadd [#allocation13], 4294966208 }
  0x1e   :  { %2692 = dma.done.wait [#allocation16], 1024  }
  0x1f   :  { %2693 = vsyncadd [#allocation16], 4294966272  ;;  %v162_v0 = vld [vmem:[#allocation6 + $0x70] sm:$0xff]  ;;  %v163_v1 = vld [vmem:[#allocation6 + $0x78] sm:$0xff]  ;;  %vm170_vm0 = vcmask 523264   ;;  %v3687_v56 = vmov 0.0  }
  0x20   :  { %v291_v2 = vld [vmem:[#allocation9 + $0x70] sm:$0xff]  ;;  %203 = vmatpush.msra.mxu0 %v162_v0  ;;  %244 = vmatpush.msra.mxu1 %v163_v1  ;;  %v292_v3 = vld [vmem:[#allocation9 + $0x78] sm:$0xff]  ;;  %v160_v4 = vld [vmem:[#allocation6 + $0x60] sm:$0xff]  ;;  %vm2099_vm1 = vcmask 261120   ;;  %s2192_s21 = sshll.u32 %s3685_s13, 4  ;;  %s2713_s22 = smov [#allocation20]   ;;  %s2193_s21 = int_to_ptr.hbm [resolvable:$true] %s2192_s21 }
  0x21   :  { %v161_v5 = vld [vmem:[#allocation6 + $0x68] sm:$0xff]  ;;  %301 = vmatpush.msra.mxu2 %v291_v2  ;;  %342 = vmatpush.msra.mxu3 %v292_v3  ;;  %v289_v6 = vld [vmem:[#allocation9 + $0x60] sm:$0xff]  ;;  %v158_v8 = vld [vmem:[#allocation6 + $0x50] sm:$0xff]  ;;  %s2203_s30 = sshll.u32 %s2713_s22, 4  ;;  %s2205_s18 = sshll.u32 %s3686_s14, 4  ;;  %s2204_s30 = int_to_ptr.vmem [resolvable:$true] %s2203_s30  ;;  %s2206_s18 = int_to_ptr.hbm [resolvable:$true] %s2205_s18 }
  0x22   :  { %v290_v7 = vld [vmem:[#allocation9 + $0x68] sm:$0xff]  ;;  %204 = vmatpush.msra.mxu0 %v160_v4  ;;  %245 = vmatpush.msra.mxu1 %v161_v5  ;;  %v159_v9 = vld [vmem:[#allocation6 + $0x58] sm:$0xff]  ;;  %v287_v10 = vld [vmem:[#allocation9 + $0x50] sm:$0xff]  ;;  %s2179_s23 = sshll.u32 %s3684_s12, 4  ;;  %s2180_s23 = int_to_ptr.hbm [resolvable:$true] %s2179_s23 }
  0x23   :  { %v288_v11 = vld [vmem:[#allocation9 + $0x58] sm:$0xff]  ;;  %302 = vmatpush.msra.mxu2 %v289_v6  ;;  %343 = vmatpush.msra.mxu3 %v290_v7  ;;  %v156_v12 = vld [vmem:[#allocation6 + $0x40] sm:$0xff]  ;;  %v157_v13 = vld [vmem:[#allocation6 + $0x48] sm:$0xff] }
  0x24   :  { %205 = vmatpush.msra.mxu0 %v158_v8  ;;  %246 = vmatpush.msra.mxu1 %v159_v9  ;;  %v285_v14 = vld [vmem:[#allocation9 + $0x40] sm:$0xff]  ;;  %v286_v15 = vld [vmem:[#allocation9 + $0x48] sm:$0xff]  ;;  %v154_v16 = vld [vmem:[#allocation6 + $0x30] sm:$0xff] }
  0x25   :  { %303 = vmatpush.msra.mxu2 %v287_v10  ;;  %344 = vmatpush.msra.mxu3 %v288_v11  ;;  %v155_v17 = vld [vmem:[#allocation6 + $0x38] sm:$0xff]  ;;  %v283_v18 = vld [vmem:[#allocation9 + $0x30] sm:$0xff]  ;;  %v152_v20 = vld [vmem:[#allocation6 + $0x20] sm:$0xff] }
  0x26   :  { %206 = vmatpush.msra.mxu0 %v156_v12  ;;  %247 = vmatpush.msra.mxu1 %v157_v13  ;;  %v284_v19 = vld [vmem:[#allocation9 + $0x38] sm:$0xff]  ;;  %v153_v21 = vld [vmem:[#allocation6 + $0x28] sm:$0xff]  ;;  %v281_v22 = vld [vmem:[#allocation9 + $0x20] sm:$0xff] }
  0x27   :  { %304 = vmatpush.msra.mxu2 %v285_v14  ;;  %345 = vmatpush.msra.mxu3 %v286_v15  ;;  %v282_v23 = vld [vmem:[#allocation9 + $0x28] sm:$0xff]  ;;  %v150_v24 = vld [vmem:[#allocation6 + $0x10] sm:$0xff]  ;;  %v151_v25 = vld [vmem:[#allocation6 + $0x18] sm:$0xff] }
  0x28   :  { %207 = vmatpush.msra.mxu0 %v154_v16  ;;  %248 = vmatpush.msra.mxu1 %v155_v17  ;;  %v279_v26 = vld [vmem:[#allocation9 + $0x10] sm:$0xff]  ;;  %v280_v27 = vld [vmem:[#allocation9 + $0x18] sm:$0xff]  ;;  %v148_v28 = vld [vmem:[#allocation6] sm:$0xff] }
  0x29   :  { %305 = vmatpush.msra.mxu2 %v283_v18  ;;  %346 = vmatpush.msra.mxu3 %v284_v19  ;;  %v149_v29 = vld [vmem:[#allocation6 + $0x8] sm:$0xff]  ;;  %v277_v30 = vld [vmem:[#allocation9] sm:$0xff]  ;;  %v2817_v33 = vld [vmem:[#allocation11 + $0x70] sm:$0xff] }
  0x2a   :  { %208 = vmatpush.msra.mxu0 %v152_v20  ;;  %249 = vmatpush.msra.mxu1 %v153_v21  ;;  %v278_v31 = vld [vmem:[#allocation9 + $0x8] sm:$0xff]  ;;  %v140_v32 = vld [vmem:[%s3672_s0] sm:$0xff]  ;;  %v2819_v34 = vld [vmem:[#allocation11 + $0x78] sm:$0xff] }
  0x2b   :  { %306 = vmatpush.msra.mxu2 %v281_v22  ;;  %347 = vmatpush.msra.mxu3 %v282_v23  ;;  %v2825_v35 = vld [vmem:[#allocation11 + $0x60] sm:$0xff]  ;;  %v2827_v36 = vld [vmem:[#allocation11 + $0x68] sm:$0xff]  ;;  %v2831_v37 = vld [vmem:[#allocation11 + $0x50] sm:$0xff] }
  0x2c   :  { %209 = vmatpush.msra.mxu0 %v150_v24  ;;  %250 = vmatpush.msra.mxu1 %v151_v25  ;;  %v2833_v38 = vld [vmem:[#allocation11 + $0x58] sm:$0xff]  ;;  %v141_v39 = vld [vmem:[%s3672_s0 + $0x8] sm:$0xff]  ;;  %v2846_v40 = vld [vmem:[#allocation11 + $0x40] sm:$0xff] }
  0x2d   :  { %307 = vmatpush.msra.mxu2 %v279_v26  ;;  %348 = vmatpush.msra.mxu3 %v280_v27  ;;  %v2848_v41 = vld [vmem:[#allocation11 + $0x48] sm:$0xff]  ;;  %v2856_v42 = vld [vmem:[#allocation11 + $0x30] sm:$0xff]  ;;  %v2858_v43 = vld [vmem:[#allocation11 + $0x38] sm:$0xff] }
  0x2e   :  { %210 = vmatpush.msra.mxu0 %v148_v28  ;;  %251 = vmatpush.msra.mxu1 %v149_v29  ;;  %v142_v44 = vld [vmem:[%s3672_s0 + $0x10] sm:$0xff]  ;;  %v2875_v45 = vld [vmem:[#allocation11 + $0x20] sm:$0xff]  ;;  %v2877_v46 = vld [vmem:[#allocation11 + $0x28] sm:$0xff] }
  0x2f   :  { %308 = vmatpush.msra.mxu2 %v277_v30  ;;  %349 = vmatpush.msra.mxu3 %v278_v31  ;;  %v143_v47 = vld [vmem:[%s3672_s0 + $0x18] sm:$0xff]  ;;  %v2890_v48 = vld [vmem:[#allocation11 + $0x10] sm:$0xff]  ;;  %v2894_v50 = vld [vmem:[#allocation11] sm:$0xff] }
  0x30   :  { %2230 = vmatmul.msk.f32.vlgmr.msra.gmra.mxu0 %vm170_vm0, %v140_v32  ;;  %2238 = vmatmul.msk.f32.vlgmr.msra.gmra.mxu1 %vm170_vm0, %v140_v32  ;;  %v2892_v49 = vld [vmem:[#allocation11 + $0x18] sm:$0xff]  ;;  %v2898_v51 = vld [vmem:[#allocation11 + $0x8] sm:$0xff]  ;;  %v144_v52 = vld [vmem:[%s3672_s0 + $0x20] sm:$0xff] }
  0x31   :  { %2246 = vmatmul.msk.f32.vlgmr.msra.gmra.mxu2 %vm170_vm0, %v140_v32  ;;  %2254 = vmatmul.msk.f32.vlgmr.msra.gmra.mxu3 %vm170_vm0, %v140_v32  ;;  %v145_v53 = vld [vmem:[%s3672_s0 + $0x28] sm:$0xff]  ;;  %v146_v54 = vld [vmem:[%s3672_s0 + $0x30] sm:$0xff]  ;;  %v147_v55 = vld [vmem:[%s3672_s0 + $0x38] sm:$0xff]  ;;  %s2711_s0 = smov 64  }
  0x32   :  { %468 = vmatpush.msrb.mxu0 %v2817_v33  ;;  %488 = vmatpush.msrb.mxu1 %v2819_v34  ;;  %v164_v19 = vld [vmem:[#allocation12] sm:$0x3] }
  0x33   :  { %534 = vmatpush.msrb.mxu2 %v2817_v33  ;;  %554 = vmatpush.msrb.mxu3 %v2819_v34  ;;  %v3036_v24 = vperm.slane %v164_v19, 0  ;;  %v3038_v25 = vperm.slane %v164_v19, 1 }
  0x34   :  { %469 = vmatpush.msrb.mxu0 %v2825_v35  ;;  %489 = vmatpush.msrb.mxu1 %v2827_v36 }
  0x35   :  { %535 = vmatpush.msrb.mxu2 %v2825_v35  ;;  %555 = vmatpush.msrb.mxu3 %v2827_v36 }
  0x36   :  { %470 = vmatpush.msrb.mxu0 %v2831_v37  ;;  %490 = vmatpush.msrb.mxu1 %v2833_v38 }
  0x37   :  { %536 = vmatpush.msrb.mxu2 %v2831_v37  ;;  %556 = vmatpush.msrb.mxu3 %v2833_v38 }
  0x38   :  { %2231 = vmatmul.msk.f32.gmra.mxu0 %vm170_vm0, %v141_v39  ;;  %2239 = vmatmul.msk.f32.gmra.mxu1 %vm170_vm0, %v141_v39 }
  0x39   :  { %2247 = vmatmul.msk.f32.gmra.mxu2 %vm170_vm0, %v141_v39  ;;  %2255 = vmatmul.msk.f32.gmra.mxu3 %vm170_vm0, %v141_v39 }
  0x3a   :  { %471 = vmatpush.msrb.mxu0 %v2846_v40  ;;  %491 = vmatpush.msrb.mxu1 %v2848_v41 }
  0x3b   :  { %537 = vmatpush.msrb.mxu2 %v2846_v40  ;;  %557 = vmatpush.msrb.mxu3 %v2848_v41 }
  0x3c   :  { %472 = vmatpush.msrb.mxu0 %v2856_v42  ;;  %492 = vmatpush.msrb.mxu1 %v2858_v43 }
  0x3d   :  { %538 = vmatpush.msrb.mxu2 %v2856_v42  ;;  %558 = vmatpush.msrb.mxu3 %v2858_v43 }
  0x3e   :  { %473 = vmatpush.msrb.mxu0 %v2875_v45  ;;  %493 = vmatpush.msrb.mxu1 %v2877_v46 }
  0x3f   :  { %539 = vmatpush.msrb.mxu2 %v2875_v45  ;;  %559 = vmatpush.msrb.mxu3 %v2877_v46 }
  0x40   :  { %2232 = vmatmul.msk.f32.gmra.mxu0 %vm170_vm0, %v142_v44  ;;  %2240 = vmatmul.msk.f32.gmra.mxu1 %vm170_vm0, %v142_v44 }
  0x41   :  { %2248 = vmatmul.msk.f32.gmra.mxu2 %vm170_vm0, %v142_v44  ;;  %2256 = vmatmul.msk.f32.gmra.mxu3 %vm170_vm0, %v142_v44 }
  0x42   :  { %474 = vmatpush.msrb.mxu0 %v2890_v48  ;;  %494 = vmatpush.msrb.mxu1 %v2892_v49 }
  0x43   :  { %540 = vmatpush.msrb.mxu2 %v2890_v48  ;;  %560 = vmatpush.msrb.mxu3 %v2892_v49 }
  0x44   :  { %475 = vmatpush.msrb.mxu0 %v2894_v50  ;;  %495 = vmatpush.msrb.mxu1 %v2898_v51 }
  0x45   :  { %541 = vmatpush.msrb.mxu2 %v2894_v50  ;;  %561 = vmatpush.msrb.mxu3 %v2898_v51 }
  0x46   :  { %600 = vmatpush.msra.mxu0 %v2817_v33  ;;  %620 = vmatpush.msra.mxu1 %v2819_v34 }
  0x47   :  { %666 = vmatpush.msra.mxu2 %v2817_v33  ;;  %686 = vmatpush.msra.mxu3 %v2819_v34 }
  0x48   :  { %2233 = vmatmul.msk.f32.gmra.mxu0 %vm170_vm0, %v143_v47  ;;  %2241 = vmatmul.msk.f32.gmra.mxu1 %vm170_vm0, %v143_v47 }
  0x49   :  { %2249 = vmatmul.msk.f32.gmra.mxu2 %vm170_vm0, %v143_v47  ;;  %2257 = vmatmul.msk.f32.gmra.mxu3 %vm170_vm0, %v143_v47 }
  0x4a   :  { %601 = vmatpush.msra.mxu0 %v2825_v35  ;;  %621 = vmatpush.msra.mxu1 %v2827_v36 }
  0x4b   :  { %667 = vmatpush.msra.mxu2 %v2825_v35  ;;  %687 = vmatpush.msra.mxu3 %v2827_v36 }
  0x4c   :  { %602 = vmatpush.msra.mxu0 %v2831_v37  ;;  %622 = vmatpush.msra.mxu1 %v2833_v38 }
  0x4d   :  { %668 = vmatpush.msra.mxu2 %v2831_v37  ;;  %688 = vmatpush.msra.mxu3 %v2833_v38 }
  0x4e   :  { %603 = vmatpush.msra.mxu0 %v2846_v40  ;;  %623 = vmatpush.msra.mxu1 %v2848_v41 }
  0x4f   :  { %669 = vmatpush.msra.mxu2 %v2846_v40  ;;  %689 = vmatpush.msra.mxu3 %v2848_v41 }
  0x50   :  { %2234 = vmatmul.msk.f32.gmra.mxu0 %vm170_vm0, %v144_v52  ;;  %2242 = vmatmul.msk.f32.gmra.mxu1 %vm170_vm0, %v144_v52 }
  0x51   :  { %2250 = vmatmul.msk.f32.gmra.mxu2 %vm170_vm0, %v144_v52  ;;  %2258 = vmatmul.msk.f32.gmra.mxu3 %vm170_vm0, %v144_v52 }
  0x52   :  { %604 = vmatpush.msra.mxu0 %v2856_v42  ;;  %624 = vmatpush.msra.mxu1 %v2858_v43 }
  0x53   :  { %670 = vmatpush.msra.mxu2 %v2856_v42  ;;  %690 = vmatpush.msra.mxu3 %v2858_v43 }
  0x54   :  { %605 = vmatpush.msra.mxu0 %v2875_v45  ;;  %625 = vmatpush.msra.mxu1 %v2877_v46 }
  0x55   :  { %671 = vmatpush.msra.mxu2 %v2875_v45  ;;  %691 = vmatpush.msra.mxu3 %v2877_v46 }
  0x56   :  { %606 = vmatpush.msra.mxu0 %v2890_v48  ;;  %626 = vmatpush.msra.mxu1 %v2892_v49 }
  0x57   :  { %672 = vmatpush.msra.mxu2 %v2890_v48  ;;  %692 = vmatpush.msra.mxu3 %v2892_v49 }
  0x58   :  { %2235 = vmatmul.msk.f32.gmra.mxu0 %vm170_vm0, %v145_v53  ;;  %2243 = vmatmul.msk.f32.gmra.mxu1 %vm170_vm0, %v145_v53 }
  0x59   :  { %2251 = vmatmul.msk.f32.gmra.mxu2 %vm170_vm0, %v145_v53  ;;  %2259 = vmatmul.msk.f32.gmra.mxu3 %vm170_vm0, %v145_v53 }
  0x5a   :  { %607 = vmatpush.msra.mxu0 %v2894_v50  ;;  %627 = vmatpush.msra.mxu1 %v2898_v51 }
  0x5b   :  { %673 = vmatpush.msra.mxu2 %v2894_v50  ;;  %693 = vmatpush.msra.mxu3 %v2898_v51 }
  0x60   :  { %2236 = vmatmul.msk.f32.gmra.mxu0 %vm170_vm0, %v146_v54  ;;  %2244 = vmatmul.msk.f32.gmra.mxu1 %vm170_vm0, %v146_v54 }
  0x61   :  { %2252 = vmatmul.msk.f32.gmra.mxu2 %vm170_vm0, %v146_v54  ;;  %2260 = vmatmul.msk.f32.gmra.mxu3 %vm170_vm0, %v146_v54 }
  0x68   :  { %2237 = vmatmul.msk.f32.gmra.mxu0 %vm170_vm0, %v147_v55  ;;  %2245 = vmatmul.msk.f32.gmra.mxu1 %vm170_vm0, %v147_v55 }
  0x69   :  { %2253 = vmatmul.msk.f32.gmra.mxu2 %vm170_vm0, %v147_v55  ;;  %2261 = vmatmul.msk.f32.gmra.mxu3 %vm170_vm0, %v147_v55 }
  0x70   :  { %476 = vmatmul.f32.vlgmr.msrb.gmra.mxu0 %v3687_v56  ;;  %496 = vmatmul.f32.vlgmr.msrb.gmra.mxu1 %v3687_v56 }
  0x71   :  { %732 = vmatpush.msrb.mxu0 %v2817_v33  ;;  %752 = vmatpush.msrb.mxu1 %v2819_v34 }
  0x73   :  { %733 = vmatpush.msrb.mxu0 %v2825_v35  ;;  %753 = vmatpush.msrb.mxu1 %v2827_v36 }
  0x75   :  { %734 = vmatpush.msrb.mxu0 %v2831_v37  ;;  %754 = vmatpush.msrb.mxu1 %v2833_v38 }
  0x77   :  { %735 = vmatpush.msrb.mxu0 %v2846_v40  ;;  %755 = vmatpush.msrb.mxu1 %v2848_v41 }
  0x79   :  { %736 = vmatpush.msrb.mxu0 %v2856_v42  ;;  %756 = vmatpush.msrb.mxu1 %v2858_v43 }
  0x7b   :  { %737 = vmatpush.msrb.mxu0 %v2875_v45  ;;  %757 = vmatpush.msrb.mxu1 %v2877_v46 }
  0x7d   :  { %738 = vmatpush.msrb.mxu0 %v2890_v48  ;;  %758 = vmatpush.msrb.mxu1 %v2892_v49 }
  0x7f   :  { %739 = vmatpush.msrb.mxu0 %v2894_v50  ;;  %759 = vmatpush.msrb.mxu1 %v2898_v51 }
  0xad   :  { %v212_v57 = vpop.f32.mrf.mxu0  ;;  %v253_v58 = vpop.f32.mrf.mxu1 }
  0xae   :  { %v213_v26 = vadd.f32 %v212_v57, %v3036_v24  ;;  %v254_v27 = vadd.f32 %v253_v58, %v3038_v25 }
  0xb4   :  { %v2984_v59 = vpop.f32.mrf.mxu2  ;;  %v2986_v60 = vpop.f32.mrf.mxu3 }
  0xb5   :  { %v2988_v61 = vpop.f32.mrf.mxu0  ;;  %v2990_v62 = vpop.f32.mrf.mxu1 }
  0xbc   :  { %v2992_v63 = vpop.f32.mrf.mxu2  ;;  %v2994_v0 = vpop.f32.mrf.mxu3 }
  0xbd   :  { %v2996_v1 = vpop.f32.mrf.mxu0  ;;  %v2998_v2 = vpop.f32.mrf.mxu1 }
  0xc4   :  { %v3000_v3 = vpop.f32.mrf.mxu2  ;;  %v3002_v4 = vpop.f32.mrf.mxu3 }
  0xc5   :  { %v3004_v5 = vpop.f32.mrf.mxu0  ;;  %v3006_v6 = vpop.f32.mrf.mxu1 }
  0xcc   :  { %v3008_v7 = vpop.f32.mrf.mxu2  ;;  %v3010_v8 = vpop.f32.mrf.mxu3 }
  0xcd   :  { %v3012_v9 = vpop.f32.mrf.mxu0  ;;  %v3014_v10 = vpop.f32.mrf.mxu1 }
  0xd4   :  { %v3016_v11 = vpop.f32.mrf.mxu2  ;;  %v3018_v12 = vpop.f32.mrf.mxu3 }
  0xd5   :  { %v3020_v13 = vpop.f32.mrf.mxu0  ;;  %v3022_v14 = vpop.f32.mrf.mxu1 }
  0xdc   :  { %v3024_v15 = vpop.f32.mrf.mxu2  ;;  %v3026_v16 = vpop.f32.mrf.mxu3 }
  0xdd   :  { %v3028_v17 = vpop.f32.mrf.mxu0  ;;  %v3030_v18 = vpop.f32.mrf.mxu1 }
  0xe4   :  { %v328_v20 = vpop.f32.mrf.mxu2  ;;  %v369_v21 = vpop.f32.mrf.mxu3 }
  0xe5   :  { %v3032_v22 = vpop.f32.mrf.mxu0  ;;  %v3034_v23 = vpop.f32.mrf.mxu1 }
  0xec   :  { %v331_v28 = vpop.f32.mrf.mxu2  ;;  %v372_v29 = vpop.f32.mrf.mxu3 }
  0xed   :  { %v393_v30 = vadd.f32 %v331_v28, %v213_v26  ;;  %v394_v31 = vadd.f32 %v372_v29, %v254_v27  ;;  %v477_v32 = vpop.f32.mrf.mxu0  ;;  %v497_v39 = vpop.f32.mrf.mxu1 }
  0xef   :  { %v500_v44 = vadd.f32 %v477_v32, %v393_v30  ;;  %v501_v47 = vadd.f32 %v497_v39, %v394_v31  ;;  %v216_v31 = vadd.f32 %v2988_v61, %v3036_v24  ;;  %v257_v32 = vadd.f32 %v2990_v62, %v3038_v25 }
  0xf1   :  { %2374 = vtanh.f32 %v500_v44  ;;  %v399_v39 = vadd.f32 %v328_v20, %v216_v31  ;;  %v260_v31 = vadd.f32 %v2998_v2, %v3038_v25 }
  0xf2   :  { %2376 = vtanh.f32 %v501_v47 }
  0xf7   :  { %v2375_v52 = vpop.eup %2374 }
  0xf8   :  { %v504_v53 = vmul.f32 0.5, %v2375_v52  ;;  %v2377_v55 = vpop.eup %2376  ;;  %v400_v52 = vadd.f32 %v369_v21, %v257_v32 }
  0xf9   :  { %v506_v26 = vmul.f32 0.5, %v2377_v55 }
  0xfa   :  { %v505_v54 = vadd.f32 0.5, %v504_v53 }
  0xfb   :  { %v507_v27 = vadd.f32 0.5, %v506_v26 }
  0xfc   :  { %v509_v19 = vmul.f32 %v2377_v55, %v505_v54  ;;  %v508_v57 = vmul.f32 0.0, %v505_v54 }
  0xfe   :  { %511 = vrot.lane.b32.xlu0 %v509_v19, %s2711_s0 }
 0x170   :  { %v512_v58 = vpop.permute.xlu0 %511 }
 0x171   :  { %v514_v56 = vadd.f32 %v512_v58, %v508_v57 }
 0x173   :  { %2378 = vtanh.f32 %v514_v56 }
 0x179   :  { %v2379_v28 = vpop.eup %2378 }
 0x17a   :  { %v516_v29 = vmul.f32 %v2379_v28, %v507_v27 }
 0x17c   :  { %518 = vrot.lane.b32.xlu0 %v516_v29, %s2711_s0 }
 0x1ee   :  { %v519_v30 = vpop.permute.xlu0 %518 }
 0x1ef   :  { %521 = vst.msk [vmem:[#allocation2] sm:$0xff] %vm170_vm0, %v519_v30  ;;  %2262 = vmatmul.msk.f32.vlgmr.msrb.gmra.mxu2 %vm170_vm0, %v519_v30  ;;  %2263 = vmatmul.msk.f32.vlgmr.msrb.gmra.mxu3 %vm170_vm0, %v519_v30 }
 0x1f0   :  { %798 = vmatpush.msrb.mxu2 %v2817_v33  ;;  %818 = vmatpush.msrb.mxu3 %v2819_v34 }
 0x1f2   :  { %799 = vmatpush.msrb.mxu2 %v2825_v35  ;;  %819 = vmatpush.msrb.mxu3 %v2827_v36 }
 0x1f4   :  { %800 = vmatpush.msrb.mxu2 %v2831_v37  ;;  %820 = vmatpush.msrb.mxu3 %v2833_v38 }
 0x1f6   :  { %801 = vmatpush.msrb.mxu2 %v2846_v40  ;;  %821 = vmatpush.msrb.mxu3 %v2848_v41 }
 0x1f8   :  { %802 = vmatpush.msrb.mxu2 %v2856_v42  ;;  %822 = vmatpush.msrb.mxu3 %v2858_v43 }
 0x1fa   :  { %803 = vmatpush.msrb.mxu2 %v2875_v45  ;;  %823 = vmatpush.msrb.mxu3 %v2877_v46 }
 0x1fc   :  { %804 = vmatpush.msrb.mxu2 %v2890_v48  ;;  %824 = vmatpush.msrb.mxu3 %v2892_v49 }
 0x1fe   :  { %805 = vmatpush.msrb.mxu2 %v2894_v50  ;;  %825 = vmatpush.msrb.mxu3 %v2898_v51 }
 0x272   :  { %v543_v44 = vpop.f32.mrf.mxu2  ;;  %v563_v47 = vpop.f32.mrf.mxu3 }
 0x273   :  { %v566_v53 = vadd.f32 %v543_v44, %v399_v39  ;;  %v567_v54 = vadd.f32 %v563_v47, %v400_v52  ;;  %v406_v47 = vadd.f32 %v3026_v16, %v260_v31 }
 0x275   :  { %2380 = vtanh.f32 %v566_v53 }
 0x276   :  { %2382 = vtanh.f32 %v567_v54 }
 0x27b   :  { %v2381_v55 = vpop.eup %2380 }
 0x27c   :  { %v570_v19 = vmul.f32 0.5, %v2381_v55  ;;  %v2383_v58 = vpop.eup %2382 }
 0x27d   :  { %v572_v62 = vmul.f32 0.5, %v2383_v58 }
 0x27e   :  { %v571_v57 = vadd.f32 0.5, %v570_v19 }
 0x27f   :  { %v573_v20 = vadd.f32 0.5, %v572_v62 }
 0x280   :  { %v575_v26 = vmul.f32 %v2383_v58, %v571_v57  ;;  %v574_v27 = vmul.f32 %v571_v57, %v514_v56  ;;  %v219_v56 = vadd.f32 %v2996_v1, %v3036_v24 }
 0x282   :  { %577 = vrot.lane.b32.xlu1 %v575_v26, %s2711_s0  ;;  %v405_v32 = vadd.f32 %v3024_v15, %v219_v56 }
 0x2f4   :  { %v578_v61 = vpop.permute.xlu1 %577 }
 0x2f5   :  { %v580_v28 = vadd.f32 %v578_v61, %v574_v27 }
 0x2f7   :  { %2384 = vtanh.f32 %v580_v28 }
 0x2fd   :  { %v2385_v29 = vpop.eup %2384 }
 0x2fe   :  { %v582_v30 = vmul.f32 %v2385_v29, %v573_v20  ;;  %v225_v20 = vadd.f32 %v3012_v9, %v3036_v24  ;;  %v266_v29 = vadd.f32 %v3014_v10, %v3038_v25 }
 0x300   :  { %584 = vrot.lane.b32.xlu1 %v582_v30, %s2711_s0  ;;  %v417_v30 = vadd.f32 %v3008_v7, %v225_v20  ;;  %v418_v31 = vadd.f32 %v3010_v8, %v266_v29  ;;  %v1002_v20 = vld [vmem:[#allocation6 + $0x98] sm:$0xff]  ;;  %v999_v29 = vld [vmem:[#allocation6 + $0x80] sm:$0xff] }
 0x372   :  { %v585_v21 = vpop.permute.xlu1 %584 }
 0x373   :  { %587 = vst.msk [vmem:[#allocation2 + $0x8] sm:$0xff] %vm170_vm0, %v585_v21  ;;  %2264 = vmatmul.msk.f32.vlgmr.msra.gmra.mxu0 %vm170_vm0, %v585_v21  ;;  %2265 = vmatmul.msk.f32.vlgmr.msra.gmra.mxu1 %vm170_vm0, %v585_v21 }
 0x374   :  { %864 = vmatpush.msra.mxu0 %v2817_v33  ;;  %884 = vmatpush.msra.mxu1 %v2819_v34 }
 0x376   :  { %865 = vmatpush.msra.mxu0 %v2825_v35  ;;  %885 = vmatpush.msra.mxu1 %v2827_v36 }
 0x378   :  { %866 = vmatpush.msra.mxu0 %v2831_v37  ;;  %886 = vmatpush.msra.mxu1 %v2833_v38 }
 0x37a   :  { %867 = vmatpush.msra.mxu0 %v2846_v40  ;;  %887 = vmatpush.msra.mxu1 %v2848_v41 }
 0x37c   :  { %868 = vmatpush.msra.mxu0 %v2856_v42  ;;  %888 = vmatpush.msra.mxu1 %v2858_v43 }
 0x37e   :  { %869 = vmatpush.msra.mxu0 %v2875_v45  ;;  %889 = vmatpush.msra.mxu1 %v2877_v46 }
 0x380   :  { %870 = vmatpush.msra.mxu0 %v2890_v48  ;;  %890 = vmatpush.msra.mxu1 %v2892_v49 }
 0x382   :  { %871 = vmatpush.msra.mxu0 %v2894_v50  ;;  %891 = vmatpush.msra.mxu1 %v2898_v51 }
 0x3f0   :  { %v609_v39 = vpop.f32.mrf.mxu0  ;;  %v629_v44 = vpop.f32.mrf.mxu1 }
 0x3f1   :  { %v632_v52 = vadd.f32 %v609_v39, %v405_v32  ;;  %v633_v53 = vadd.f32 %v629_v44, %v406_v47 }
 0x3f3   :  { %2386 = vtanh.f32 %v632_v52 }
 0x3f4   :  { %2388 = vtanh.f32 %v633_v53 }
 0x3f9   :  { %v2387_v54 = vpop.eup %2386 }
 0x3fa   :  { %v636_v55 = vmul.f32 0.5, %v2387_v54  ;;  %v2389_v57 = vpop.eup %2388 }
 0x3fb   :  { %v638_v15 = vmul.f32 0.5, %v2389_v57 }
 0x3fc   :  { %v637_v19 = vadd.f32 0.5, %v636_v55 }
 0x3fd   :  { %v639_v27 = vadd.f32 0.5, %v638_v15 }
 0x3fe   :  { %v641_v58 = vmul.f32 %v2389_v57, %v637_v19  ;;  %v640_v1 = vmul.f32 %v637_v19, %v580_v28 }
 0x400   :  { %643 = vrot.lane.b32.xlu2 %v641_v58, %s2711_s0 }
 0x45a   :  { %v644_v26 = vpop.permute.xlu2 %643 }
 0x45b   :  { %v646_v2 = vadd.f32 %v644_v26, %v640_v1  ;;  %v228_v1 = vadd.f32 %v3020_v13, %v3036_v24  ;;  %v269_v26 = vadd.f32 %v3022_v14, %v3038_v25  ;;  %v1013_v13 = vld [vmem:[#allocation6 + $0xf0] sm:$0xff]  ;;  %v1011_v14 = vld [vmem:[#allocation6 + $0xe0] sm:$0xff] }
 0x45d   :  { %2390 = vtanh.f32 %v646_v2 }
 0x463   :  { %v2391_v61 = vpop.eup %2390 }
 0x464   :  { %v648_v62 = vmul.f32 %v2391_v61, %v639_v27  ;;  %v424_v61 = vadd.f32 %v3002_v4, %v269_v26  ;;  %v1007_v4 = vld [vmem:[#allocation6 + $0xc0] sm:$0xff] }
 0x466   :  { %650 = vrot.lane.b32.xlu2 %v648_v62, %s2711_s0 }
 0x4c0   :  { %v651_v16 = vpop.permute.xlu2 %650 }
 0x4c1   :  { %653 = vst.msk [vmem:[#allocation2 + $0x10] sm:$0xff] %vm170_vm0, %v651_v16  ;;  %2266 = vmatmul.msk.f32.vlgmr.msra.gmra.mxu2 %vm170_vm0, %v651_v16  ;;  %2267 = vmatmul.msk.f32.vlgmr.msra.gmra.mxu3 %vm170_vm0, %v651_v16 }
 0x4c2   :  { %930 = vmatpush.msra.mxu2 %v2817_v33  ;;  %950 = vmatpush.msra.mxu3 %v2819_v34  ;;  %v222_v33 = vadd.f32 %v3004_v5, %v3036_v24  ;;  %v263_v34 = vadd.f32 %v3006_v6, %v3038_v25 }
 0x4c4   :  { %931 = vmatpush.msra.mxu2 %v2825_v35  ;;  %951 = vmatpush.msra.mxu3 %v2827_v36  ;;  %v411_v35 = vadd.f32 %v3016_v11, %v222_v33 }
 0x4c6   :  { %932 = vmatpush.msra.mxu2 %v2831_v37  ;;  %952 = vmatpush.msra.mxu3 %v2833_v38  ;;  %v412_v38 = vadd.f32 %v3018_v12, %v263_v34 }
 0x4c8   :  { %933 = vmatpush.msra.mxu2 %v2846_v40  ;;  %953 = vmatpush.msra.mxu3 %v2848_v41 }
 0x4ca   :  { %934 = vmatpush.msra.mxu2 %v2856_v42  ;;  %954 = vmatpush.msra.mxu3 %v2858_v43 }
 0x4cc   :  { %935 = vmatpush.msra.mxu2 %v2875_v45  ;;  %955 = vmatpush.msra.mxu3 %v2877_v46 }
 0x4ce   :  { %936 = vmatpush.msra.mxu2 %v2890_v48  ;;  %956 = vmatpush.msra.mxu3 %v2892_v49 }
 0x4d0   :  { %937 = vmatpush.msra.mxu2 %v2894_v50  ;;  %957 = vmatpush.msra.mxu3 %v2898_v51 }
 0x544   :  { %v675_v36 = vpop.f32.mrf.mxu2  ;;  %v695_v37 = vpop.f32.mrf.mxu3 }
 0x545   :  { %v698_v40 = vadd.f32 %v675_v36, %v411_v35  ;;  %v699_v41 = vadd.f32 %v695_v37, %v412_v38  ;;  %v1014_v38 = vld [vmem:[#allocation6 + $0xf8] sm:$0xff] }
 0x547   :  { %2392 = vtanh.f32 %v698_v40  ;;  %v1009_v40 = vld [vmem:[#allocation6 + $0xd0] sm:$0xff] }
 0x548   :  { %2394 = vtanh.f32 %v699_v41  ;;  %v1010_v41 = vld [vmem:[#allocation6 + $0xd8] sm:$0xff] }
 0x54d   :  { %v2393_v42 = vpop.eup %2392 }
 0x54e   :  { %v702_v43 = vmul.f32 0.5, %v2393_v42  ;;  %v2395_v46 = vpop.eup %2394  ;;  %v1008_v42 = vld [vmem:[#allocation6 + $0xc8] sm:$0xff] }
 0x54f   :  { %v704_v5 = vmul.f32 0.5, %v2395_v46 }
 0x550   :  { %v703_v45 = vadd.f32 0.5, %v702_v43 }
 0x551   :  { %v705_v6 = vadd.f32 0.5, %v704_v5  ;;  %v1005_v5 = vld [vmem:[#allocation6 + $0xb0] sm:$0xff] }
 0x552   :  { %v707_v48 = vmul.f32 %v2395_v46, %v703_v45  ;;  %v706_v49 = vmul.f32 %v703_v45, %v646_v2  ;;  %v423_v2 = vadd.f32 %v3000_v3, %v228_v1  ;;  %v1012_v3 = vld [vmem:[#allocation6 + $0xe8] sm:$0xff] }
 0x554   :  { %709 = vrot.lane.b32.xlu0 %v707_v48, %s2711_s0 }
 0x5c6   :  { %v710_v50 = vpop.permute.xlu0 %709 }
 0x5c7   :  { %v712_v51 = vadd.f32 %v710_v50, %v706_v49 }
 0x5c9   :  { %2396 = vtanh.f32 %v712_v51 }
 0x5cf   :  { %v2397_v11 = vpop.eup %2396 }
 0x5d0   :  { %v714_v28 = vmul.f32 %v2397_v11, %v705_v6  ;;  %v1006_v6 = vld [vmem:[#allocation6 + $0xb8] sm:$0xff]  ;;  %v1003_v11 = vld [vmem:[#allocation6 + $0xa0] sm:$0xff] }
 0x5d2   :  { %716 = vrot.lane.b32.xlu1 %v714_v28, %s2711_s0  ;;  %v1004_v28 = vld [vmem:[#allocation6 + $0xa8] sm:$0xff] }
 0x644   :  { %v717_v12 = vpop.permute.xlu1 %716 }
 0x645   :  { %719 = vst.msk [vmem:[#allocation2 + $0x18] sm:$0xff] %vm170_vm0, %v717_v12  ;;  %2268 = vmatmul.msk.f32.vlgmr.msrb.gmra.mxu0 %vm170_vm0, %v717_v12  ;;  %2269 = vmatmul.msk.f32.vlgmr.msrb.gmra.mxu1 %vm170_vm0, %v717_v12  ;;  %v1001_v12 = vld [vmem:[#allocation6 + $0x90] sm:$0xff] }
 0x646   :  { %1054 = vmatpush.msrb.mxu0 %v1013_v13  ;;  %1095 = vmatpush.msrb.mxu1 %v1014_v38  ;;  %v1135_v13 = vld [vmem:[#allocation9 + $0xb0] sm:$0xff]  ;;  %v1136_v38 = vld [vmem:[#allocation9 + $0xb8] sm:$0xff] }
 0x648   :  { %1055 = vmatpush.msrb.mxu0 %v1011_v14  ;;  %1096 = vmatpush.msrb.mxu1 %v1012_v3  ;;  %v1133_v14 = vld [vmem:[#allocation9 + $0xa0] sm:$0xff]  ;;  %v1134_v3 = vld [vmem:[#allocation9 + $0xa8] sm:$0xff] }
 0x64a   :  { %1056 = vmatpush.msrb.mxu0 %v1009_v40  ;;  %1097 = vmatpush.msrb.mxu1 %v1010_v41  ;;  %v1131_v40 = vld [vmem:[#allocation9 + $0x90] sm:$0xff]  ;;  %v1132_v41 = vld [vmem:[#allocation9 + $0x98] sm:$0xff] }
 0x64c   :  { %1057 = vmatpush.msrb.mxu0 %v1007_v4  ;;  %1098 = vmatpush.msrb.mxu1 %v1008_v42  ;;  %v1129_v4 = vld [vmem:[#allocation9 + $0x80] sm:$0xff]  ;;  %v1130_v42 = vld [vmem:[#allocation9 + $0x88] sm:$0xff] }
 0x64e   :  { %1058 = vmatpush.msrb.mxu0 %v1005_v5  ;;  %1099 = vmatpush.msrb.mxu1 %v1006_v6 }
 0x650   :  { %1059 = vmatpush.msrb.mxu0 %v1003_v11  ;;  %1100 = vmatpush.msrb.mxu1 %v1004_v28  ;;  %v234_v28 = vadd.f32 %v3032_v22, %v3036_v24 }
 0x652   :  { %1060 = vmatpush.msrb.mxu0 %v1001_v12  ;;  %1101 = vmatpush.msrb.mxu1 %v1002_v20 }
 0x654   :  { %1061 = vmatpush.msrb.mxu0 %v999_v29  ;;  %v275_v29 = vadd.f32 %v3034_v23, %v3038_v25 }
 0x6c2   :  { %v741_v21 = vpop.f32.mrf.mxu0  ;;  %v761_v56 = vpop.f32.mrf.mxu1 }
 0x6c3   :  { %v764_v32 = vadd.f32 %v741_v21, %v417_v30  ;;  %v765_v39 = vadd.f32 %v761_v56, %v418_v31  ;;  %v1000_v30 = vld [vmem:[#allocation6 + $0x88] sm:$0xff]  ;;  %v3151_v56 = vld [vmem:[#allocation2] sm:$0xff] }
 0x6c4   :  { %1102 = vmatpush.msrb.mxu1 %v1000_v30  ;;  %v3157_v31 = vld [vmem:[#allocation2 + $0x8] sm:$0xff]  ;;  %v435_v30 = vadd.f32 %v2984_v59, %v234_v28 }
 0x6c5   :  { %2398 = vtanh.f32 %v764_v32  ;;  %v3163_v32 = vld [vmem:[#allocation2 + $0x10] sm:$0xff] }
 0x6c6   :  { %2400 = vtanh.f32 %v765_v39  ;;  %v3169_v39 = vld [vmem:[#allocation2 + $0x18] sm:$0xff] }
 0x6cb   :  { %v2399_v44 = vpop.eup %2398 }
 0x6cc   :  { %v768_v47 = vmul.f32 0.5, %v2399_v44  ;;  %v2401_v53 = vpop.eup %2400 }
 0x6cd   :  { %v770_v7 = vmul.f32 0.5, %v2401_v53 }
 0x6ce   :  { %v769_v52 = vadd.f32 0.5, %v768_v47 }
 0x6cf   :  { %v771_v19 = vadd.f32 0.5, %v770_v7 }
 0x6d0   :  { %v773_v54 = vmul.f32 %v2401_v53, %v769_v52  ;;  %v772_v9 = vmul.f32 %v769_v52, %v712_v51  ;;  %v231_v52 = vadd.f32 %v3028_v17, %v3036_v24  ;;  %v272_v53 = vadd.f32 %v3030_v18, %v3038_v25  ;;  %v1143_v17 = vld [vmem:[#allocation9 + $0xf0] sm:$0xff]  ;;  %v1141_v18 = vld [vmem:[#allocation9 + $0xe0] sm:$0xff] }
 0x6d2   :  { %775 = vrot.lane.b32.xlu2 %v773_v54, %s2711_s0  ;;  %v429_v54 = vadd.f32 %v2992_v63, %v231_v52  ;;  %v1142_v63 = vld [vmem:[#allocation9 + $0xe8] sm:$0xff] }
 0x72c   :  { %v776_v55 = vpop.permute.xlu2 %775 }
 0x72d   :  { %v778_v10 = vadd.f32 %v776_v55, %v772_v9 }
 0x72f   :  { %2402 = vtanh.f32 %v778_v10 }
 0x735   :  { %v2403_v57 = vpop.eup %2402 }
 0x736   :  { %v780_v58 = vmul.f32 %v2403_v57, %v771_v19 }
 0x738   :  { %782 = vrot.lane.b32.xlu0 %v780_v58, %s2711_s0 }
 0x7aa   :  { %v783_v8 = vpop.permute.xlu0 %782 }
 0x7ab   :  { %785 = vst.msk [vmem:[#allocation2 + $0x20] sm:$0xff] %vm170_vm0, %v783_v8  ;;  %2270 = vmatmul.msk.f32.vlgmr.msrb.gmra.mxu2 %vm170_vm0, %v783_v8  ;;  %2271 = vmatmul.msk.f32.vlgmr.msrb.gmra.mxu3 %vm170_vm0, %v783_v8 }
 0x7ac   :  { %1153 = vmatpush.msrb.mxu2 %v1143_v17 }
 0x7ae   :  { %1154 = vmatpush.msrb.mxu2 %v1141_v18 }
 0x7b2   :  { %v3175_v44 = vld [vmem:[#allocation2 + $0x20] sm:$0xff] }
 0x82e   :  { %v807_v15 = vpop.f32.mrf.mxu2  ;;  %v827_v27 = vpop.f32.mrf.mxu3 }
 0x82f   :  { %v830_v62 = vadd.f32 %v807_v15, %v423_v2  ;;  %v831_v16 = vadd.f32 %v827_v27, %v424_v61  ;;  %v1144_v2 = vld [vmem:[#allocation9 + $0xf8] sm:$0xff]  ;;  %v1139_v15 = vld [vmem:[#allocation9 + $0xd0] sm:$0xff]  ;;  %v1138_v61 = vld [vmem:[#allocation9 + $0xc8] sm:$0xff] }
 0x830   :  { %1194 = vmatpush.msrb.mxu3 %v1144_v2  ;;  %v1140_v27 = vld [vmem:[#allocation9 + $0xd8] sm:$0xff]  ;;  %1155 = vmatpush.msrb.mxu2 %v1139_v15 }
 0x831   :  { %2404 = vtanh.f32 %v830_v62 }
 0x832   :  { %2406 = vtanh.f32 %v831_v16  ;;  %1195 = vmatpush.msrb.mxu3 %v1142_v63 }
 0x834   :  { %1196 = vmatpush.msrb.mxu3 %v1140_v27 }
 0x836   :  { %1197 = vmatpush.msrb.mxu3 %v1138_v61 }
 0x837   :  { %v2405_v33 = vpop.eup %2404 }
 0x838   :  { %v834_v34 = vmul.f32 0.5, %v2405_v33  ;;  %v2407_v36 = vpop.eup %2406  ;;  %1198 = vmatpush.msrb.mxu3 %v1136_v38 }
 0x839   :  { %v836_v48 = vmul.f32 0.5, %v2407_v36 }
 0x83a   :  { %v835_v35 = vadd.f32 0.5, %v834_v34  ;;  %1199 = vmatpush.msrb.mxu3 %v1134_v3 }
 0x83b   :  { %v837_v49 = vadd.f32 0.5, %v836_v48 }
 0x83c   :  { %v839_v37 = vmul.f32 %v2407_v36, %v835_v35  ;;  %v838_v43 = vmul.f32 %v835_v35, %v778_v10  ;;  %v430_v10 = vadd.f32 %v2994_v0, %v272_v53  ;;  %v1137_v0 = vld [vmem:[#allocation9 + $0xc0] sm:$0xff]  ;;  %1200 = vmatpush.msrb.mxu3 %v1132_v41 }
 0x83d   :  { %1156 = vmatpush.msrb.mxu2 %v1137_v0 }
 0x83e   :  { %841 = vrot.lane.b32.xlu1 %v839_v37, %s2711_s0  ;;  %1201 = vmatpush.msrb.mxu3 %v1130_v42 }
 0x83f   :  { %1157 = vmatpush.msrb.mxu2 %v1135_v13 }
 0x841   :  { %1158 = vmatpush.msrb.mxu2 %v1133_v14 }
 0x843   :  { %1159 = vmatpush.msrb.mxu2 %v1131_v40 }
 0x845   :  { %1160 = vmatpush.msrb.mxu2 %v1129_v4 }
 0x8b0   :  { %v842_v45 = vpop.permute.xlu1 %841 }
 0x8b1   :  { %v3144_v46 = vadd.f32 %v842_v45, %v838_v43 }
 0x8b3   :  { %2408 = vtanh.f32 %v3144_v46 }
 0x8b9   :  { %v2409_v50 = vpop.eup %2408 }
 0x8ba   :  { %v846_v51 = vmul.f32 %v2409_v50, %v837_v49 }
 0x8bc   :  { %848 = vrot.lane.b32.xlu2 %v846_v51, %s2711_s0 }
 0x916   :  { %v849_v21 = vpop.permute.xlu2 %848 }
 0x917   :  { %851 = vst.msk [vmem:[#allocation2 + $0x28] sm:$0xff] %vm170_vm0, %v849_v21  ;;  %2272 = vmatmul.msk.f32.vlgmr.msra.gmra.mxu0 %vm170_vm0, %v849_v21  ;;  %2273 = vmatmul.msk.f32.vlgmr.msra.gmra.mxu1 %vm170_vm0, %v849_v21 }
 0x91e   :  { %v3181_v47 = vld [vmem:[#allocation2 + $0x28] sm:$0xff] }
 0x91f   :  { %2276 = vmatmul.msk.f32.vlgmr.msrb.gmra.mxu0 %vm170_vm0, %v3151_v56  ;;  %2284 = vmatmul.msk.f32.vlgmr.msrb.gmra.mxu1 %vm170_vm0, %v3151_v56 }
 0x927   :  { %2277 = vmatmul.msk.f32.gmra.mxu0 %vm170_vm0, %v3157_v31  ;;  %2285 = vmatmul.msk.f32.gmra.mxu1 %vm170_vm0, %v3157_v31 }
 0x92f   :  { %2278 = vmatmul.msk.f32.gmra.mxu0 %vm170_vm0, %v3163_v32  ;;  %2286 = vmatmul.msk.f32.gmra.mxu1 %vm170_vm0, %v3163_v32 }
 0x937   :  { %2279 = vmatmul.msk.f32.gmra.mxu0 %vm170_vm0, %v3169_v39  ;;  %2287 = vmatmul.msk.f32.gmra.mxu1 %vm170_vm0, %v3169_v39 }
 0x93f   :  { %2280 = vmatmul.msk.f32.gmra.mxu0 %vm170_vm0, %v3175_v44  ;;  %2288 = vmatmul.msk.f32.gmra.mxu1 %vm170_vm0, %v3175_v44 }
 0x947   :  { %2281 = vmatmul.msk.f32.gmra.mxu0 %vm170_vm0, %v3181_v47  ;;  %2289 = vmatmul.msk.f32.gmra.mxu1 %vm170_vm0, %v3181_v47 }
 0x994   :  { %v873_v9 = vpop.f32.mrf.mxu0  ;;  %v893_v55 = vpop.f32.mrf.mxu1 }
 0x995   :  { %v896_v7 = vadd.f32 %v873_v9, %v429_v54  ;;  %v897_v19 = vadd.f32 %v893_v55, %v430_v10  ;;  %v1016_v54 = vld [vmem:[#allocation12 + $0x2] sm:$0x3] }
 0x996   :  { %v3254_v55 = vperm.slane %v1016_v54, 1 }
 0x997   :  { %2410 = vtanh.f32 %v896_v7 }
 0x998   :  { %2412 = vtanh.f32 %v897_v19 }
 0x99c   :  { %v3232_v48 = vpop.f32.mrf.mxu1 }
 0x99d   :  { %v2411_v57 = vpop.eup %2410 }
 0x99e   :  { %v900_v58 = vmul.f32 0.5, %v2411_v57  ;;  %v2413_v1 = vpop.eup %2412 }
 0x99f   :  { %v902_v34 = vmul.f32 0.5, %v2413_v1 }
 0x9a0   :  { %v901_v8 = vadd.f32 0.5, %v900_v58 }
 0x9a1   :  { %v903_v35 = vadd.f32 0.5, %v902_v34 }
 0x9a2   :  { %v905_v26 = vmul.f32 %v2413_v1, %v901_v8  ;;  %v904_v62 = vmul.f32 %v901_v8, %v3144_v46  ;;  %v3230_v46 = vpop.f32.mrf.mxu0 }
 0x9a4   :  { %907 = vrot.lane.b32.xlu0 %v905_v26, %s2711_s0  ;;  %v3236_v50 = vpop.f32.mrf.mxu1 }
 0x9aa   :  { %v3234_v49 = vpop.f32.mrf.mxu0 }
 0x9ac   :  { %v1110_v5 = vpop.f32.mrf.mxu1 }
 0x9ad   :  { %v1111_v40 = vadd.f32 %v1110_v5, %v3254_v55  ;;  %v3303_v5 = vld [vmem:[#allocation11 + $0xf0] sm:$0xff] }
 0x9ae   :  { %1318 = vmatpush.msra.mxu0 %v3303_v5 }
 0x9b2   :  { %v1069_v51 = vpop.f32.mrf.mxu0 }
 0x9b4   :  { %v1113_v11 = vpop.f32.mrf.mxu1 }
 0x9ba   :  { %v1072_v6 = vpop.f32.mrf.mxu0 }
 0x9bc   :  { %v1116_v20 = vpop.f32.mrf.mxu1 }
 0x9bd   :  { %v1117_v0 = vadd.f32 %v1116_v20, %v3254_v55  ;;  %v3305_v20 = vld [vmem:[#allocation11 + $0xf8] sm:$0xff] }
 0x9be   :  { %1338 = vmatpush.msra.mxu1 %v3305_v20 }
 0x9c2   :  { %v1075_v12 = vpop.f32.mrf.mxu0 }
 0xa16   :  { %v908_v16 = vpop.permute.xlu0 %907 }
 0xa17   :  { %v3195_v33 = vadd.f32 %v908_v16, %v904_v62 }
 0xa19   :  { %2414 = vtanh.f32 %v3195_v33 }
 0xa1f   :  { %v2415_v36 = vpop.eup %2414 }
 0xa20   :  { %v912_v37 = vmul.f32 %v2415_v36, %v903_v35  ;;  %v1114_v36 = vadd.f32 %v1113_v11, %v3254_v55 }
 0xa22   :  { %914 = vrot.lane.b32.xlu1 %v912_v37, %s2711_s0 }
 0xa94   :  { %v915_v43 = vpop.permute.xlu1 %914 }
 0xa95   :  { %917 = vst.msk [vmem:[#allocation2 + $0x30] sm:$0xff] %vm170_vm0, %v915_v43  ;;  %2274 = vmatmul.msk.f32.vlgmr.msra.gmra.mxu2 %vm170_vm0, %v915_v43  ;;  %2275 = vmatmul.msk.f32.vlgmr.msra.gmra.mxu3 %vm170_vm0, %v915_v43 }
 0xa96   :  { %1384 = vmatpush.msra.mxu2 %v3303_v5  ;;  %1404 = vmatpush.msra.mxu3 %v3305_v20 }
 0xa9c   :  { %v996_v45 = vld [vmem:[#allocation2 + $0x30] sm:$0xff] }
 0xa9d   :  { %2282 = vmatmul.msk.f32.gmra.mxu0 %vm170_vm0, %v996_v45  ;;  %2290 = vmatmul.msk.f32.gmra.mxu1 %vm170_vm0, %v996_v45 }
 0xa9e   :  { %2292 = vmatmul.msk.f32.vlgmr.msrb.gmra.mxu2 %vm170_vm0, %v3151_v56  ;;  %2300 = vmatmul.msk.f32.vlgmr.msrb.gmra.mxu3 %vm170_vm0, %v3151_v56 }
 0xaa6   :  { %2293 = vmatmul.msk.f32.gmra.mxu2 %vm170_vm0, %v3157_v31  ;;  %2301 = vmatmul.msk.f32.gmra.mxu3 %vm170_vm0, %v3157_v31  ;;  %v436_v31 = vadd.f32 %v2986_v60, %v275_v29  ;;  %v3252_v60 = vperm.slane %v1016_v54, 0  ;;  %v3307_v29 = vld [vmem:[#allocation11 + $0xe0] sm:$0xff] }
 0xaa7   :  { %1319 = vmatpush.msra.mxu0 %v3307_v29  ;;  %1385 = vmatpush.msra.mxu2 %v3307_v29 }
 0xaa8   :  { %v1076_v27 = vadd.f32 %v1075_v12, %v3252_v60  ;;  %v1073_v35 = vadd.f32 %v1072_v6, %v3252_v60  ;;  %v1070_v3 = vadd.f32 %v1069_v51, %v3252_v60  ;;  %v1108_v6 = vadd.f32 %v3236_v50, %v3254_v55  ;;  %v3313_v50 = vld [vmem:[#allocation11 + $0xd0] sm:$0xff] }
 0xaa9   :  { %1320 = vmatpush.msra.mxu0 %v3313_v50  ;;  %1386 = vmatpush.msra.mxu2 %v3313_v50 }
 0xaae   :  { %2294 = vmatmul.msk.f32.gmra.mxu2 %vm170_vm0, %v3163_v32  ;;  %2302 = vmatmul.msk.f32.gmra.mxu3 %vm170_vm0, %v3163_v32 }
 0xab6   :  { %2295 = vmatmul.msk.f32.gmra.mxu2 %vm170_vm0, %v3169_v39  ;;  %2303 = vmatmul.msk.f32.gmra.mxu3 %vm170_vm0, %v3169_v39 }
 0xabe   :  { %2296 = vmatmul.msk.f32.gmra.mxu2 %vm170_vm0, %v3175_v44  ;;  %2304 = vmatmul.msk.f32.gmra.mxu3 %vm170_vm0, %v3175_v44  ;;  %v1078_v44 = vpop.f32.mrf.mxu0 }
 0xabf   :  { %v1079_v26 = vadd.f32 %v1078_v44, %v3252_v60 }
 0xac6   :  { %2297 = vmatmul.msk.f32.gmra.mxu2 %vm170_vm0, %v3181_v47  ;;  %2305 = vmatmul.msk.f32.gmra.mxu3 %vm170_vm0, %v3181_v47  ;;  %v1119_v47 = vpop.f32.mrf.mxu1 }
 0xac7   :  { %v1120_v17 = vadd.f32 %v1119_v47, %v3254_v55 }
 0xace   :  { %2298 = vmatmul.msk.f32.gmra.mxu2 %vm170_vm0, %v996_v45  ;;  %2306 = vmatmul.msk.f32.gmra.mxu3 %vm170_vm0, %v996_v45  ;;  %v1067_v45 = vadd.f32 %v3234_v49, %v3252_v60  ;;  %v3311_v49 = vld [vmem:[#allocation11 + $0xe8] sm:$0xff] }
 0xacf   :  { %1339 = vmatpush.msra.mxu1 %v3311_v49  ;;  %1405 = vmatpush.msra.mxu3 %v3311_v49 }
 0xb18   :  { %v939_v21 = vpop.f32.mrf.mxu2  ;;  %v959_v56 = vpop.f32.mrf.mxu3 }
 0xb19   :  { %v962_v32 = vadd.f32 %v939_v21, %v435_v30  ;;  %v963_v39 = vadd.f32 %v959_v56, %v436_v31  ;;  %v3315_v30 = vld [vmem:[#allocation11 + $0xd8] sm:$0xff]  ;;  %v3321_v21 = vld [vmem:[#allocation11 + $0xc0] sm:$0xff]  ;;  %v3323_v56 = vld [vmem:[#allocation11 + $0xc8] sm:$0xff] }
 0xb1a   :  { %v1081_v25 = vpop.f32.mrf.mxu0  ;;  %v1122_v9 = vpop.f32.mrf.mxu1  ;;  %1340 = vmatpush.msra.mxu1 %v3315_v30  ;;  %v3329_v31 = vld [vmem:[#allocation11 + $0xb0] sm:$0xff]  ;;  %1406 = vmatpush.msra.mxu3 %v3315_v30 }
 0xb1b   :  { %2416 = vtanh.f32 %v962_v32  ;;  %v1082_v7 = vadd.f32 %v1081_v25, %v3252_v60  ;;  %v1123_v19 = vadd.f32 %v1122_v9, %v3254_v55  ;;  %v3331_v32 = vld [vmem:[#allocation11 + $0xb8] sm:$0xff]  ;;  %1321 = vmatpush.msra.mxu0 %v3321_v21  ;;  %1387 = vmatpush.msra.mxu2 %v3321_v21  ;;  %v3350_v9 = vld [vmem:[#allocation11 + $0xa0] sm:$0xff] }
 0xb1c   :  { %2418 = vtanh.f32 %v963_v39  ;;  %1341 = vmatpush.msra.mxu1 %v3323_v56  ;;  %1407 = vmatpush.msra.mxu3 %v3323_v56 }
 0xb1d   :  { %1322 = vmatpush.msra.mxu0 %v3329_v31  ;;  %1388 = vmatpush.msra.mxu2 %v3329_v31 }
 0xb1e   :  { %1342 = vmatpush.msra.mxu1 %v3331_v32  ;;  %1408 = vmatpush.msra.mxu3 %v3331_v32 }
 0xb1f   :  { %1323 = vmatpush.msra.mxu0 %v3350_v9  ;;  %1389 = vmatpush.msra.mxu2 %v3350_v9 }
 0xb21   :  { %v2417_v52 = vpop.eup %2416  ;;  %v3244_v53 = vpop.f32.mrf.mxu2 }
 0xb22   :  { %v3246_v22 = vpop.f32.mrf.mxu3  ;;  %v966_v24 = vmul.f32 0.5, %v2417_v52  ;;  %v3250_v59 = vpop.eup %2418 }
 0xb23   :  { %v968_v52 = vmul.f32 0.5, %v3250_v59 }
 0xb24   :  { %v3248_v23 = vadd.f32 0.5, %v966_v24 }
 0xb25   :  { %v969_v24 = vadd.f32 0.5, %v968_v52 }
 0xb26   :  { %v971_v10 = vmul.f32 %v3250_v59, %v3248_v23  ;;  %v970_v39 = vmul.f32 %v3248_v23, %v3195_v33  ;;  %v3358_v33 = vld [vmem:[#allocation11 + $0x90] sm:$0xff]  ;;  %v3360_v23 = vld [vmem:[#allocation11 + $0x98] sm:$0xff]  ;;  %v3362_v59 = vld [vmem:[#allocation11 + $0x80] sm:$0xff] }
 0xb27   :  { %1324 = vmatpush.msra.mxu0 %v3358_v33  ;;  %1390 = vmatpush.msra.mxu2 %v3358_v33 }
 0xb28   :  { %973 = vrot.lane.b32.xlu2 %v971_v10, %s2711_s0  ;;  %v3352_v10 = vld [vmem:[#allocation11 + $0xa8] sm:$0xff] }
 0xb29   :  { %v1165_v57 = vpop.f32.mrf.mxu2  ;;  %1343 = vmatpush.msra.mxu1 %v3352_v10  ;;  %1409 = vmatpush.msra.mxu3 %v3352_v10 }
 0xb2a   :  { %v1206_v58 = vpop.f32.mrf.mxu3  ;;  %v3261_v8 = vadd.f32 %v1165_v57, %v1082_v7  ;;  %v3366_v7 = vld [vmem:[#allocation11 + $0x88] sm:$0xff]  ;;  %1325 = vmatpush.msra.mxu0 %v3362_v59  ;;  %1391 = vmatpush.msra.mxu2 %v3362_v59 }
 0xb2b   :  { %v3263_v1 = vadd.f32 %v1206_v58, %v1123_v19  ;;  %1344 = vmatpush.msra.mxu1 %v3360_v23  ;;  %1410 = vmatpush.msra.mxu3 %v3360_v23  ;;  %v3689_v58 = vmov 0.0  }
 0xb2c   :  { %1283 = vst [vmem:[#allocation4 + $0x60] sm:$0xff] %v3261_v8  ;;  %1450 = vmatpush.msrb.mxu0 %v3303_v5  ;;  %1516 = vmatpush.msrb.mxu2 %v3303_v5 }
 0xb2d   :  { %1345 = vmatpush.msra.mxu1 %v3366_v7  ;;  %1411 = vmatpush.msra.mxu3 %v3366_v7 }
 0xb2e   :  { %1451 = vmatpush.msrb.mxu0 %v3307_v29  ;;  %1517 = vmatpush.msrb.mxu2 %v3307_v29 }
 0xb2f   :  { %1470 = vmatpush.msrb.mxu1 %v3305_v20  ;;  %1536 = vmatpush.msrb.mxu3 %v3305_v20 }
 0xb30   :  { %1452 = vmatpush.msrb.mxu0 %v3313_v50  ;;  %1518 = vmatpush.msrb.mxu2 %v3313_v50 }
 0xb31   :  { %v1168_v2 = vpop.f32.mrf.mxu2  ;;  %1471 = vmatpush.msrb.mxu1 %v3311_v49  ;;  %1537 = vmatpush.msrb.mxu3 %v3311_v49 }
 0xb32   :  { %v1209_v18 = vpop.f32.mrf.mxu3  ;;  %v3268_v63 = vadd.f32 %v1168_v2, %v1079_v26  ;;  %1453 = vmatpush.msrb.mxu0 %v3321_v21  ;;  %1519 = vmatpush.msrb.mxu2 %v3321_v21 }
 0xb33   :  { %v3270_v15 = vadd.f32 %v1209_v18, %v1120_v17  ;;  %1472 = vmatpush.msrb.mxu1 %v3315_v30  ;;  %1538 = vmatpush.msrb.mxu3 %v3315_v30 }
 0xb34   :  { %1277 = vst [vmem:[#allocation4 + $0x50] sm:$0xff] %v3268_v63  ;;  %1454 = vmatpush.msrb.mxu0 %v3329_v31  ;;  %1520 = vmatpush.msrb.mxu2 %v3329_v31 }
 0xb35   :  { %1473 = vmatpush.msrb.mxu1 %v3323_v56  ;;  %1539 = vmatpush.msrb.mxu3 %v3323_v56 }
 0xb36   :  { %1455 = vmatpush.msrb.mxu0 %v3350_v9  ;;  %1521 = vmatpush.msrb.mxu2 %v3350_v9 }
 0xb37   :  { %1474 = vmatpush.msrb.mxu1 %v3331_v32  ;;  %1540 = vmatpush.msrb.mxu3 %v3331_v32 }
 0xb38   :  { %1456 = vmatpush.msrb.mxu0 %v3358_v33  ;;  %1522 = vmatpush.msrb.mxu2 %v3358_v33 }
 0xb39   :  { %v1171_v61 = vpop.f32.mrf.mxu2  ;;  %1475 = vmatpush.msrb.mxu1 %v3352_v10  ;;  %1541 = vmatpush.msrb.mxu3 %v3352_v10 }
 0xb3a   :  { %v1212_v62 = vpop.f32.mrf.mxu3  ;;  %v3275_v16 = vadd.f32 %v1171_v61, %v1076_v27  ;;  %1457 = vmatpush.msrb.mxu0 %v3362_v59  ;;  %1523 = vmatpush.msrb.mxu2 %v3362_v59  ;;  %v1064_v61 = vadd.f32 %v3230_v46, %v3252_v60 }
 0xb3b   :  { %v3277_v34 = vadd.f32 %v1212_v62, %v1117_v0  ;;  %1476 = vmatpush.msrb.mxu1 %v3360_v23  ;;  %1542 = vmatpush.msrb.mxu3 %v3360_v23  ;;  %v1105_v62 = vadd.f32 %v3232_v48, %v3254_v55 }
 0xb3c   :  { %1271 = vst [vmem:[#allocation4 + $0x40] sm:$0xff] %v3275_v16 }
 0xb3d   :  { %1477 = vmatpush.msrb.mxu1 %v3366_v7  ;;  %1543 = vmatpush.msrb.mxu3 %v3366_v7 }
 0xb41   :  { %v1174_v37 = vpop.f32.mrf.mxu2 }
 0xb42   :  { %v1215_v13 = vpop.f32.mrf.mxu3  ;;  %v3282_v38 = vadd.f32 %v1174_v37, %v1073_v35 }
 0xb43   :  { %v3284_v14 = vadd.f32 %v1215_v13, %v1114_v36 }
 0xb44   :  { %1265 = vst [vmem:[#allocation4 + $0x30] sm:$0xff] %v3282_v38 }
 0xb49   :  { %v1177_v41 = vpop.f32.mrf.mxu2 }
 0xb4a   :  { %v1218_v4 = vpop.f32.mrf.mxu3  ;;  %v3289_v42 = vadd.f32 %v1177_v41, %v1070_v3 }
 0xb4b   :  { %v3291_v43 = vadd.f32 %v1218_v4, %v1111_v40 }
 0xb4c   :  { %1259 = vst [vmem:[#allocation4 + $0x20] sm:$0xff] %v3289_v42 }
 0xb51   :  { %v1180_v11 = vpop.f32.mrf.mxu2 }
 0xb52   :  { %v1221_v28 = vpop.f32.mrf.mxu3  ;;  %v3298_v12 = vadd.f32 %v1180_v11, %v1067_v45 }
 0xb53   :  { %v3300_v51 = vadd.f32 %v1221_v28, %v1108_v6 }
 0xb54   :  { %1253 = vst [vmem:[#allocation4 + $0x10] sm:$0xff] %v3298_v12 }
 0xb82   :  { %v974_v44 = vpop.permute.xlu2 %973 }
 0xb83   :  { %v3345_v47 = vadd.f32 %v974_v44, %v970_v39 }
 0xb85   :  { %2420 = vtanh.f32 %v3345_v47 }
 0xb8b   :  { %v2421_v54 = vpop.eup %2420 }
 0xb8c   :  { %v978_v25 = vmul.f32 %v2421_v54, %v969_v24 }
 0xb8e   :  { %980 = vrot.lane.b32.xlu0 %v978_v25, %s2711_s0 }
 0xc00   :  { %v981_v19 = vpop.permute.xlu0 %980 }
 0xc01   :  { %983 = vst.msk [vmem:[#allocation2 + $0x38] sm:$0xff] %vm170_vm0, %v981_v19 }
 0xc02   :  { %984 = vst.msk [vmem:[#allocation18] sm:$0xff] %vm170_vm0, %v981_v19 }
 0xc08   :  { %v997_v57 = vld [vmem:[#allocation2 + $0x38] sm:$0xff] }
 0xc09   :  { %2283 = vmatmul.msk.f32.gmra.mxu0 %vm170_vm0, %v997_v57  ;;  %2291 = vmatmul.msk.f32.gmra.mxu1 %vm170_vm0, %v997_v57 }
 0xc0a   :  { %2299 = vmatmul.msk.f32.gmra.mxu2 %vm170_vm0, %v997_v57  ;;  %2307 = vmatmul.msk.f32.gmra.mxu3 %vm170_vm0, %v997_v57 }
 0xc11   :  { %1326 = vmatmul.f32.vlgmr.msra.gmra.mxu0 %v3689_v58  ;;  %1346 = vmatmul.f32.vlgmr.msra.gmra.mxu1 %v3689_v58 }
 0xc12   :  { %1582 = vmatpush.msra.mxu0 %v3303_v5  ;;  %1602 = vmatpush.msra.mxu1 %v3305_v20 }
 0xc14   :  { %1583 = vmatpush.msra.mxu0 %v3307_v29  ;;  %1603 = vmatpush.msra.mxu1 %v3311_v49 }
 0xc16   :  { %1584 = vmatpush.msra.mxu0 %v3313_v50  ;;  %1604 = vmatpush.msra.mxu1 %v3315_v30 }
 0xc18   :  { %1585 = vmatpush.msra.mxu0 %v3321_v21  ;;  %1605 = vmatpush.msra.mxu1 %v3323_v56 }
 0xc1a   :  { %1586 = vmatpush.msra.mxu0 %v3329_v31  ;;  %1606 = vmatpush.msra.mxu1 %v3331_v32 }
 0xc1c   :  { %1587 = vmatpush.msra.mxu0 %v3350_v9  ;;  %1607 = vmatpush.msra.mxu1 %v3352_v10 }
 0xc1e   :  { %1588 = vmatpush.msra.mxu0 %v3358_v33  ;;  %1608 = vmatpush.msra.mxu1 %v3360_v23 }
 0xc20   :  { %1589 = vmatpush.msra.mxu0 %v3362_v59  ;;  %1609 = vmatpush.msra.mxu1 %v3366_v7 }
 0xc86   :  { %v1084_v26 = vpop.f32.mrf.mxu0  ;;  %v1125_v17 = vpop.f32.mrf.mxu1 }
 0xc87   :  { %v1085_v2 = vadd.f32 %v1084_v26, %v3252_v60  ;;  %v1126_v18 = vadd.f32 %v1125_v17, %v3254_v55 }
 0xc89   :  { %v3433_v27 = vadd.f32 %v3244_v53, %v1085_v2  ;;  %v3436_v0 = vadd.f32 %v3246_v22, %v1126_v18 }
 0xc8b   :  { %1289 = vst [vmem:[#allocation4 + $0x70] sm:$0xff] %v3433_v27 }
 0xc8d   :  { %v1183_v35 = vpop.f32.mrf.mxu2  ;;  %v1224_v36 = vpop.f32.mrf.mxu3 }
 0xc8e   :  { %v1245_v37 = vadd.f32 %v1183_v35, %v1064_v61  ;;  %v1246_v13 = vadd.f32 %v1224_v36, %v1105_v62  ;;  %v1327_v3 = vpop.f32.mrf.mxu0  ;;  %v1347_v40 = vpop.f32.mrf.mxu1 }
 0xc90   :  { %1247 = vst [vmem:[#allocation4] sm:$0xff] %v1245_v37  ;;  %v1350_v53 = vadd.f32 %v1327_v3, %v1245_v37  ;;  %v1351_v41 = vadd.f32 %v1347_v40, %v1246_v13 }
 0xc92   :  { %2422 = vtanh.f32 %v1350_v53 }
 0xc93   :  { %2424 = vtanh.f32 %v1351_v41 }
 0xc98   :  { %v2423_v22 = vpop.eup %2422 }
 0xc99   :  { %v1354_v4 = vmul.f32 0.5, %v2423_v22  ;;  %v2425_v6 = vpop.eup %2424 }
 0xc9a   :  { %v1356_v55 = vmul.f32 0.5, %v2425_v6 }
 0xc9b   :  { %v1355_v45 = vadd.f32 0.5, %v1354_v4 }
 0xc9c   :  { %v1357_v28 = vadd.f32 0.5, %v1356_v55 }
 0xc9d   :  { %v1359_v11 = vmul.f32 %v2425_v6, %v1355_v45  ;;  %v1358_v46 = vmul.f32 0.0, %v1355_v45 }
 0xc9f   :  { %1361 = vrot.lane.b32.xlu1 %v1359_v11, %s2711_s0 }
 0xd11   :  { %v1362_v48 = vpop.permute.xlu1 %1361 }
 0xd12   :  { %v1364_v60 = vadd.f32 %v1362_v48, %v1358_v46 }
 0xd14   :  { %2426 = vtanh.f32 %v1364_v60 }
 0xd1a   :  { %v2427_v39 = vpop.eup %2426 }
 0xd1b   :  { %v1366_v44 = vmul.f32 %v2427_v39, %v1357_v28 }
 0xd1d   :  { %1368 = vrot.lane.b32.xlu2 %v1366_v44, %s2711_s0 }
 0xd77   :  { %v1369_v52 = vpop.permute.xlu2 %1368 }
 0xd78   :  { %1371 = vst.msk [vmem:[#allocation3] sm:$0xff] %vm170_vm0, %v1369_v52  ;;  %2308 = vmatmul.msk.f32.vlgmr.msra.gmra.mxu2 %vm170_vm0, %v1369_v52  ;;  %2309 = vmatmul.msk.f32.vlgmr.msra.gmra.mxu3 %vm170_vm0, %v1369_v52 }
 0xd79   :  { %1648 = vmatpush.msra.mxu2 %v3303_v5  ;;  %1668 = vmatpush.msra.mxu3 %v3305_v20 }
 0xd7b   :  { %1649 = vmatpush.msra.mxu2 %v3307_v29  ;;  %1669 = vmatpush.msra.mxu3 %v3311_v49 }
 0xd7d   :  { %1650 = vmatpush.msra.mxu2 %v3313_v50  ;;  %1670 = vmatpush.msra.mxu3 %v3315_v30 }
 0xd7f   :  { %1651 = vmatpush.msra.mxu2 %v3321_v21  ;;  %1671 = vmatpush.msra.mxu3 %v3323_v56 }
 0xd81   :  { %1652 = vmatpush.msra.mxu2 %v3329_v31  ;;  %1672 = vmatpush.msra.mxu3 %v3331_v32 }
 0xd83   :  { %1653 = vmatpush.msra.mxu2 %v3350_v9  ;;  %1673 = vmatpush.msra.mxu3 %v3352_v10 }
 0xd85   :  { %1654 = vmatpush.msra.mxu2 %v3358_v33  ;;  %1674 = vmatpush.msra.mxu3 %v3360_v23 }
 0xd87   :  { %1655 = vmatpush.msra.mxu2 %v3362_v59  ;;  %1675 = vmatpush.msra.mxu3 %v3366_v7 }
 0xdfb   :  { %v1393_v24 = vpop.f32.mrf.mxu2  ;;  %v1413_v54 = vpop.f32.mrf.mxu3 }
 0xdfc   :  { %v1416_v25 = vadd.f32 %v1393_v24, %v3298_v12  ;;  %v1417_v19 = vadd.f32 %v1413_v54, %v3300_v51 }
 0xdfe   :  { %2428 = vtanh.f32 %v1416_v25 }
 0xdff   :  { %2430 = vtanh.f32 %v1417_v19 }
 0xe04   :  { %v2429_v57 = vpop.eup %2428 }
 0xe05   :  { %v1420_v58 = vmul.f32 0.5, %v2429_v57  ;;  %v2431_v17 = vpop.eup %2430 }
 0xe06   :  { %v1422_v35 = vmul.f32 0.5, %v2431_v17 }
 0xe07   :  { %v1421_v26 = vadd.f32 0.5, %v1420_v58 }
 0xe08   :  { %v1423_v36 = vadd.f32 0.5, %v1422_v35 }
 0xe09   :  { %v1425_v2 = vmul.f32 %v2431_v17, %v1421_v26  ;;  %v1424_v18 = vmul.f32 %v1421_v26, %v1364_v60 }
 0xe0b   :  { %1427 = vrot.lane.b32.xlu0 %v1425_v2, %s2711_s0 }
 0xe7d   :  { %v1428_v61 = vpop.permute.xlu0 %1427 }
 0xe7e   :  { %v1430_v62 = vadd.f32 %v1428_v61, %v1424_v18 }
 0xe80   :  { %2432 = vtanh.f32 %v1430_v62 }
 0xe86   :  { %v2433_v37 = vpop.eup %2432 }
 0xe87   :  { %v1432_v13 = vmul.f32 %v2433_v37, %v1423_v36 }
 0xe89   :  { %1434 = vrot.lane.b32.xlu1 %v1432_v13, %s2711_s0 }
 0xefb   :  { %v1435_v12 = vpop.permute.xlu1 %1434 }
 0xefc   :  { %1437 = vst.msk [vmem:[#allocation3 + $0x8] sm:$0xff] %vm170_vm0, %v1435_v12  ;;  %2310 = vmatmul.msk.f32.vlgmr.msrb.gmra.mxu0 %vm170_vm0, %v1435_v12  ;;  %2311 = vmatmul.msk.f32.vlgmr.msrb.gmra.mxu1 %vm170_vm0, %v1435_v12 }
 0xefd   :  { %1714 = vmatpush.msrb.mxu0 %v3303_v5  ;;  %1734 = vmatpush.msrb.mxu1 %v3305_v20 }
 0xeff   :  { %1715 = vmatpush.msrb.mxu0 %v3307_v29  ;;  %1735 = vmatpush.msrb.mxu1 %v3311_v49 }
 0xf01   :  { %1716 = vmatpush.msrb.mxu0 %v3313_v50  ;;  %1736 = vmatpush.msrb.mxu1 %v3315_v30 }
 0xf03   :  { %1717 = vmatpush.msrb.mxu0 %v3321_v21  ;;  %1737 = vmatpush.msrb.mxu1 %v3323_v56 }
 0xf05   :  { %1718 = vmatpush.msrb.mxu0 %v3329_v31  ;;  %1738 = vmatpush.msrb.mxu1 %v3331_v32 }
 0xf07   :  { %1719 = vmatpush.msrb.mxu0 %v3350_v9  ;;  %1739 = vmatpush.msrb.mxu1 %v3352_v10 }
 0xf09   :  { %1720 = vmatpush.msrb.mxu0 %v3358_v33  ;;  %1740 = vmatpush.msrb.mxu1 %v3360_v23 }
 0xf0b   :  { %1721 = vmatpush.msrb.mxu0 %v3362_v59  ;;  %1741 = vmatpush.msrb.mxu1 %v3366_v7 }
 0xf79   :  { %v1459_v51 = vpop.f32.mrf.mxu0  ;;  %v1479_v3 = vpop.f32.mrf.mxu1 }
 0xf7a   :  { %v1482_v40 = vadd.f32 %v1459_v51, %v3289_v42  ;;  %v1483_v53 = vadd.f32 %v1479_v3, %v3291_v43 }
 0xf7c   :  { %2434 = vtanh.f32 %v1482_v40 }
 0xf7d   :  { %2436 = vtanh.f32 %v1483_v53  ;;  %v1855_v53 = vld [vmem:[#allocation14 + $0x38] sm:$0xff] }
 0xf82   :  { %v2435_v41 = vpop.eup %2434 }
 0xf83   :  { %v1486_v22 = vmul.f32 0.5, %v2435_v41  ;;  %v2437_v45 = vpop.eup %2436  ;;  %v1932_v41 = vld [vmem:[#allocation15 + $0x38] sm:$0xff] }
 0xf84   :  { %v1488_v60 = vmul.f32 0.5, %v2437_v45 }
 0xf85   :  { %v1487_v4 = vadd.f32 0.5, %v1486_v22  ;;  %v1854_v22 = vld [vmem:[#allocation14 + $0x30] sm:$0xff] }
 0xf86   :  { %v1489_v55 = vadd.f32 0.5, %v1488_v60 }
 0xf87   :  { %v1491_v6 = vmul.f32 %v2437_v45, %v1487_v4  ;;  %v1490_v11 = vmul.f32 %v1487_v4, %v1430_v62  ;;  %v1931_v4 = vld [vmem:[#allocation15 + $0x30] sm:$0xff]  ;;  %v1853_v45 = vld [vmem:[#allocation14 + $0x28] sm:$0xff] }
 0xf89   :  { %1493 = vrot.lane.b32.xlu2 %v1491_v6, %s2711_s0  ;;  %v1930_v6 = vld [vmem:[#allocation15 + $0x28] sm:$0xff] }
 0xfe3   :  { %v1494_v46 = vpop.permute.xlu2 %1493 }
 0xfe4   :  { %v1496_v48 = vadd.f32 %v1494_v46, %v1490_v11 }
 0xfe6   :  { %2438 = vtanh.f32 %v1496_v48 }
 0xfec   :  { %v2439_v28 = vpop.eup %2438 }
 0xfed   :  { %v1498_v39 = vmul.f32 %v2439_v28, %v1489_v55 }
 0xfef   :  { %1500 = vrot.lane.b32.xlu0 %v1498_v39, %s2711_s0 }
0x1061   :  { %v1501_v42 = vpop.permute.xlu0 %1500 }
0x1062   :  { %1503 = vst.msk [vmem:[#allocation3 + $0x10] sm:$0xff] %vm170_vm0, %v1501_v42  ;;  %2312 = vmatmul.msk.f32.vlgmr.msrb.gmra.mxu2 %vm170_vm0, %v1501_v42  ;;  %2313 = vmatmul.msk.f32.vlgmr.msrb.gmra.mxu3 %vm170_vm0, %v1501_v42  ;;  %v1851_v42 = vld [vmem:[#allocation14 + $0x18] sm:$0xff] }
0x1063   :  { %1780 = vmatpush.msrb.mxu2 %v3303_v5  ;;  %1800 = vmatpush.msrb.mxu3 %v3305_v20 }
0x1065   :  { %1781 = vmatpush.msrb.mxu2 %v3307_v29  ;;  %1801 = vmatpush.msrb.mxu3 %v3311_v49 }
0x1067   :  { %1782 = vmatpush.msrb.mxu2 %v3313_v50  ;;  %1802 = vmatpush.msrb.mxu3 %v3315_v30 }
0x1069   :  { %1783 = vmatpush.msrb.mxu2 %v3321_v21  ;;  %1803 = vmatpush.msrb.mxu3 %v3323_v56 }
0x106b   :  { %1784 = vmatpush.msrb.mxu2 %v3329_v31  ;;  %1804 = vmatpush.msrb.mxu3 %v3331_v32 }
0x106d   :  { %1785 = vmatpush.msrb.mxu2 %v3350_v9  ;;  %1805 = vmatpush.msrb.mxu3 %v3352_v10 }
0x106f   :  { %1786 = vmatpush.msrb.mxu2 %v3358_v33  ;;  %1806 = vmatpush.msrb.mxu3 %v3360_v23 }
0x1071   :  { %1787 = vmatpush.msrb.mxu2 %v3362_v59  ;;  %1807 = vmatpush.msrb.mxu3 %v3366_v7 }
0x10e5   :  { %v1525_v43 = vpop.f32.mrf.mxu2  ;;  %v1545_v5 = vpop.f32.mrf.mxu3 }
0x10e6   :  { %v1548_v20 = vadd.f32 %v1525_v43, %v3282_v38  ;;  %v1549_v29 = vadd.f32 %v1545_v5, %v3284_v14  ;;  %v1928_v43 = vld [vmem:[#allocation15 + $0x18] sm:$0xff]  ;;  %v1850_v5 = vld [vmem:[#allocation14 + $0x10] sm:$0xff] }
0x10e8   :  { %2440 = vtanh.f32 %v1548_v20  ;;  %v1927_v20 = vld [vmem:[#allocation15 + $0x10] sm:$0xff] }
0x10e9   :  { %2442 = vtanh.f32 %v1549_v29  ;;  %v1849_v29 = vld [vmem:[#allocation14 + $0x8] sm:$0xff] }
0x10ee   :  { %v2441_v49 = vpop.eup %2440 }
0x10ef   :  { %v1552_v50 = vmul.f32 0.5, %v2441_v49  ;;  %v2443_v21 = vpop.eup %2442  ;;  %v1926_v49 = vld [vmem:[#allocation15 + $0x8] sm:$0xff] }
0x10f0   :  { %v1554_v10 = vmul.f32 0.5, %v2443_v21 }
0x10f1   :  { %v1553_v30 = vadd.f32 0.5, %v1552_v50  ;;  %v1848_v50 = vld [vmem:[#allocation14] sm:$0xff] }
0x10f2   :  { %v1555_v33 = vadd.f32 0.5, %v1554_v10 }
0x10f3   :  { %v1557_v56 = vmul.f32 %v2443_v21, %v1553_v30  ;;  %v1556_v31 = vmul.f32 %v1553_v30, %v1496_v48  ;;  %v1925_v30 = vld [vmem:[#allocation15] sm:$0xff] }
0x10f5   :  { %1559 = vrot.lane.b32.xlu1 %v1557_v56, %s2711_s0  ;;  %v1840_v56 = vld [vmem:[#allocation3] sm:$0xff] }
0x1167   :  { %v1560_v32 = vpop.permute.xlu1 %1559 }
0x1168   :  { %v1562_v9 = vadd.f32 %v1560_v32, %v1556_v31  ;;  %v1841_v31 = vld [vmem:[#allocation3 + $0x8] sm:$0xff]  ;;  %v1842_v32 = vld [vmem:[#allocation3 + $0x10] sm:$0xff] }
0x116a   :  { %2444 = vtanh.f32 %v1562_v9 }
0x1170   :  { %v2445_v23 = vpop.eup %2444 }
0x1171   :  { %v1564_v59 = vmul.f32 %v2445_v23, %v1555_v33 }
0x1173   :  { %1566 = vrot.lane.b32.xlu2 %v1564_v59, %s2711_s0 }
0x11cd   :  { %v1567_v38 = vpop.permute.xlu2 %1566 }
0x11ce   :  { %1569 = vst.msk [vmem:[#allocation3 + $0x18] sm:$0xff] %vm170_vm0, %v1567_v38  ;;  %2314 = vmatmul.msk.f32.vlgmr.msra.gmra.mxu0 %vm170_vm0, %v1567_v38  ;;  %2315 = vmatmul.msk.f32.vlgmr.msra.gmra.mxu1 %vm170_vm0, %v1567_v38 }
0x11cf   :  { %1892 = vmatpush.msra.mxu0 %v1855_v53  ;;  %1941 = vmatpush.msra.mxu1 %v1932_v41 }
0x11d1   :  { %1893 = vmatpush.msra.mxu0 %v1854_v22  ;;  %1942 = vmatpush.msra.mxu1 %v1931_v4 }
0x11d3   :  { %1894 = vmatpush.msra.mxu0 %v1853_v45  ;;  %1943 = vmatpush.msra.mxu1 %v1930_v6 }
0x124b   :  { %v1591_v14 = vpop.f32.mrf.mxu0  ;;  %v1611_v7 = vpop.f32.mrf.mxu1 }
0x124c   :  { %v1614_v44 = vadd.f32 %v1591_v14, %v3275_v16  ;;  %v1615_v52 = vadd.f32 %v1611_v7, %v3277_v34 }
0x124e   :  { %2446 = vtanh.f32 %v1614_v44 }
0x124f   :  { %2448 = vtanh.f32 %v1615_v52 }
0x1254   :  { %v2447_v24 = vpop.eup %2446 }
0x1255   :  { %v1618_v54 = vmul.f32 0.5, %v2447_v24  ;;  %v2449_v19 = vpop.eup %2448 }
0x1256   :  { %v1620_v2 = vmul.f32 0.5, %v2449_v19 }
0x1257   :  { %v1619_v25 = vadd.f32 0.5, %v1618_v54 }
0x1258   :  { %v1621_v18 = vadd.f32 0.5, %v1620_v2 }
0x1259   :  { %v1623_v57 = vmul.f32 %v2449_v19, %v1619_v25  ;;  %v1622_v58 = vmul.f32 %v1619_v25, %v1562_v9  ;;  %v1843_v9 = vld [vmem:[#allocation3 + $0x18] sm:$0xff] }
0x125b   :  { %1625 = vrot.lane.b32.xlu0 %v1623_v57, %s2711_s0 }
0x12cd   :  { %v1626_v26 = vpop.permute.xlu0 %1625 }
0x12ce   :  { %v1628_v17 = vadd.f32 %v1626_v26, %v1622_v58 }
0x12d0   :  { %2450 = vtanh.f32 %v1628_v17 }
0x12d6   :  { %v2451_v61 = vpop.eup %2450 }
0x12d7   :  { %v1630_v62 = vmul.f32 %v2451_v61, %v1621_v18 }
0x12d9   :  { %1632 = vrot.lane.b32.xlu1 %v1630_v62, %s2711_s0 }
0x134b   :  { %v1633_v16 = vpop.permute.xlu1 %1632 }
0x134c   :  { %1635 = vst.msk [vmem:[#allocation3 + $0x20] sm:$0xff] %vm170_vm0, %v1633_v16  ;;  %2316 = vmatmul.msk.f32.vlgmr.msra.gmra.mxu2 %vm170_vm0, %v1633_v16  ;;  %2317 = vmatmul.msk.f32.vlgmr.msra.gmra.mxu3 %vm170_vm0, %v1633_v16 }
0x1353   :  { %v1844_v10 = vld [vmem:[#allocation3 + $0x20] sm:$0xff] }
0x13cf   :  { %v1657_v34 = vpop.f32.mrf.mxu2  ;;  %v1677_v35 = vpop.f32.mrf.mxu3 }
0x13d0   :  { %v1680_v36 = vadd.f32 %v1657_v34, %v3268_v63  ;;  %v1681_v37 = vadd.f32 %v1677_v35, %v3270_v15  ;;  %v1852_v63 = vld [vmem:[#allocation14 + $0x20] sm:$0xff] }
0x13d1   :  { %v1929_v15 = vld [vmem:[#allocation15 + $0x20] sm:$0xff]  ;;  %1895 = vmatpush.msra.mxu0 %v1852_v63 }
0x13d2   :  { %2452 = vtanh.f32 %v1680_v36  ;;  %1944 = vmatpush.msra.mxu1 %v1929_v15 }
0x13d3   :  { %2454 = vtanh.f32 %v1681_v37  ;;  %1896 = vmatpush.msra.mxu0 %v1851_v42 }
0x13d4   :  { %1945 = vmatpush.msra.mxu1 %v1928_v43 }
0x13d5   :  { %1897 = vmatpush.msra.mxu0 %v1850_v5 }
0x13d6   :  { %1946 = vmatpush.msra.mxu1 %v1927_v20 }
0x13d7   :  { %1898 = vmatpush.msra.mxu0 %v1849_v29 }
0x13d8   :  { %v2453_v13 = vpop.eup %2452  ;;  %1947 = vmatpush.msra.mxu1 %v1926_v49 }
0x13d9   :  { %v1684_v12 = vmul.f32 0.5, %v2453_v13  ;;  %v2455_v3 = vpop.eup %2454  ;;  %1899 = vmatpush.msra.mxu0 %v1848_v50 }
0x13da   :  { %v1686_v60 = vmul.f32 0.5, %v2455_v3  ;;  %1948 = vmatpush.msra.mxu1 %v1925_v30 }
0x13db   :  { %v1685_v51 = vadd.f32 0.5, %v1684_v12 }
0x13dc   :  { %v1687_v55 = vadd.f32 0.5, %v1686_v60 }
0x13dd   :  { %v1689_v40 = vmul.f32 %v2455_v3, %v1685_v51  ;;  %v1688_v11 = vmul.f32 %v1685_v51, %v1628_v17 }
0x13df   :  { %1691 = vrot.lane.b32.xlu2 %v1689_v40, %s2711_s0 }
0x1439   :  { %v1692_v46 = vpop.permute.xlu2 %1691 }
0x143a   :  { %v3527_v48 = vadd.f32 %v1692_v46, %v1688_v11 }
0x143c   :  { %2456 = vtanh.f32 %v3527_v48 }
0x1442   :  { %v2457_v28 = vpop.eup %2456 }
0x1443   :  { %v1696_v39 = vmul.f32 %v2457_v28, %v1687_v55 }
0x1445   :  { %1698 = vrot.lane.b32.xlu0 %v1696_v39, %s2711_s0 }
0x14b7   :  { %v1699_v21 = vpop.permute.xlu0 %1698 }
0x14b8   :  { %1701 = vst.msk [vmem:[#allocation3 + $0x28] sm:$0xff] %vm170_vm0, %v1699_v21  ;;  %2318 = vmatmul.msk.f32.vlgmr.msrb.gmra.mxu0 %vm170_vm0, %v1699_v21  ;;  %2319 = vmatmul.msk.f32.vlgmr.msrb.gmra.mxu1 %vm170_vm0, %v1699_v21 }
0x14bf   :  { %v1845_v33 = vld [vmem:[#allocation3 + $0x28] sm:$0xff] }
0x14c0   :  { %2322 = vmatmul.msk.f32.vlgmr.msra.gmra.mxu0 %vm170_vm0, %v1840_v56  ;;  %2330 = vmatmul.msk.f32.vlgmr.msra.gmra.mxu1 %vm170_vm0, %v1840_v56 }
0x14c8   :  { %2323 = vmatmul.msk.f32.gmra.mxu0 %vm170_vm0, %v1841_v31  ;;  %2331 = vmatmul.msk.f32.gmra.mxu1 %vm170_vm0, %v1841_v31 }
0x14d0   :  { %2324 = vmatmul.msk.f32.gmra.mxu0 %vm170_vm0, %v1842_v32  ;;  %2332 = vmatmul.msk.f32.gmra.mxu1 %vm170_vm0, %v1842_v32 }
0x14d8   :  { %2325 = vmatmul.msk.f32.gmra.mxu0 %vm170_vm0, %v1843_v9  ;;  %2333 = vmatmul.msk.f32.gmra.mxu1 %vm170_vm0, %v1843_v9 }
0x14e0   :  { %2326 = vmatmul.msk.f32.gmra.mxu0 %vm170_vm0, %v1844_v10  ;;  %2334 = vmatmul.msk.f32.gmra.mxu1 %vm170_vm0, %v1844_v10 }
0x14e8   :  { %2327 = vmatmul.msk.f32.gmra.mxu0 %vm170_vm0, %v1845_v33  ;;  %2335 = vmatmul.msk.f32.gmra.mxu1 %vm170_vm0, %v1845_v33 }
0x1535   :  { %v1723_v23 = vpop.f32.mrf.mxu0  ;;  %v1743_v59 = vpop.f32.mrf.mxu1 }
0x1536   :  { %v1746_v38 = vadd.f32 %v1723_v23, %v3261_v8  ;;  %v1747_v14 = vadd.f32 %v1743_v59, %v3263_v1  ;;  %v3556_v1 = vld [vmem:[%s3679_s7] ss:$0 sm:$0xff] }
0x1538   :  { %2458 = vtanh.f32 %v1746_v38 }
0x1539   :  { %2460 = vtanh.f32 %v1747_v14 }
0x153d   :  { %v3548_v7 = vpop.f32.mrf.mxu0  ;;  %v3550_v44 = vpop.f32.mrf.mxu1 }
0x153e   :  { %v2459_v52 = vpop.eup %2458 }
0x153f   :  { %v1750_v24 = vmul.f32 0.5, %v2459_v52  ;;  %v2461_v25 = vpop.eup %2460  ;;  %v2013_v52 = vld [vmem:[%s3680_s8 + $0x38] sm:$0xff] }
0x1540   :  { %v1752_v63 = vmul.f32 0.5, %v2461_v25  ;;  %2050 = vmatpush.msra.mxu2 %v2013_v52 }
0x1541   :  { %v1751_v54 = vadd.f32 0.5, %v1750_v24 }
0x1542   :  { %v1753_v15 = vadd.f32 0.5, %v1752_v63 }
0x1543   :  { %v1755_v19 = vmul.f32 %v2461_v25, %v1751_v54  ;;  %v1754_v4 = vmul.f32 %v1751_v54, %v3527_v48 }
0x1545   :  { %1757 = vrot.lane.b32.xlu1 %v1755_v19, %s2711_s0  ;;  %v1904_v57 = vpop.f32.mrf.mxu0  ;;  %v1953_v58 = vpop.f32.mrf.mxu1  ;;  %v2012_v19 = vld [vmem:[%s3680_s8 + $0x30] sm:$0xff] }
0x1546   :  { %v1905_v42 = vadd.f32 %v3556_v1, %v1904_v57  ;;  %2051 = vmatpush.msra.mxu2 %v2012_v19  ;;  %v2011_v57 = vld [vmem:[%s3680_s8 + $0x28] sm:$0xff] }
0x1548   :  { %2052 = vmatpush.msra.mxu2 %v2011_v57 }
0x154d   :  { %v1907_v26 = vpop.f32.mrf.mxu0  ;;  %v1956_v17 = vpop.f32.mrf.mxu1 }
0x154e   :  { %v1908_v13 = vadd.f32 %v3556_v1, %v1907_v26  ;;  %v2009_v26 = vld [vmem:[%s3680_s8 + $0x18] sm:$0xff] }
0x1555   :  { %v1910_v8 = vpop.f32.mrf.mxu0  ;;  %v1959_v2 = vpop.f32.mrf.mxu1 }
0x1556   :  { %v1911_v18 = vadd.f32 %v3556_v1, %v1910_v8  ;;  %v2007_v8 = vld [vmem:[%s3680_s8 + $0x8] sm:$0xff] }
0x155d   :  { %v1913_v61 = vpop.f32.mrf.mxu0  ;;  %v1962_v62 = vpop.f32.mrf.mxu1 }
0x155e   :  { %v1914_v16 = vadd.f32 %v3556_v1, %v1913_v61  ;;  %v1983_v34 = vadd.f32 %v1962_v62, %v1911_v18  ;;  %v1902_v18 = vadd.f32 %v3556_v1, %v3548_v7 }
0x1560   :  { %v1986_v35 = vadd.f32 %v1959_v2, %v1914_v16  ;;  %v1984_v36 = vmax.f32 %v1983_v34, 0.0  ;;  %v2006_v2 = vld [vmem:[%s3680_s8] sm:$0xff] }
0x1562   :  { %v1987_v37 = vmax.f32 %v1986_v35, 0.0  ;;  %1985 = vst.msk [vmem:[#allocation4 + $0x30] sm:$0xff] %vm170_vm0, %v1984_v36 }
0x1564   :  { %1988 = vst.msk [vmem:[#allocation4 + $0x40] sm:$0xff] %vm170_vm0, %v1987_v37 }
0x1565   :  { %v1916_v12 = vpop.f32.mrf.mxu0  ;;  %v1965_v51 = vpop.f32.mrf.mxu1 }
0x1566   :  { %v1917_v3 = vadd.f32 %v3556_v1, %v1916_v12  ;;  %v1980_v40 = vadd.f32 %v1965_v51, %v1908_v13 }
0x1568   :  { %v1989_v53 = vadd.f32 %v1956_v17, %v1917_v3  ;;  %v1981_v41 = vmax.f32 %v1980_v40, 0.0  ;;  %v2008_v17 = vld [vmem:[%s3680_s8 + $0x10] sm:$0xff] }
0x1569   :  { %v2001_v51 = vld [vmem:[#allocation4 + $0x30] sm:$0xff] }
0x156a   :  { %v1990_v22 = vmax.f32 %v1989_v53, 0.0  ;;  %1982 = vst.msk [vmem:[#allocation4 + $0x20] sm:$0xff] %vm170_vm0, %v1981_v41 }
0x156b   :  { %v2002_v3 = vld [vmem:[#allocation4 + $0x40] sm:$0xff] }
0x156c   :  { %1991 = vst.msk [vmem:[#allocation4 + $0x50] sm:$0xff] %vm170_vm0, %v1990_v22  ;;  %v2092_v22 = vld [vmem:[%s3682_s10 + $0x8] sm:$0xff] }
0x1571   :  { %v2000_v7 = vld [vmem:[#allocation4 + $0x20] sm:$0xff] }
0x1573   :  { %v2003_v40 = vld [vmem:[#allocation4 + $0x50] sm:$0xff] }
0x15b7   :  { %v1758_v45 = vpop.permute.xlu1 %1757 }
0x15b8   :  { %v1760_v6 = vadd.f32 %v1758_v45, %v1754_v4  ;;  %v2091_v4 = vld [vmem:[%s3682_s10] sm:$0xff] }
0x15b9   :  { %v2372_v45 = vld [vmem:[%s3681_s9] ss:$0 sm:$0xff]  ;;  %s2712_s9 = smov [#allocation18]  }
0x15ba   :  { %2462 = vtanh.f32 %v1760_v6 }
0x15c0   :  { %v2463_v11 = vpop.eup %2462 }
0x15c1   :  { %v1762_v46 = vmul.f32 %v2463_v11, %v1753_v15 }
0x15c3   :  { %1764 = vrot.lane.b32.xlu2 %v1762_v46, %s2711_s0 }
0x15cb   :  { %986 = vrot.lane.b32.xlu2 %v3345_v47, %s2711_s0 }
0x161d   :  { %v1765_v60 = vpop.permute.xlu2 %1764 }
0x161e   :  { %1767 = vst.msk [vmem:[#allocation3 + $0x30] sm:$0xff] %vm170_vm0, %v1765_v60  ;;  %2320 = vmatmul.msk.f32.vlgmr.msrb.gmra.mxu2 %vm170_vm0, %v1765_v60  ;;  %2321 = vmatmul.msk.f32.vlgmr.msrb.gmra.mxu3 %vm170_vm0, %v1765_v60 }
0x1625   :  { %v987_v48 = vpop.permute.xlu2 %986  ;;  %v1846_v55 = vld [vmem:[#allocation3 + $0x30] sm:$0xff] }
0x1626   :  { %989 = vst.msk [vmem:[#allocation20] sm:$0xff] %vm170_vm0, %v987_v48  ;;  %2328 = vmatmul.msk.f32.gmra.mxu0 %vm170_vm0, %v1846_v55  ;;  %2336 = vmatmul.msk.f32.gmra.mxu1 %vm170_vm0, %v1846_v55 }
0x16a1   :  { %v1789_v28 = vpop.f32.mrf.mxu2  ;;  %v1809_v39 = vpop.f32.mrf.mxu3 }
0x16a2   :  { %v1812_v47 = vadd.f32 %v1789_v28, %v3433_v27  ;;  %v1813_v20 = vadd.f32 %v1809_v39, %v3436_v0 }
0x16a3   :  { %v1919_v43 = vpop.f32.mrf.mxu0  ;;  %v1968_v5 = vpop.f32.mrf.mxu1 }
0x16a4   :  { %2464 = vtanh.f32 %v1812_v47  ;;  %v1920_v29 = vadd.f32 %v3556_v1, %v1919_v43  ;;  %v1977_v49 = vadd.f32 %v1968_v5, %v1905_v42 }
0x16a5   :  { %2466 = vtanh.f32 %v1813_v20 }
0x16a6   :  { %v1992_v50 = vadd.f32 %v1953_v58, %v1920_v29  ;;  %v1978_v30 = vmax.f32 %v1977_v49, 0.0  ;;  %v2010_v58 = vld [vmem:[%s3680_s8 + $0x20] sm:$0xff] }
0x16a7   :  { %2053 = vmatpush.msra.mxu2 %v2010_v58 }
0x16a8   :  { %v1993_v21 = vmax.f32 %v1992_v50, 0.0  ;;  %1979 = vst.msk [vmem:[#allocation4 + $0x10] sm:$0xff] %vm170_vm0, %v1978_v30 }
0x16a9   :  { %2054 = vmatpush.msra.mxu2 %v2009_v26 }
0x16aa   :  { %v2465_v56 = vpop.eup %2464  ;;  %1994 = vst.msk [vmem:[#allocation4 + $0x60] sm:$0xff] %vm170_vm0, %v1993_v21 }
0x16ab   :  { %v1816_v31 = vmul.f32 0.5, %v2465_v56  ;;  %v2467_v27 = vpop.eup %2466  ;;  %2055 = vmatpush.msra.mxu2 %v2008_v17 }
0x16ac   :  { %v1818_v23 = vmul.f32 0.5, %v2467_v27 }
0x16ad   :  { %v1817_v32 = vadd.f32 0.5, %v1816_v31  ;;  %2056 = vmatpush.msra.mxu2 %v2007_v8 }
0x16ae   :  { %v1819_v59 = vadd.f32 0.5, %v1818_v23 }
0x16af   :  { %v1821_v9 = vmul.f32 %v2467_v27, %v1817_v32  ;;  %v1820_v10 = vmul.f32 %v1817_v32, %v1760_v6  ;;  %2057 = vmatpush.msra.mxu2 %v2006_v2  ;;  %v1999_v12 = vld [vmem:[#allocation4 + $0x10] sm:$0xff] }
0x16b1   :  { %1823 = vrot.lane.b32.xlu0 %v1821_v9, %s2711_s0  ;;  %v2004_v53 = vld [vmem:[#allocation4 + $0x60] sm:$0xff] }
0x16b2   :  { %v2373_v9 = vld [vmem:[%s3683_s11] ss:$0 sm:$0xff]  ;;  %s2714_s11 = smov [#allocation17]  }
0x16b3   :  { %s2177_s14 = sshll.u32 %s2714_s11, 4  ;;  %s2178_s14 = int_to_ptr.vmem [resolvable:$true] %s2177_s14 }
0x1723   :  { %v1824_v0 = vpop.permute.xlu0 %1823 }
0x1724   :  { %v1826_v33 = vadd.f32 %v1824_v0, %v1820_v10 }
0x1726   :  { %2468 = vtanh.f32 %v1826_v33  ;;  %1836 = vrot.lane.b32.xlu0 %v1826_v33, %s2711_s0 }
0x172c   :  { %v2469_v38 = vpop.eup %2468 }
0x172d   :  { %v1828_v14 = vmul.f32 %v2469_v38, %v1819_v59 }
0x172f   :  { %1830 = vrot.lane.b32.xlu1 %v1828_v14, %s2711_s0 }
0x1798   :  { %v1837_v24 = vpop.permute.xlu0 %1836 }
0x1799   :  { %1839 = vst.msk [vmem:[#allocation20 + $0x8] sm:$0xff] %vm170_vm0, %v1837_v24 }
0x17a1   :  { %v1831_v54 = vpop.permute.xlu1 %1830 }
0x17a2   :  { %1833 = vst.msk [vmem:[#allocation3 + $0x38] sm:$0xff] %vm170_vm0, %v1831_v54 }
0x17a3   :  { %1834 = vst.msk [vmem:[#allocation18 + $0x8] sm:$0xff] %vm170_vm0, %v1831_v54 }
0x17a9   :  { %v1847_v25 = vld [vmem:[#allocation3 + $0x38] sm:$0xff] }
0x17aa   :  { %2329 = vmatmul.msk.f32.gmra.mxu0 %vm170_vm0, %v1847_v25  ;;  %2337 = vmatmul.msk.f32.gmra.mxu1 %vm170_vm0, %v1847_v25 }
0x1827   :  { %v1922_v61 = vpop.f32.mrf.mxu0  ;;  %v1971_v62 = vpop.f32.mrf.mxu1 }
0x1828   :  { %v1923_v16 = vadd.f32 %v3556_v1, %v1922_v61  ;;  %v1974_v34 = vadd.f32 %v1971_v62, %v1902_v18  ;;  %v2093_v1 = vld [vmem:[%s3682_s10 + $0x10] sm:$0xff] }
0x182a   :  { %v1995_v35 = vadd.f32 %v3550_v44, %v1923_v16  ;;  %v1975_v36 = vmax.f32 %v1974_v34, 0.0  ;;  %v2094_v44 = vld [vmem:[%s3682_s10 + $0x18] sm:$0xff]  ;;  %s2190_s10 = sshll.u32 %s2712_s9, 4  ;;  %s2191_s10 = int_to_ptr.vmem [resolvable:$true] %s2190_s10 }
0x182b   :  { %2136 = vmatpush.msra.mxu3 %v2094_v44  ;;  %2198 = dma.vmem_to_hbm [thread:$0]  %s2191_s10, 256, %s2193_s21, [#allocation19], %s2707_s2, %s2707_s2, %s2708_s3  }
0x182c   :  { %v1996_v37 = vmax.f32 %v1995_v35, 0.0  ;;  %1976 = vst.msk [vmem:[#allocation4] sm:$0xff] %vm170_vm0, %v1975_v36  ;;  %2211 = dma.vmem_to_hbm [thread:$0]  %s2204_s30, 256, %s2206_s18, [#allocation19], %s2707_s2, %s2707_s2, %s2708_s3  }
0x182d   :  { %2137 = vmatpush.msra.mxu3 %v2093_v1 }
0x182e   :  { %1997 = vst.msk [vmem:[#allocation4 + $0x70] sm:$0xff] %vm170_vm0, %v1996_v37 }
0x182f   :  { %2138 = vmatpush.msra.mxu3 %v2092_v22 }
0x1831   :  { %2139 = vmatpush.msra.mxu3 %v2091_v4 }
0x1833   :  { %v1998_v13 = vld [vmem:[#allocation4] sm:$0xff] }
0x1834   :  { %2338 = vmatmul.msk.f32.vlgmr.msra.gmra.mxu2 %vm170_vm0, %v1998_v13 }
0x1835   :  { %v2005_v41 = vld [vmem:[#allocation4 + $0x70] sm:$0xff] }
0x183c   :  { %2339 = vmatmul.msk.f32.gmra.mxu2 %vm170_vm0, %v1999_v12 }
0x1844   :  { %2340 = vmatmul.msk.f32.gmra.mxu2 %vm170_vm0, %v2000_v7 }
0x184c   :  { %2341 = vmatmul.msk.f32.gmra.mxu2 %vm170_vm0, %v2001_v51 }
0x1854   :  { %2342 = vmatmul.msk.f32.gmra.mxu2 %vm170_vm0, %v2002_v3 }
0x185c   :  { %2343 = vmatmul.msk.f32.gmra.mxu2 %vm170_vm0, %v2003_v40 }
0x1864   :  { %2344 = vmatmul.msk.f32.gmra.mxu2 %vm170_vm0, %v2004_v53 }
0x186c   :  { %2345 = vmatmul.msk.f32.gmra.mxu2 %vm170_vm0, %v2005_v41 }
0x18b7   :  { %v2059_v6 = vpop.f32.mrf.mxu2 }
0x18b8   :  { %v2060_v63 = vadd.f32 %v2372_v45, %v2059_v6 }
0x18ba   :  { %v2083_v15 = vmax.f32 %v2060_v63, 0.0 }
0x18bc   :  { %2346 = vmatmul.msk.f32.vlgmr.msra.gmra.mxu3 %vm2099_vm1, %v2083_v15 }
0x18bf   :  { %v2062_v11 = vpop.f32.mrf.mxu2 }
0x18c0   :  { %v2063_v46 = vadd.f32 %v2372_v45, %v2062_v11 }
0x18c2   :  { %v2084_v60 = vmax.f32 %v2063_v46, 0.0 }
0x18c4   :  { %2347 = vmatmul.msk.f32.gmra.mxu3 %vm2099_vm1, %v2084_v60 }
0x18c7   :  { %v2065_v48 = vpop.f32.mrf.mxu2 }
0x18c8   :  { %v2066_v55 = vadd.f32 %v2372_v45, %v2065_v48 }
0x18ca   :  { %v2085_v28 = vmax.f32 %v2066_v55, 0.0 }
0x18cc   :  { %2348 = vmatmul.msk.f32.gmra.mxu3 %vm2099_vm1, %v2085_v28 }
0x18cf   :  { %v2068_v39 = vpop.f32.mrf.mxu2 }
0x18d0   :  { %v2069_v42 = vadd.f32 %v2372_v45, %v2068_v39 }
0x18d2   :  { %v2086_v47 = vmax.f32 %v2069_v42, 0.0 }
0x18d4   :  { %2349 = vmatmul.msk.f32.gmra.mxu3 %vm2099_vm1, %v2086_v47 }
0x18d7   :  { %v2071_v43 = vpop.f32.mrf.mxu2 }
0x18d8   :  { %v2072_v5 = vadd.f32 %v2372_v45, %v2071_v43 }
0x18da   :  { %v2087_v20 = vmax.f32 %v2072_v5, 0.0 }
0x18dc   :  { %2350 = vmatmul.msk.f32.gmra.mxu3 %vm2099_vm1, %v2087_v20 }
0x18df   :  { %v2074_v29 = vpop.f32.mrf.mxu2 }
0x18e0   :  { %v2075_v49 = vadd.f32 %v2372_v45, %v2074_v29 }
0x18e2   :  { %v2088_v50 = vmax.f32 %v2075_v49, 0.0 }
0x18e4   :  { %2351 = vmatmul.msk.f32.gmra.mxu3 %vm2099_vm1, %v2088_v50 }
0x18e7   :  { %v2077_v30 = vpop.f32.mrf.mxu2 }
0x18e8   :  { %v2078_v21 = vadd.f32 %v2372_v45, %v2077_v30 }
0x18ea   :  { %v2089_v56 = vmax.f32 %v2078_v21, 0.0 }
0x18ec   :  { %2352 = vmatmul.msk.f32.gmra.mxu3 %vm2099_vm1, %v2089_v56 }
0x18ef   :  { %v2080_v31 = vpop.f32.mrf.mxu2 }
0x18f0   :  { %v2081_v32 = vadd.f32 %v2372_v45, %v2080_v31 }
0x18f2   :  { %v2090_v27 = vmax.f32 %v2081_v32, 0.0 }
0x18f4   :  { %2353 = vmatmul.msk.f32.gmra.mxu3 %vm2099_vm1, %v2090_v27 }
0x193f   :  { %v2141_v10 = vpop.f32.mrf.mxu3 }
0x1940   :  { %v2142_v0 = vadd.f32 %v2373_v9, %v2141_v10 }
0x1942   :  { %2165 = vst [vmem:[#allocation17] sm:$0xff] %v2142_v0 }
0x1947   :  { %v2144_v33 = vpop.f32.mrf.mxu3 }
0x1948   :  { %v2145_v23 = vadd.f32 %v2373_v9, %v2144_v33 }
0x194a   :  { %2166 = vst [vmem:[#allocation17 + $0x8] sm:$0xff] %v2145_v23 }
0x194f   :  { %v2147_v59 = vpop.f32.mrf.mxu3 }
0x1950   :  { %v2148_v38 = vadd.f32 %v2373_v9, %v2147_v59 }
0x1952   :  { %2167 = vst [vmem:[#allocation17 + $0x10] sm:$0xff] %v2148_v38 }
0x1957   :  { %v2150_v14 = vpop.f32.mrf.mxu3 }
0x1958   :  { %v2151_v52 = vadd.f32 %v2373_v9, %v2150_v14 }
0x195a   :  { %2168 = vst [vmem:[#allocation17 + $0x18] sm:$0xff] %v2151_v52 }
0x195f   :  { %v2153_v24 = vpop.f32.mrf.mxu3 }
0x1960   :  { %v2154_v54 = vadd.f32 %v2373_v9, %v2153_v24 }
0x1962   :  { %2169 = vst [vmem:[#allocation17 + $0x20] sm:$0xff] %v2154_v54 }
0x1967   :  { %v2156_v25 = vpop.f32.mrf.mxu3 }
0x1968   :  { %v2157_v19 = vadd.f32 %v2373_v9, %v2156_v25 }
0x196a   :  { %2170 = vst [vmem:[#allocation17 + $0x28] sm:$0xff] %v2157_v19 }
0x196f   :  { %v2159_v57 = vpop.f32.mrf.mxu3 }
0x1970   :  { %v2160_v58 = vadd.f32 %v2373_v9, %v2159_v57 }
0x1972   :  { %2171 = vst [vmem:[#allocation17 + $0x30] sm:$0xff] %v2160_v58 }
0x1977   :  { %v2162_v26 = vpop.f32.mrf.mxu3 }
0x1978   :  { %v2163_v17 = vadd.f32 %v2373_v9, %v2162_v26 }
0x197a   :  { %2172 = vst [vmem:[#allocation17 + $0x38] sm:$0xff] %v2163_v17 }
0x197b   :  { %2185 = dma.vmem_to_hbm [thread:$0]  %s2178_s14, 1024, %s2180_s23, [#allocation8], %s2707_s2, %s2707_s2, %s2708_s3  }
0x197c   :  { %2694 = dma.done.wait [#allocation8], 1024  }
0x197d   :  { %2695 = vsyncadd [#allocation8], 4294966272 }
0x197e   :  { %2696 = dma.done.wait [#allocation19], 512  }
0x197f   :  { %2697 = vsyncadd [#allocation19], 4294966784 }
0x1980   :  { %2224 = vsyncpa [#allocation7], 1 }
0x1981   :  { %2225 = vsyncpa [#allocation10], 1 }
0x1982   :  { %2226 = vsyncpa [#allocation13], 1 }
0x1983   :  { %2227 = vsyncpa [#allocation16], 1 }
0x1984   :  { %2228 = vsyncpa [#allocation8], 1 }
0x1985   :  { %2229 = vsyncpa [#allocation19], 1 }

</bundles_post_ra>
